<compile_context>
chip_gen: v7x
topology: tpu7x:2x2x1
jax: 0.10.0
libtpu: 0.0.40
codegen_flags: <defaults>
</compile_context>

<pallas_src>
import jax
import jax.numpy as jnp
import numpy as np
from jax import lax
from jax.experimental import pallas as pl
from jax.experimental.pallas import tpu as pltpu


def _sigmoid(x):
    # exp -> EUP, approximate reciprocal -> EUP; keeps the VPU free.
    return pl.reciprocal(1.0 + jnp.exp(-x), approx=True)


# ------------------------------ fused kernel --------------------------------

def _net_kernel(x_ref, w1b_ref, b1r_ref, w2b_ref, b2r_ref,
                we1_ref, be1_ref, we2_ref, be2_ref,
                wd1_ref, bd1_ref, wd2_ref, bd2_ref,
                out_ref, rho_ref,
                xpad_s, p1pad_s):
    TB = x_ref.shape[0]                     # batch tile
    L = we2_ref.shape[1]                    # latent size
    f32 = jnp.float32
    bf16 = jnp.bfloat16

    # -------- conv1: 1->16, 3x3, pad=1 as 3 banded MXU matmuls --------
    # xpad_s: H zero-padded input, (TB, 30, 32); W padding is folded into the
    # band matrix, lane columns 28..31 are always zero.
    xpad_s[...] = jnp.zeros((TB, 30, 32), f32)
    xpad_s[:, 1:29, 0:28] = x_ref[...]

    a1 = jnp.zeros((TB * 28, 512), f32)
    for dy in range(3):
        lhs = xpad_s[:, dy:dy + 28, :].reshape(TB * 28, 32).astype(bf16)
        a1 = a1 + jnp.dot(lhs, w1b_ref[dy], preferred_element_type=f32)
    a1 = a1 + b1r_ref[...]
    # a1 lane layout: lane = parity*256 + co*14 + xh, output x = 2*xh + parity.

    # -------- maxpool 2x2 : 28x28 -> 14x14 --------
    r1 = a1.reshape(TB, 14, 2, 512)                           # split H (leading dims)
    h1 = jnp.maximum(r1[:, :, 0, :], r1[:, :, 1, :])          # (TB,14,512)
    p1 = jnp.maximum(h1[:, :, 0:224], h1[:, :, 256:480])      # (TB,14,224), lane = ci*14 + x

    # -------- conv2: 16->32, 3x3, pad=1 as 3 banded MXU matmuls --------
    p1pad_s[...] = jnp.zeros((TB, 16, 224), f32)              # H zero pad rows 0,15
    p1pad_s[:, 1:15, :] = p1

    a2 = jnp.zeros((TB * 14, 512), f32)
    for dy in range(3):
        lhs = p1pad_s[:, dy:dy + 14, :].reshape(TB * 14, 224).astype(bf16)
        a2 = a2 + jnp.dot(lhs, w2b_ref[dy], preferred_element_type=f32)
    a2 = a2 + b2r_ref[...]
    # a2 lane layout: lane = parity*256 + co*7 + xh, output x = 2*xh + parity.

    # -------- maxpool 2x2 : 14x14 -> 7x7 --------
    r2 = a2.reshape(TB, 7, 2, 512)
    h2 = jnp.maximum(r2[:, :, 0, :], r2[:, :, 1, :])          # (TB,7,512)
    p2 = jnp.maximum(h2[:, :, 0:224], h2[:, :, 256:480])      # (TB,7,224), lane = co*7 + w

    # -------- encoder: flatten fused into enc_fc1 (7 accumulated dots) --------
    acc = jnp.zeros((TB, 128), f32)
    for h in range(7):
        acc = acc + jnp.dot(p2[:, h, :].astype(bf16), we1_ref[h],
                            preferred_element_type=f32)
    e1 = _sigmoid(acc + be1_ref[...])
    e2 = _sigmoid(jnp.dot(e1.astype(bf16), we2_ref[...],
                          preferred_element_type=f32) + be2_ref[...])

    # fused data_rho partial sums (per-tile latent column sums)
    s = jnp.sum(e2, axis=0, keepdims=True)                    # (1, L)
    rho_ref[0] = jnp.broadcast_to(s, (8, L))

    # -------- decoder --------
    d1 = _sigmoid(jnp.dot(e2.astype(bf16), wd1_ref[...],
                          preferred_element_type=f32) + bd1_ref[...])
    d2 = _sigmoid(jnp.dot(d1.astype(bf16), wd2_ref[...],
                          preferred_element_type=f32) + bd2_ref[...])
    out_ref[...] = d2                                         # (TB, 784), lane-dense


# ---------------------------- parameter handling -----------------------------

def init_params(key, latent_size=16):
    """PyTorch-default-style U(-1/sqrt(fan_in), 1/sqrt(fan_in)) init, PyTorch layouts."""
    def lin(k, fan_in, fan_out):
        k1, k2 = jax.random.split(k)
        bound = 1.0 / jnp.sqrt(jnp.float32(fan_in))
        w = jax.random.uniform(k1, (fan_in, fan_out), jnp.float32, -bound, bound)
        b = jax.random.uniform(k2, (fan_out,), jnp.float32, -bound, bound)
        return w, b

    def conv(k, cin, cout, ks=3):
        k1, k2 = jax.random.split(k)
        fan_in = cin * ks * ks
        bound = 1.0 / jnp.sqrt(jnp.float32(fan_in))
        w = jax.random.uniform(k1, (cout, cin, ks, ks), jnp.float32, -bound, bound)
        b = jax.random.uniform(k2, (cout,), jnp.float32, -bound, bound)
        return w, b

    keys = jax.random.split(key, 6)
    return {
        "conv1": conv(keys[0], 1, 16),
        "conv2": conv(keys[1], 16, 32),
        "enc_fc1": lin(keys[2], 1568, 128),   # rows in PyTorch (c, h, w) flatten order
        "enc_fc2": lin(keys[3], 128, latent_size),
        "dec_fc1": lin(keys[4], latent_size, 128),
        "dec_fc2": lin(keys[5], 128, 28 * 28),
    }


def _conv1_band(w1, b1):
    """Banded conv1 weights: (3, 32, 512) bf16.  out lane = parity*256 + co*14 + xh."""
    dy = np.arange(3)[:, None, None]
    j = np.arange(32)[None, :, None]
    lane = np.arange(512)[None, None, :]
    parity, rem = lane // 256, lane % 256
    co, xh = rem // 14, rem % 14
    x = 2 * xh + parity
    dx = j - x + 1
    valid = (rem < 224) & (j < 28) & (dx >= 0) & (dx <= 2)
    co_i = np.where(valid, co, 0)
    dy_i = np.broadcast_to(dy, valid.shape if valid.shape[0] == 3 else (3,) + valid.shape[1:])
    dx_i = np.where(valid, dx, 0)
    w1c = w1.reshape(16, 3, 3)
    band = jnp.where(valid, w1c[co_i, dy_i, dx_i], 0.0).astype(jnp.bfloat16)

    lane1 = np.arange(512)
    rem1 = lane1 % 256
    bmask = rem1 < 224
    bco = np.where(bmask, rem1 // 14, 0)
    b1row = jnp.where(bmask, b1[bco], 0.0).reshape(1, 512).astype(jnp.float32)
    return band, b1row


def _conv2_band(w2, b2):
    """Banded conv2 weights: (3, 224, 512) bf16.  in lane = ci*14 + jx,
    out lane = parity*256 + co*7 + xh."""
    dy = np.arange(3)[:, None, None]
    r = np.arange(224)[None, :, None]
    lane = np.arange(512)[None, None, :]
    ci, jx = r // 14, r % 14
    parity, rem = lane // 256, lane % 256
    co, xh = rem // 7, rem % 7
    x2 = 2 * xh + parity
    dx = jx - x2 + 1
    valid = (rem < 224) & (dx >= 0) & (dx <= 2)
    co_i = np.where(valid, co, 0)
    dy_i = np.broadcast_to(dy, (3,) + valid.shape[1:])
    dx_i = np.where(valid, dx, 0)
    band = jnp.where(valid, w2[co_i, ci, dy_i, dx_i], 0.0).astype(jnp.bfloat16)

    lane1 = np.arange(512)
    rem1 = lane1 % 256
    bmask = rem1 < 224
    bco = np.where(bmask, rem1 // 7, 0)
    b2row = jnp.where(bmask, b2[bco], 0.0).reshape(1, 512).astype(jnp.float32)
    return band, b2row


def _enc_fc1_pack(we1):
    """(1568,128) -> (7,224,128): row (h, co*7+w) = we1[co*49 + h*7 + w]."""
    h = np.arange(7)[:, None]
    lane = np.arange(224)[None, :]
    co, w = lane // 7, lane % 7
    fidx = co * 49 + h * 7 + w            # (7, 224)
    return we1[fidx].astype(jnp.bfloat16)


def _pack_params(params):
    """Repack PyTorch-layout weights into kernel layouts (tiny one-off XLA ops)."""
    w1, b1 = params["conv1"]       # (16,1,3,3), (16,)
    w2, b2 = params["conv2"]       # (32,16,3,3), (32,)
    we1, be1 = params["enc_fc1"]   # (1568,128), (128,)
    we2, be2 = params["enc_fc2"]   # (128,L), (L,)
    wd1, bd1 = params["dec_fc1"]   # (L,128), (128,)
    wd2, bd2 = params["dec_fc2"]   # (128,784), (784,)

    w1band, b1row = _conv1_band(w1, b1)
    w2band, b2row = _conv2_band(w2, b2)
    we1k = _enc_fc1_pack(we1)
    bf16 = jnp.bfloat16
    return (w1band, b1row, w2band, b2row,
            we1k, be1.reshape(1, -1),
            we2.astype(bf16), be2.reshape(1, -1),
            wd1.astype(bf16), bd1.reshape(1, -1),
            wd2.astype(bf16), bd2.reshape(1, -1))


# ------------------------------- Net.forward ---------------------------------

def _pick_tile(B):
    if B <= 128:
        return B
    for t in (128, 64, 32, 16, 8):
        if B % t == 0:
            return t
    raise ValueError("batch sizes > 128 must be a multiple of 8")


def net_forward(params, x):
    """x: (B, 1, 28, 28) f32 -> (out: (B, 28, 28), data_rho: (latent,))."""
    B = x.shape[0]
    L = params["enc_fc2"][0].shape[1]
    TB = _pick_tile(B)              # up to 128 batch rows per grid step (MXU M dim)
    NT = B // TB

    xk = x.astype(jnp.float32).reshape(B, 28, 28)    # NCHW (C=1) -> (B,H,W), free
    packed = _pack_params(params)

    out2d, rho_part = pl.pallas_call(
        _net_kernel,
        out_shape=(jax.ShapeDtypeStruct((B, 784), jnp.float32),
                   jax.ShapeDtypeStruct((NT, 8, L), jnp.float32)),
        grid=(NT,),
        in_specs=[
            pl.BlockSpec((TB, 28, 28), lambda i: (i, 0, 0)),      # input tile
            pl.BlockSpec((3, 32, 512), lambda i: (0, 0, 0)),      # conv1 band
            pl.BlockSpec((1, 512), lambda i: (0, 0)),             # conv1 bias row
            pl.BlockSpec((3, 224, 512), lambda i: (0, 0, 0)),     # conv2 band
            pl.BlockSpec((1, 512), lambda i: (0, 0)),             # conv2 bias row
            pl.BlockSpec((7, 224, 128), lambda i: (0, 0, 0)),     # enc fc1 (per-h)
            pl.BlockSpec((1, 128), lambda i: (0, 0)),             # enc fc1 b
            pl.BlockSpec((128, L), lambda i: (0, 0)),             # enc fc2 w
            pl.BlockSpec((1, L), lambda i: (0, 0)),               # enc fc2 b
            pl.BlockSpec((L, 128), lambda i: (0, 0)),             # dec fc1 w
            pl.BlockSpec((1, 128), lambda i: (0, 0)),             # dec fc1 b
            pl.BlockSpec((128, 784), lambda i: (0, 0)),           # dec fc2 w
            pl.BlockSpec((1, 784), lambda i: (0, 0)),             # dec fc2 b
        ],
        out_specs=(pl.BlockSpec((TB, 784), lambda i: (i, 0)),
                   pl.BlockSpec((1, 8, L), lambda i: (i, 0, 0))),
        scratch_shapes=[
            pltpu.VMEM((TB, 30, 32), jnp.float32),    # H-padded conv1 input
            pltpu.VMEM((TB, 16, 224), jnp.float32),   # H-padded conv2 input
        ],
        compiler_params=pltpu.CompilerParams(
            dimension_semantics=("parallel",),
            vmem_limit_bytes=64 * 1024 * 1024),
    )(xk, *packed)

    data_rho = rho_part[:, 0, :].sum(axis=0) / B     # finish the fused mean(0)
    return out2d.reshape(B, 28, 28), data_rho


# ------------------------- pure-JAX reference (check) -------------------------

def net_forward_reference(params, x):
    w1, b1 = params["conv1"]
    w2, b2 = params["conv2"]
    we1, be1 = params["enc_fc1"]
    we2, be2 = params["enc_fc2"]
    wd1, bd1 = params["dec_fc1"]
    wd2, bd2 = params["dec_fc2"]
    B = x.shape[0]
    dn = ("NCHW", "OIHW", "NCHW")
    y = lax.conv_general_dilated(x.astype(jnp.float32), w1, (1, 1), "SAME",
                                 dimension_numbers=dn) + b1.reshape(1, -1, 1, 1)
    y = lax.reduce_window(y, -jnp.inf, lax.max, (1, 1, 2, 2), (1, 1, 2, 2), "VALID")
    y = lax.conv_general_dilated(y, w2, (1, 1), "SAME",
                                 dimension_numbers=dn) + b2.reshape(1, -1, 1, 1)
    y = lax.reduce_window(y, -jnp.inf, lax.max, (1, 1, 2, 2), (1, 1, 2, 2), "VALID")
    feat = y.reshape(B, 1568)
    e1 = jax.nn.sigmoid(feat @ we1 + be1)
    e2 = jax.nn.sigmoid(e1 @ we2 + be2)
    rho = e2.mean(axis=0)
    d1 = jax.nn.sigmoid(e2 @ wd1 + bd1)
    d2 = jax.nn.sigmoid(d1 @ wd2 + bd2)
    return d2.reshape(B, 28, 28), rho


# ----------------------------------- main ------------------------------------

if __name__ == "__main__":
    latent_size = 16
    key = jax.random.PRNGKey(0)
    pkey, xkey = jax.random.split(key)
    params = init_params(pkey, latent_size=latent_size)
    # MNIST-shaped input (the 1568-wide encoder input forces 28x28, 1 channel).
    x = jax.random.uniform(xkey, (2, 1, 28, 28), jnp.float32)

    fwd = jax.jit(net_forward)
    out, data_rho = fwd(params, x)
    jax.block_until_ready((out, data_rho))

    assert out.shape == (2, 28, 28) and out.dtype == jnp.float32
    assert data_rho.shape == (latent_size,)

    # Correctness check against a pure-JAX/XLA reference (bf16 MXU inputs +
    # approx reciprocal give small deviations; tolerance is generous).
    ref_out, ref_rho = jax.jit(net_forward_reference)(params, x)
    err_out = float(jnp.max(jnp.abs(out - ref_out)))
    err_rho = float(jnp.max(jnp.abs(data_rho - ref_rho)))
    assert err_out < 5e-2 and err_rho < 5e-2, (err_out, err_rho)

    # TODO(synk): training loop / Adam optimizer / rho_loss / MSE loss / MNIST IO /
    # matplotlib plotting from the original module are host-side and out of scope.
    print("KERNEL_OK")
</pallas_src>

<mosaic_0001>
module attributes {stable_mosaic.version = 11 : i64} {
  func.func @_net_kernel(%arg0: i32, %arg1: memref<2x28x28xf32, #tpu.memory_space<vmem>>, %arg2: memref<3x32x512xbf16, #tpu.memory_space<vmem>>, %arg3: memref<1x512xf32, #tpu.memory_space<vmem>>, %arg4: memref<3x224x512xbf16, #tpu.memory_space<vmem>>, %arg5: memref<1x512xf32, #tpu.memory_space<vmem>>, %arg6: memref<7x224x128xbf16, #tpu.memory_space<vmem>>, %arg7: memref<1x128xf32, #tpu.memory_space<vmem>>, %arg8: memref<128x16xbf16, #tpu.memory_space<vmem>>, %arg9: memref<1x16xf32, #tpu.memory_space<vmem>>, %arg10: memref<16x128xbf16, #tpu.memory_space<vmem>>, %arg11: memref<1x128xf32, #tpu.memory_space<vmem>>, %arg12: memref<128x784xbf16, #tpu.memory_space<vmem>>, %arg13: memref<1x784xf32, #tpu.memory_space<vmem>>, %arg14: memref<2x784xf32, #tpu.memory_space<vmem>>, %arg15: memref<1x8x16xf32, #tpu.memory_space<vmem>>, %arg16: memref<2x30x32xf32, #tpu.memory_space<vmem>>, %arg17: memref<2x16x224xf32, #tpu.memory_space<vmem>>) attributes {dimension_semantics = [#tpu.dimension_semantics<parallel>], iteration_bounds = array<i64: 1>, scalar_prefetch = 0 : i64, scratch_operands = 2 : i64, tpu.core_type = #tpu.core_type<tc>, window_params = [{transform_indices = @transform_0, window_bounds = array<i64: 2, 28, 28>}, {pipeline_mode = #tpu.pipeline_mode<synchronous>, transform_indices = @transform_1, window_bounds = array<i64: 3, 32, 512>}, {pipeline_mode = #tpu.pipeline_mode<synchronous>, transform_indices = @transform_2, window_bounds = array<i64: 1, 512>}, {pipeline_mode = #tpu.pipeline_mode<synchronous>, transform_indices = @transform_3, window_bounds = array<i64: 3, 224, 512>}, {pipeline_mode = #tpu.pipeline_mode<synchronous>, transform_indices = @transform_4, window_bounds = array<i64: 1, 512>}, {pipeline_mode = #tpu.pipeline_mode<synchronous>, transform_indices = @transform_5, window_bounds = array<i64: 7, 224, 128>}, {pipeline_mode = #tpu.pipeline_mode<synchronous>, transform_indices = @transform_6, window_bounds = array<i64: 1, 128>}, {pipeline_mode = #tpu.pipeline_mode<synchronous>, transform_indices = @transform_7, window_bounds = array<i64: 128, 16>}, {pipeline_mode = #tpu.pipeline_mode<synchronous>, transform_indices = @transform_8, window_bounds = array<i64: 1, 16>}, {pipeline_mode = #tpu.pipeline_mode<synchronous>, transform_indices = @transform_9, window_bounds = array<i64: 16, 128>}, {pipeline_mode = #tpu.pipeline_mode<synchronous>, transform_indices = @transform_10, window_bounds = array<i64: 1, 128>}, {pipeline_mode = #tpu.pipeline_mode<synchronous>, transform_indices = @transform_11, window_bounds = array<i64: 128, 784>}, {pipeline_mode = #tpu.pipeline_mode<synchronous>, transform_indices = @transform_12, window_bounds = array<i64: 1, 784>}, {transform_indices = @transform_13, window_bounds = array<i64: 2, 784>}, {transform_indices = @transform_14, window_bounds = array<i64: 1, 8, 16>}]} {
    %cst = arith.constant 0.000000e+00 : f32
    %0 = vector.broadcast %cst : f32 to vector<2x30x32xf32>
    %c0 = arith.constant 0 : index
    %c0_0 = arith.constant 0 : index
    %c0_1 = arith.constant 0 : index
    %1 = vector.load %arg16[%c0, %c0_0, %c0_1] : memref<2x30x32xf32, #tpu.memory_space<vmem>>, vector<2x30x32xf32>
    tpu.vector_store %arg16[%c0, %c0_0, %c0_1], %0 {strides = array<i32>} : memref<2x30x32xf32, #tpu.memory_space<vmem>>, vector<2x30x32xf32>,
    %c0_2 = arith.constant 0 : index
    %c0_3 = arith.constant 0 : index
    %c0_4 = arith.constant 0 : index
    %2 = vector.load %arg1[%c0_2, %c0_3, %c0_4] : memref<2x28x28xf32, #tpu.memory_space<vmem>>, vector<2x28x28xf32>
    %c0_5 = arith.constant 0 : index
    %c1 = arith.constant 1 : index
    %c0_6 = arith.constant 0 : index
    %3 = vector.load %arg16[%c0_5, %c1, %c0_6] : memref<2x30x32xf32, #tpu.memory_space<vmem>>, vector<2x28x28xf32>
    tpu.vector_store %arg16[%c0_5, %c1, %c0_6], %2 {strides = array<i32>} : memref<2x30x32xf32, #tpu.memory_space<vmem>>, vector<2x28x28xf32>,
    %cst_7 = arith.constant 0.000000e+00 : f32
    %4 = vector.broadcast %cst_7 : f32 to vector<56x512xf32>
    %c0_8 = arith.constant 0 : index
    %c0_9 = arith.constant 0 : index
    %c0_10 = arith.constant 0 : index
    %5 = vector.load %arg16[%c0_8, %c0_9, %c0_10] : memref<2x30x32xf32, #tpu.memory_space<vmem>>, vector<2x28x32xf32>
    %6 = vector.shape_cast %5 : vector<2x28x32xf32> to vector<56x32xf32>
    %7 = arith.truncf %6 : vector<56x32xf32> to vector<56x32xbf16>
    %c0_11 = arith.constant 0 : index
    %c0_12 = arith.constant 0 : index
    %c0_13 = arith.constant 0 : index
    %8 = vector.load %arg2[%c0_11, %c0_12, %c0_13] : memref<3x32x512xbf16, #tpu.memory_space<vmem>>, vector<1x32x512xbf16>
    %9 = vector.shape_cast %8 : vector<1x32x512xbf16> to vector<32x512xbf16>
    %cst_14 = arith.constant dense<0.000000e+00> : vector<56x512xf32>
    %10 = tpu.matmul %7, %9, %cst_14 {dimension_numbers = #tpu.dot_dimension_numbers<[1], [0], [0], [1], [0, 0, 1, 1], [], []>} : vector<56x32xbf16>, vector<32x512xbf16>, vector<56x512xf32> -> vector<56x512xf32>
    %11 = arith.addf %4, %10 : vector<56x512xf32>
    %c0_15 = arith.constant 0 : index
    %c1_16 = arith.constant 1 : index
    %c0_17 = arith.constant 0 : index
    %12 = vector.load %arg16[%c0_15, %c1_16, %c0_17] : memref<2x30x32xf32, #tpu.memory_space<vmem>>, vector<2x28x32xf32>
    %13 = vector.shape_cast %12 : vector<2x28x32xf32> to vector<56x32xf32>
    %14 = arith.truncf %13 : vector<56x32xf32> to vector<56x32xbf16>
    %c1_18 = arith.constant 1 : index
    %c0_19 = arith.constant 0 : index
    %c0_20 = arith.constant 0 : index
    %15 = vector.load %arg2[%c1_18, %c0_19, %c0_20] : memref<3x32x512xbf16, #tpu.memory_space<vmem>>, vector<1x32x512xbf16>
    %16 = vector.shape_cast %15 : vector<1x32x512xbf16> to vector<32x512xbf16>
    %cst_21 = arith.constant dense<0.000000e+00> : vector<56x512xf32>
    %17 = tpu.matmul %14, %16, %cst_21 {dimension_numbers = #tpu.dot_dimension_numbers<[1], [0], [0], [1], [0, 0, 1, 1], [], []>} : vector<56x32xbf16>, vector<32x512xbf16>, vector<56x512xf32> -> vector<56x512xf32>
    %18 = arith.addf %11, %17 : vector<56x512xf32>
    %c0_22 = arith.constant 0 : index
    %c2 = arith.constant 2 : index
    %c0_23 = arith.constant 0 : index
    %19 = vector.load %arg16[%c0_22, %c2, %c0_23] : memref<2x30x32xf32, #tpu.memory_space<vmem>>, vector<2x28x32xf32>
    %20 = vector.shape_cast %19 : vector<2x28x32xf32> to vector<56x32xf32>
    %21 = arith.truncf %20 : vector<56x32xf32> to vector<56x32xbf16>
    %c2_24 = arith.constant 2 : index
    %c0_25 = arith.constant 0 : index
    %c0_26 = arith.constant 0 : index
    %22 = vector.load %arg2[%c2_24, %c0_25, %c0_26] : memref<3x32x512xbf16, #tpu.memory_space<vmem>>, vector<1x32x512xbf16>
    %23 = vector.shape_cast %22 : vector<1x32x512xbf16> to vector<32x512xbf16>
    %cst_27 = arith.constant dense<0.000000e+00> : vector<56x512xf32>
    %24 = tpu.matmul %21, %23, %cst_27 {dimension_numbers = #tpu.dot_dimension_numbers<[1], [0], [0], [1], [0, 0, 1, 1], [], []>} : vector<56x32xbf16>, vector<32x512xbf16>, vector<56x512xf32> -> vector<56x512xf32>
    %25 = arith.addf %18, %24 : vector<56x512xf32>
    %c0_28 = arith.constant 0 : index
    %c0_29 = arith.constant 0 : index
    %26 = vector.load %arg3[%c0_28, %c0_29] : memref<1x512xf32, #tpu.memory_space<vmem>>, vector<1x512xf32>
    %27 = vector.broadcast %26 : vector<1x512xf32> to vector<56x512xf32>
    %28 = arith.addf %25, %27 : vector<56x512xf32>
    %29 = vector.shape_cast %28 : vector<56x512xf32> to vector<2x14x2x512xf32>
    %30 = vector.extract_strided_slice %29 {offsets = [0, 0, 0, 0], sizes = [2, 14, 1, 512], strides = [1, 1, 1, 1]} : vector<2x14x2x512xf32> to vector<2x14x1x512xf32>
    %31 = vector.shape_cast %30 : vector<2x14x1x512xf32> to vector<2x14x512xf32>
    %32 = vector.extract_strided_slice %29 {offsets = [0, 0, 1, 0], sizes = [2, 14, 1, 512], strides = [1, 1, 1, 1]} : vector<2x14x2x512xf32> to vector<2x14x1x512xf32>
    %33 = vector.shape_cast %32 : vector<2x14x1x512xf32> to vector<2x14x512xf32>
    %34 = arith.maximumf %31, %33 : vector<2x14x512xf32>
    %35 = vector.extract_strided_slice %34 {offsets = [0, 0, 0], sizes = [2, 14, 224], strides = [1, 1, 1]} : vector<2x14x512xf32> to vector<2x14x224xf32>
    %36 = vector.extract_strided_slice %34 {offsets = [0, 0, 256], sizes = [2, 14, 224], strides = [1, 1, 1]} : vector<2x14x512xf32> to vector<2x14x224xf32>
    %37 = arith.maximumf %35, %36 : vector<2x14x224xf32>
    %cst_30 = arith.constant 0.000000e+00 : f32
    %38 = vector.broadcast %cst_30 : f32 to vector<2x16x224xf32>
    %c0_31 = arith.constant 0 : index
    %c0_32 = arith.constant 0 : index
    %c0_33 = arith.constant 0 : index
    %39 = vector.load %arg17[%c0_31, %c0_32, %c0_33] : memref<2x16x224xf32, #tpu.memory_space<vmem>>, vector<2x16x224xf32>
    tpu.vector_store %arg17[%c0_31, %c0_32, %c0_33], %38 {strides = array<i32>} : memref<2x16x224xf32, #tpu.memory_space<vmem>>, vector<2x16x224xf32>,
    %c0_34 = arith.constant 0 : index
    %c1_35 = arith.constant 1 : index
    %c0_36 = arith.constant 0 : index
    %40 = vector.load %arg17[%c0_34, %c1_35, %c0_36] : memref<2x16x224xf32, #tpu.memory_space<vmem>>, vector<2x14x224xf32>
    tpu.vector_store %arg17[%c0_34, %c1_35, %c0_36], %37 {strides = array<i32>} : memref<2x16x224xf32, #tpu.memory_space<vmem>>, vector<2x14x224xf32>,
    %cst_37 = arith.constant 0.000000e+00 : f32
    %41 = vector.broadcast %cst_37 : f32 to vector<28x512xf32>
    %c0_38 = arith.constant 0 : index
    %c0_39 = arith.constant 0 : index
    %c0_40 = arith.constant 0 : index
    %42 = vector.load %arg17[%c0_38, %c0_39, %c0_40] : memref<2x16x224xf32, #tpu.memory_space<vmem>>, vector<2x14x224xf32>
    %43 = vector.shape_cast %42 : vector<2x14x224xf32> to vector<28x224xf32>
    %44 = arith.truncf %43 : vector<28x224xf32> to vector<28x224xbf16>
    %c0_41 = arith.constant 0 : index
    %c0_42 = arith.constant 0 : index
    %c0_43 = arith.constant 0 : index
    %45 = vector.load %arg4[%c0_41, %c0_42, %c0_43] : memref<3x224x512xbf16, #tpu.memory_space<vmem>>, vector<1x224x512xbf16>
    %46 = vector.shape_cast %45 : vector<1x224x512xbf16> to vector<224x512xbf16>
    %cst_44 = arith.constant dense<0.000000e+00> : vector<28x512xf32>
    %47 = tpu.matmul %44, %46, %cst_44 {dimension_numbers = #tpu.dot_dimension_numbers<[1], [0], [0], [1], [0, 0, 1, 1], [], []>} : vector<28x224xbf16>, vector<224x512xbf16>, vector<28x512xf32> -> vector<28x512xf32>
    %48 = arith.addf %41, %47 : vector<28x512xf32>
    %c0_45 = arith.constant 0 : index
    %c1_46 = arith.constant 1 : index
    %c0_47 = arith.constant 0 : index
    %49 = vector.load %arg17[%c0_45, %c1_46, %c0_47] : memref<2x16x224xf32, #tpu.memory_space<vmem>>, vector<2x14x224xf32>
    %50 = vector.shape_cast %49 : vector<2x14x224xf32> to vector<28x224xf32>
    %51 = arith.truncf %50 : vector<28x224xf32> to vector<28x224xbf16>
    %c1_48 = arith.constant 1 : index
    %c0_49 = arith.constant 0 : index
    %c0_50 = arith.constant 0 : index
    %52 = vector.load %arg4[%c1_48, %c0_49, %c0_50] : memref<3x224x512xbf16, #tpu.memory_space<vmem>>, vector<1x224x512xbf16>
    %53 = vector.shape_cast %52 : vector<1x224x512xbf16> to vector<224x512xbf16>
    %cst_51 = arith.constant dense<0.000000e+00> : vector<28x512xf32>
    %54 = tpu.matmul %51, %53, %cst_51 {dimension_numbers = #tpu.dot_dimension_numbers<[1], [0], [0], [1], [0, 0, 1, 1], [], []>} : vector<28x224xbf16>, vector<224x512xbf16>, vector<28x512xf32> -> vector<28x512xf32>
    %55 = arith.addf %48, %54 : vector<28x512xf32>
    %c0_52 = arith.constant 0 : index
    %c2_53 = arith.constant 2 : index
    %c0_54 = arith.constant 0 : index
    %56 = vector.load %arg17[%c0_52, %c2_53, %c0_54] : memref<2x16x224xf32, #tpu.memory_space<vmem>>, vector<2x14x224xf32>
    %57 = vector.shape_cast %56 : vector<2x14x224xf32> to vector<28x224xf32>
    %58 = arith.truncf %57 : vector<28x224xf32> to vector<28x224xbf16>
    %c2_55 = arith.constant 2 : index
    %c0_56 = arith.constant 0 : index
    %c0_57 = arith.constant 0 : index
    %59 = vector.load %arg4[%c2_55, %c0_56, %c0_57] : memref<3x224x512xbf16, #tpu.memory_space<vmem>>, vector<1x224x512xbf16>
    %60 = vector.shape_cast %59 : vector<1x224x512xbf16> to vector<224x512xbf16>
    %cst_58 = arith.constant dense<0.000000e+00> : vector<28x512xf32>
    %61 = tpu.matmul %58, %60, %cst_58 {dimension_numbers = #tpu.dot_dimension_numbers<[1], [0], [0], [1], [0, 0, 1, 1], [], []>} : vector<28x224xbf16>, vector<224x512xbf16>, vector<28x512xf32> -> vector<28x512xf32>
    %62 = arith.addf %55, %61 : vector<28x512xf32>
    %c0_59 = arith.constant 0 : index
    %c0_60 = arith.constant 0 : index
    %63 = vector.load %arg5[%c0_59, %c0_60] : memref<1x512xf32, #tpu.memory_space<vmem>>, vector<1x512xf32>
    %64 = vector.broadcast %63 : vector<1x512xf32> to vector<28x512xf32>
    %65 = arith.addf %62, %64 : vector<28x512xf32>
    %66 = vector.shape_cast %65 : vector<28x512xf32> to vector<2x7x2x512xf32>
    %67 = vector.extract_strided_slice %66 {offsets = [0, 0, 0, 0], sizes = [2, 7, 1, 512], strides = [1, 1, 1, 1]} : vector<2x7x2x512xf32> to vector<2x7x1x512xf32>
    %68 = vector.shape_cast %67 : vector<2x7x1x512xf32> to vector<2x7x512xf32>
    %69 = vector.extract_strided_slice %66 {offsets = [0, 0, 1, 0], sizes = [2, 7, 1, 512], strides = [1, 1, 1, 1]} : vector<2x7x2x512xf32> to vector<2x7x1x512xf32>
    %70 = vector.shape_cast %69 : vector<2x7x1x512xf32> to vector<2x7x512xf32>
    %71 = arith.maximumf %68, %70 : vector<2x7x512xf32>
    %72 = vector.extract_strided_slice %71 {offsets = [0, 0, 0], sizes = [2, 7, 224], strides = [1, 1, 1]} : vector<2x7x512xf32> to vector<2x7x224xf32>
    %73 = vector.extract_strided_slice %71 {offsets = [0, 0, 256], sizes = [2, 7, 224], strides = [1, 1, 1]} : vector<2x7x512xf32> to vector<2x7x224xf32>
    %74 = arith.maximumf %72, %73 : vector<2x7x224xf32>
    %cst_61 = arith.constant 0.000000e+00 : f32
    %75 = vector.broadcast %cst_61 : f32 to vector<2x128xf32>
    %76 = vector.extract_strided_slice %74 {offsets = [0, 0, 0], sizes = [2, 1, 224], strides = [1, 1, 1]} : vector<2x7x224xf32> to vector<2x1x224xf32>
    %77 = vector.shape_cast %76 : vector<2x1x224xf32> to vector<2x224xf32>
    %78 = arith.truncf %77 : vector<2x224xf32> to vector<2x224xbf16>
    %c0_62 = arith.constant 0 : index
    %c0_63 = arith.constant 0 : index
    %c0_64 = arith.constant 0 : index
    %79 = vector.load %arg6[%c0_62, %c0_63, %c0_64] : memref<7x224x128xbf16, #tpu.memory_space<vmem>>, vector<1x224x128xbf16>
    %80 = vector.shape_cast %79 : vector<1x224x128xbf16> to vector<224x128xbf16>
    %cst_65 = arith.constant dense<0.000000e+00> : vector<2x128xf32>
    %81 = tpu.matmul %78, %80, %cst_65 {dimension_numbers = #tpu.dot_dimension_numbers<[1], [0], [0], [1], [0, 0, 1, 1], [], []>} : vector<2x224xbf16>, vector<224x128xbf16>, vector<2x128xf32> -> vector<2x128xf32>
    %82 = arith.addf %75, %81 : vector<2x128xf32>
    %83 = vector.extract_strided_slice %74 {offsets = [0, 1, 0], sizes = [2, 1, 224], strides = [1, 1, 1]} : vector<2x7x224xf32> to vector<2x1x224xf32>
    %84 = vector.shape_cast %83 : vector<2x1x224xf32> to vector<2x224xf32>
    %85 = arith.truncf %84 : vector<2x224xf32> to vector<2x224xbf16>
    %c1_66 = arith.constant 1 : index
    %c0_67 = arith.constant 0 : index
    %c0_68 = arith.constant 0 : index
    %86 = vector.load %arg6[%c1_66, %c0_67, %c0_68] : memref<7x224x128xbf16, #tpu.memory_space<vmem>>, vector<1x224x128xbf16>
    %87 = vector.shape_cast %86 : vector<1x224x128xbf16> to vector<224x128xbf16>
    %cst_69 = arith.constant dense<0.000000e+00> : vector<2x128xf32>
    %88 = tpu.matmul %85, %87, %cst_69 {dimension_numbers = #tpu.dot_dimension_numbers<[1], [0], [0], [1], [0, 0, 1, 1], [], []>} : vector<2x224xbf16>, vector<224x128xbf16>, vector<2x128xf32> -> vector<2x128xf32>
    %89 = arith.addf %82, %88 : vector<2x128xf32>
    %90 = vector.extract_strided_slice %74 {offsets = [0, 2, 0], sizes = [2, 1, 224], strides = [1, 1, 1]} : vector<2x7x224xf32> to vector<2x1x224xf32>
    %91 = vector.shape_cast %90 : vector<2x1x224xf32> to vector<2x224xf32>
    %92 = arith.truncf %91 : vector<2x224xf32> to vector<2x224xbf16>
    %c2_70 = arith.constant 2 : index
    %c0_71 = arith.constant 0 : index
    %c0_72 = arith.constant 0 : index
    %93 = vector.load %arg6[%c2_70, %c0_71, %c0_72] : memref<7x224x128xbf16, #tpu.memory_space<vmem>>, vector<1x224x128xbf16>
    %94 = vector.shape_cast %93 : vector<1x224x128xbf16> to vector<224x128xbf16>
    %cst_73 = arith.constant dense<0.000000e+00> : vector<2x128xf32>
    %95 = tpu.matmul %92, %94, %cst_73 {dimension_numbers = #tpu.dot_dimension_numbers<[1], [0], [0], [1], [0, 0, 1, 1], [], []>} : vector<2x224xbf16>, vector<224x128xbf16>, vector<2x128xf32> -> vector<2x128xf32>
    %96 = arith.addf %89, %95 : vector<2x128xf32>
    %97 = vector.extract_strided_slice %74 {offsets = [0, 3, 0], sizes = [2, 1, 224], strides = [1, 1, 1]} : vector<2x7x224xf32> to vector<2x1x224xf32>
    %98 = vector.shape_cast %97 : vector<2x1x224xf32> to vector<2x224xf32>
    %99 = arith.truncf %98 : vector<2x224xf32> to vector<2x224xbf16>
    %c3 = arith.constant 3 : index
    %c0_74 = arith.constant 0 : index
    %c0_75 = arith.constant 0 : index
    %100 = vector.load %arg6[%c3, %c0_74, %c0_75] : memref<7x224x128xbf16, #tpu.memory_space<vmem>>, vector<1x224x128xbf16>
    %101 = vector.shape_cast %100 : vector<1x224x128xbf16> to vector<224x128xbf16>
    %cst_76 = arith.constant dense<0.000000e+00> : vector<2x128xf32>
    %102 = tpu.matmul %99, %101, %cst_76 {dimension_numbers = #tpu.dot_dimension_numbers<[1], [0], [0], [1], [0, 0, 1, 1], [], []>} : vector<2x224xbf16>, vector<224x128xbf16>, vector<2x128xf32> -> vector<2x128xf32>
    %103 = arith.addf %96, %102 : vector<2x128xf32>
    %104 = vector.extract_strided_slice %74 {offsets = [0, 4, 0], sizes = [2, 1, 224], strides = [1, 1, 1]} : vector<2x7x224xf32> to vector<2x1x224xf32>
    %105 = vector.shape_cast %104 : vector<2x1x224xf32> to vector<2x224xf32>
    %106 = arith.truncf %105 : vector<2x224xf32> to vector<2x224xbf16>
    %c4 = arith.constant 4 : index
    %c0_77 = arith.constant 0 : index
    %c0_78 = arith.constant 0 : index
    %107 = vector.load %arg6[%c4, %c0_77, %c0_78] : memref<7x224x128xbf16, #tpu.memory_space<vmem>>, vector<1x224x128xbf16>
    %108 = vector.shape_cast %107 : vector<1x224x128xbf16> to vector<224x128xbf16>
    %cst_79 = arith.constant dense<0.000000e+00> : vector<2x128xf32>
    %109 = tpu.matmul %106, %108, %cst_79 {dimension_numbers = #tpu.dot_dimension_numbers<[1], [0], [0], [1], [0, 0, 1, 1], [], []>} : vector<2x224xbf16>, vector<224x128xbf16>, vector<2x128xf32> -> vector<2x128xf32>
    %110 = arith.addf %103, %109 : vector<2x128xf32>
    %111 = vector.extract_strided_slice %74 {offsets = [0, 5, 0], sizes = [2, 1, 224], strides = [1, 1, 1]} : vector<2x7x224xf32> to vector<2x1x224xf32>
    %112 = vector.shape_cast %111 : vector<2x1x224xf32> to vector<2x224xf32>
    %113 = arith.truncf %112 : vector<2x224xf32> to vector<2x224xbf16>
    %c5 = arith.constant 5 : index
    %c0_80 = arith.constant 0 : index
    %c0_81 = arith.constant 0 : index
    %114 = vector.load %arg6[%c5, %c0_80, %c0_81] : memref<7x224x128xbf16, #tpu.memory_space<vmem>>, vector<1x224x128xbf16>
    %115 = vector.shape_cast %114 : vector<1x224x128xbf16> to vector<224x128xbf16>
    %cst_82 = arith.constant dense<0.000000e+00> : vector<2x128xf32>
    %116 = tpu.matmul %113, %115, %cst_82 {dimension_numbers = #tpu.dot_dimension_numbers<[1], [0], [0], [1], [0, 0, 1, 1], [], []>} : vector<2x224xbf16>, vector<224x128xbf16>, vector<2x128xf32> -> vector<2x128xf32>
    %117 = arith.addf %110, %116 : vector<2x128xf32>
    %118 = vector.extract_strided_slice %74 {offsets = [0, 6, 0], sizes = [2, 1, 224], strides = [1, 1, 1]} : vector<2x7x224xf32> to vector<2x1x224xf32>
    %119 = vector.shape_cast %118 : vector<2x1x224xf32> to vector<2x224xf32>
    %120 = arith.truncf %119 : vector<2x224xf32> to vector<2x224xbf16>
    %c6 = arith.constant 6 : index
    %c0_83 = arith.constant 0 : index
    %c0_84 = arith.constant 0 : index
    %121 = vector.load %arg6[%c6, %c0_83, %c0_84] : memref<7x224x128xbf16, #tpu.memory_space<vmem>>, vector<1x224x128xbf16>
    %122 = vector.shape_cast %121 : vector<1x224x128xbf16> to vector<224x128xbf16>
    %cst_85 = arith.constant dense<0.000000e+00> : vector<2x128xf32>
    %123 = tpu.matmul %120, %122, %cst_85 {dimension_numbers = #tpu.dot_dimension_numbers<[1], [0], [0], [1], [0, 0, 1, 1], [], []>} : vector<2x224xbf16>, vector<224x128xbf16>, vector<2x128xf32> -> vector<2x128xf32>
    %124 = arith.addf %117, %123 : vector<2x128xf32>
    %c0_86 = arith.constant 0 : index
    %c0_87 = arith.constant 0 : index
    %125 = vector.load %arg7[%c0_86, %c0_87] : memref<1x128xf32, #tpu.memory_space<vmem>>, vector<1x128xf32>
    %126 = vector.broadcast %125 : vector<1x128xf32> to vector<2x128xf32>
    %127 = arith.addf %124, %126 : vector<2x128xf32>
    %cst_88 = arith.constant 0.000000e+00 : f32
    %128 = vector.broadcast %cst_88 : f32 to vector<2x128xf32>
    %129 = arith.subf %128, %127 : vector<2x128xf32>
    %130 = math.exp %129 : vector<2x128xf32>
    %cst_89 = arith.constant 1.000000e+00 : f32
    %131 = vector.broadcast %cst_89 : f32 to vector<2x128xf32>
    %132 = arith.addf %131, %130 : vector<2x128xf32>
    %133 = tpu.reciprocal %132 {approx = true} : vector<2x128xf32> -> vector<2x128xf32>
    %134 = arith.truncf %133 : vector<2x128xf32> to vector<2x128xbf16>
    %c0_90 = arith.constant 0 : index
    %c0_91 = arith.constant 0 : index
    %135 = vector.load %arg8[%c0_90, %c0_91] : memref<128x16xbf16, #tpu.memory_space<vmem>>, vector<128x16xbf16>
    %cst_92 = arith.constant dense<0.000000e+00> : vector<2x16xf32>
    %136 = tpu.matmul %134, %135, %cst_92 {dimension_numbers = #tpu.dot_dimension_numbers<[1], [0], [0], [1], [0, 0, 1, 1], [], []>} : vector<2x128xbf16>, vector<128x16xbf16>, vector<2x16xf32> -> vector<2x16xf32>
    %c0_93 = arith.constant 0 : index
    %c0_94 = arith.constant 0 : index
    %137 = vector.load %arg9[%c0_93, %c0_94] : memref<1x16xf32, #tpu.memory_space<vmem>>, vector<1x16xf32>
    %138 = vector.broadcast %137 : vector<1x16xf32> to vector<2x16xf32>
    %139 = arith.addf %136, %138 : vector<2x16xf32>
    %cst_95 = arith.constant 0.000000e+00 : f32
    %140 = vector.broadcast %cst_95 : f32 to vector<2x16xf32>
    %141 = arith.subf %140, %139 : vector<2x16xf32>
    %142 = math.exp %141 : vector<2x16xf32>
    %cst_96 = arith.constant 1.000000e+00 : f32
    %143 = vector.broadcast %cst_96 : f32 to vector<2x16xf32>
    %144 = arith.addf %143, %142 : vector<2x16xf32>
    %145 = tpu.reciprocal %144 {approx = true} : vector<2x16xf32> -> vector<2x16xf32>
    %cst_97 = arith.constant dense<0.000000e+00> : vector<16xf32>
    %146 = vector.multi_reduction <add>, %145, %cst_97 [0] : vector<2x16xf32> to vector<16xf32>
    %147 = vector.shape_cast %146 : vector<16xf32> to vector<1x16xf32>
    %148 = vector.shape_cast %147 : vector<1x16xf32> to vector<1x16xf32>
    %149 = vector.broadcast %148 : vector<1x16xf32> to vector<8x16xf32>
    %c0_98 = arith.constant 0 : index
    %c0_99 = arith.constant 0 : index
    %c0_100 = arith.constant 0 : index
    %150 = vector.load %arg15[%c0_98, %c0_99, %c0_100] : memref<1x8x16xf32, #tpu.memory_space<vmem>>, vector<1x8x16xf32>
    %151 = vector.shape_cast %150 : vector<1x8x16xf32> to vector<8x16xf32>
    %152 = vector.shape_cast %149 : vector<8x16xf32> to vector<1x8x16xf32>
    tpu.vector_store %arg15[%c0_98, %c0_99, %c0_100], %152 {strides = array<i32>} : memref<1x8x16xf32, #tpu.memory_space<vmem>>, vector<1x8x16xf32>,
    %153 = arith.truncf %145 : vector<2x16xf32> to vector<2x16xbf16>
    %c0_101 = arith.constant 0 : index
    %c0_102 = arith.constant 0 : index
    %154 = vector.load %arg10[%c0_101, %c0_102] : memref<16x128xbf16, #tpu.memory_space<vmem>>, vector<16x128xbf16>
    %cst_103 = arith.constant dense<0.000000e+00> : vector<2x128xf32>
    %155 = tpu.matmul %153, %154, %cst_103 {dimension_numbers = #tpu.dot_dimension_numbers<[1], [0], [0], [1], [0, 0, 1, 1], [], []>} : vector<2x16xbf16>, vector<16x128xbf16>, vector<2x128xf32> -> vector<2x128xf32>
    %c0_104 = arith.constant 0 : index
    %c0_105 = arith.constant 0 : index
    %156 = vector.load %arg11[%c0_104, %c0_105] : memref<1x128xf32, #tpu.memory_space<vmem>>, vector<1x128xf32>
    %157 = vector.broadcast %156 : vector<1x128xf32> to vector<2x128xf32>
    %158 = arith.addf %155, %157 : vector<2x128xf32>
    %cst_106 = arith.constant 0.000000e+00 : f32
    %159 = vector.broadcast %cst_106 : f32 to vector<2x128xf32>
    %160 = arith.subf %159, %158 : vector<2x128xf32>
    %161 = math.exp %160 : vector<2x128xf32>
    %cst_107 = arith.constant 1.000000e+00 : f32
    %162 = vector.broadcast %cst_107 : f32 to vector<2x128xf32>
    %163 = arith.addf %162, %161 : vector<2x128xf32>
    %164 = tpu.reciprocal %163 {approx = true} : vector<2x128xf32> -> vector<2x128xf32>
    %165 = arith.truncf %164 : vector<2x128xf32> to vector<2x128xbf16>
    %c0_108 = arith.constant 0 : index
    %c0_109 = arith.constant 0 : index
    %166 = vector.load %arg12[%c0_108, %c0_109] : memref<128x784xbf16, #tpu.memory_space<vmem>>, vector<128x784xbf16>
    %cst_110 = arith.constant dense<0.000000e+00> : vector<2x784xf32>
    %167 = tpu.matmul %165, %166, %cst_110 {dimension_numbers = #tpu.dot_dimension_numbers<[1], [0], [0], [1], [0, 0, 1, 1], [], []>} : vector<2x128xbf16>, vector<128x784xbf16>, vector<2x784xf32> -> vector<2x784xf32>
    %c0_111 = arith.constant 0 : index
    %c0_112 = arith.constant 0 : index
    %168 = vector.load %arg13[%c0_111, %c0_112] : memref<1x784xf32, #tpu.memory_space<vmem>>, vector<1x784xf32>
    %169 = vector.broadcast %168 : vector<1x784xf32> to vector<2x784xf32>
    %170 = arith.addf %167, %169 : vector<2x784xf32>
    %cst_113 = arith.constant 0.000000e+00 : f32
    %171 = vector.broadcast %cst_113 : f32 to vector<2x784xf32>
    %172 = arith.subf %171, %170 : vector<2x784xf32>
    %173 = math.exp %172 : vector<2x784xf32>
    %cst_114 = arith.constant 1.000000e+00 : f32
    %174 = vector.broadcast %cst_114 : f32 to vector<2x784xf32>
    %175 = arith.addf %174, %173 : vector<2x784xf32>
    %176 = tpu.reciprocal %175 {approx = true} : vector<2x784xf32> -> vector<2x784xf32>
    %c0_115 = arith.constant 0 : index
    %c0_116 = arith.constant 0 : index
    %177 = vector.load %arg14[%c0_115, %c0_116] : memref<2x784xf32, #tpu.memory_space<vmem>>, vector<2x784xf32>
    tpu.vector_store %arg14[%c0_115, %c0_116], %176 {strides = array<i32>} : memref<2x784xf32, #tpu.memory_space<vmem>>, vector<2x784xf32>,
    return
  }
  func.func @transform_0(%arg0: i32) -> (i32, i32, i32) {
    %c0_i32 = arith.constant 0 : i32
    %c0_i32_0 = arith.constant 0 : i32
    %c0_i32_1 = arith.constant 0 : i32
    return %arg0, %c0_i32, %c0_i32_0 : i32, i32, i32
  }
  func.func @transform_1(%arg0: i32) -> (i32, i32, i32) {
    %c0_i32 = arith.constant 0 : i32
    %c0_i32_0 = arith.constant 0 : i32
    %c0_i32_1 = arith.constant 0 : i32
    %c0_i32_2 = arith.constant 0 : i32
    return %c0_i32, %c0_i32_0, %c0_i32_1 : i32, i32, i32
  }
  func.func @transform_2(%arg0: i32) -> (i32, i32) {
    %c0_i32 = arith.constant 0 : i32
    %c0_i32_0 = arith.constant 0 : i32
    %c0_i32_1 = arith.constant 0 : i32
    return %c0_i32, %c0_i32_0 : i32, i32
  }
  func.func @transform_3(%arg0: i32) -> (i32, i32, i32) {
    %c0_i32 = arith.constant 0 : i32
    %c0_i32_0 = arith.constant 0 : i32
    %c0_i32_1 = arith.constant 0 : i32
    %c0_i32_2 = arith.constant 0 : i32
    return %c0_i32, %c0_i32_0, %c0_i32_1 : i32, i32, i32
  }
  func.func @transform_4(%arg0: i32) -> (i32, i32) {
    %c0_i32 = arith.constant 0 : i32
    %c0_i32_0 = arith.constant 0 : i32
    %c0_i32_1 = arith.constant 0 : i32
    return %c0_i32, %c0_i32_0 : i32, i32
  }
  func.func @transform_5(%arg0: i32) -> (i32, i32, i32) {
    %c0_i32 = arith.constant 0 : i32
    %c0_i32_0 = arith.constant 0 : i32
    %c0_i32_1 = arith.constant 0 : i32
    %c0_i32_2 = arith.constant 0 : i32
    return %c0_i32, %c0_i32_0, %c0_i32_1 : i32, i32, i32
  }
  func.func @transform_6(%arg0: i32) -> (i32, i32) {
    %c0_i32 = arith.constant 0 : i32
    %c0_i32_0 = arith.constant 0 : i32
    %c0_i32_1 = arith.constant 0 : i32
    return %c0_i32, %c0_i32_0 : i32, i32
  }
  func.func @transform_7(%arg0: i32) -> (i32, i32) {
    %c0_i32 = arith.constant 0 : i32
    %c0_i32_0 = arith.constant 0 : i32
    %c0_i32_1 = arith.constant 0 : i32
    return %c0_i32, %c0_i32_0 : i32, i32
  }
  func.func @transform_8(%arg0: i32) -> (i32, i32) {
    %c0_i32 = arith.constant 0 : i32
    %c0_i32_0 = arith.constant 0 : i32
    %c0_i32_1 = arith.constant 0 : i32
    return %c0_i32, %c0_i32_0 : i32, i32
  }
  func.func @transform_9(%arg0: i32) -> (i32, i32) {
    %c0_i32 = arith.constant 0 : i32
    %c0_i32_0 = arith.constant 0 : i32
    %c0_i32_1 = arith.constant 0 : i32
    return %c0_i32, %c0_i32_0 : i32, i32
  }
  func.func @transform_10(%arg0: i32) -> (i32, i32) {
    %c0_i32 = arith.constant 0 : i32
    %c0_i32_0 = arith.constant 0 : i32
    %c0_i32_1 = arith.constant 0 : i32
    return %c0_i32, %c0_i32_0 : i32, i32
  }
  func.func @transform_11(%arg0: i32) -> (i32, i32) {
    %c0_i32 = arith.constant 0 : i32
    %c0_i32_0 = arith.constant 0 : i32
    %c0_i32_1 = arith.constant 0 : i32
    return %c0_i32, %c0_i32_0 : i32, i32
  }
  func.func @transform_12(%arg0: i32) -> (i32, i32) {
    %c0_i32 = arith.constant 0 : i32
    %c0_i32_0 = arith.constant 0 : i32
    %c0_i32_1 = arith.constant 0 : i32
    return %c0_i32, %c0_i32_0 : i32, i32
  }
  func.func @transform_13(%arg0: i32) -> (i32, i32) {
    %c0_i32 = arith.constant 0 : i32
    %c0_i32_0 = arith.constant 0 : i32
    return %arg0, %c0_i32 : i32, i32
  }
  func.func @transform_14(%arg0: i32) -> (i32, i32, i32) {
    %c0_i32 = arith.constant 0 : i32
    %c0_i32_0 = arith.constant 0 : i32
    %c0_i32_1 = arith.constant 0 : i32
    return %arg0, %c0_i32, %c0_i32_0 : i32, i32, i32
  }
}

</mosaic_0001>

<bundles_post_ra>
// kernel: net_forward.1
= control target key start
LH: loop header
LB: loop body
LE: loop exit
PB: predicated region body
PF: predicated region fallthrough
CT: control target
= control target key end

     0   :  { %20 = vsyncpa [#allocation5], 0  ;;  %s9103_s0 = inlined_call_operand.hbm [shape: f32[2,28,28], index: 0, kind: input, shape index: {}]   ;;  %s9104_s1 = inlined_call_operand.hbm [shape: bf16[3,32,512], index: 1, kind: input, shape index: {}]   ;;  %s9105_s2 = inlined_call_operand.hbm [shape: f32[1,512], index: 2, kind: input, shape index: {}]   ;;  %s9106_s3 = inlined_call_operand.hbm [shape: bf16[3,224,512], index: 3, kind: input, shape index: {}]   ;;  %s9107_s4 = inlined_call_operand.hbm [shape: f32[1,512], index: 4, kind: input, shape index: {}]   ;;  %s9108_s5 = inlined_call_operand.hbm [shape: bf16[7,224,128], index: 5, kind: input, shape index: {}]   ;;  %s9109_s6 = inlined_call_operand.hbm [shape: f32[1,128], index: 6, kind: input, shape index: {}]   ;;  %s9110_s7 = inlined_call_operand.hbm [shape: bf16[128,16], index: 7, kind: input, shape index: {}]   ;;  %s9111_s8 = inlined_call_operand.hbm [shape: f32[1,16], index: 8, kind: input, shape index: {}]   ;;  %s9112_s9 = inlined_call_operand.hbm [shape: bf16[16,128], index: 9, kind: input, shape index: {}]   ;;  %s9113_s10 = inlined_call_operand.hbm [shape: f32[1,128], index: 10, kind: input, shape index: {}]   ;;  %s9114_s11 = inlined_call_operand.hbm [shape: bf16[128,784], index: 11, kind: input, shape index: {}]   ;;  %s9115_s12 = inlined_call_operand.hbm [shape: f32[1,784], index: 12, kind: input, shape index: {}]   ;;  %s9116_s13 = inlined_call_operand.hbm [shape: f32[2,784], index: 13, kind: output, shape index: {0}]   ;;  %s9117_s14 = inlined_call_operand.hbm [shape: f32[1,8,16], index: 14, kind: output, shape index: {1}]  }
   0x1   :  { %21 = vsyncpa [#allocation8], 0 }
   0x2   :  { %22 = vsyncpa [#allocation11], 0 }
   0x3   :  { %23 = vsyncpa [#allocation14], 0 }
   0x4   :  { %24 = vsyncpa [#allocation17], 0 }
   0x5   :  { %25 = vsyncpa [#allocation20], 0 }
   0x6   :  { %26 = vsyncpa [#allocation23], 0 }
   0x7   :  { %27 = vsyncpa [#allocation6], 0 }
   0x8   :  { %28 = vsyncpa [#allocation27], 0  ;;  %s7919_s29 = smov [#allocation7]   ;;  %s7571_s17 = scalar_lea.hbm %s9104_s1, 3072 }
   0x9   :  { %s46_s30 = sshll.u32 %s7919_s29, 4  ;;  %p7572_p0 = scmp.ne.s32.totalorder %s9104_s1, %s7571_s17  ;;  %s47_s30 = int_to_ptr.vmem [resolvable:$true] %s46_s30 }
   0xa   :  { %p7575_p1 = scmp.lt.u32.totalorder %s7571_s17, %s9104_s1 }
   0xc   :  { %p7577_p2 = pnand %p7575_p1, %p7572_p0 }
   0xe   :  { %7580 = shalt.err (!%p7577_p2)
}
   0xf   :  { %s7581_s22 = scalar_lea.vmem %s47_s30, 3072  ;;  %p7586_p4 = scmp.lt.s32.totalorder %s47_s30, %s47_s30 }
  0x10   :  { %p7582_p3 = scmp.ne.s32.totalorder %s47_s30, %s7581_s22  ;;  %p7587_p5 = scmp.lt.s32.totalorder %s7581_s22, %s7581_s22 }
  0x12   :  { %p7588_p6 = por %p7587_p5, %p7586_p4 }
  0x14   :  { %p7589_p7 = pnand %p7588_p6, %p7582_p3 }
  0x16   :  { %7592 = shalt.err (!%p7589_p7)
}
  0x17   :  { %s7920_s23 = smov 256   ;;  %s7921_s24 = smov 16  }
  0x18   :  { %52 = dma.hbm_to_vmem [thread:$0]  %s9104_s1, 3072, %s47_s30, [#allocation8], %s7920_s23, %s7920_s23, %s7921_s24  }
  0x19   :  { %s7922_s27 = smov [#allocation10]   ;;  %s7923_s29 = smov [#allocation13]  }
  0x1a   :  { %s68_s28 = sshll.u32 %s7922_s27, 4  ;;  %s90_s15 = sshll.u32 %s7923_s29, 4  ;;  %s69_s28 = int_to_ptr.vmem [resolvable:$true] %s68_s28  ;;  %s91_s15 = int_to_ptr.vmem [resolvable:$true] %s90_s15 }
  0x1b   :  { %s7593_s18 = scalar_lea.hbm %s9106_s3, 21504 }
  0x1c   :  { %p7594_p8 = scmp.ne.s32.totalorder %s9106_s3, %s7593_s18  ;;  %p7597_p9 = scmp.lt.u32.totalorder %s7593_s18, %s9106_s3 }
  0x1e   :  { %p7599_p10 = pnand %p7597_p9, %p7594_p8 }
  0x20   :  { %7602 = shalt.err (!%p7599_p10)
}
  0x21   :  { %s7603_s1 = scalar_lea.vmem %s69_s28, 21504  ;;  %p7608_p12 = scmp.lt.s32.totalorder %s69_s28, %s69_s28 }
  0x22   :  { %p7604_p11 = scmp.ne.s32.totalorder %s69_s28, %s7603_s1  ;;  %p7609_p13 = scmp.lt.s32.totalorder %s7603_s1, %s7603_s1 }
  0x24   :  { %p7610_p0 = por %p7609_p13, %p7608_p12 }
  0x26   :  { %p7611_p1 = pnand %p7610_p0, %p7604_p11 }
  0x28   :  { %7614 = shalt.err (!%p7611_p1)
}
  0x29   :  { %74 = dma.hbm_to_vmem [thread:$0]  %s9106_s3, 21504, %s69_s28, [#allocation11], %s7920_s23, %s7920_s23, %s7921_s24  }
  0x2a   :  { %s7615_s29 = scalar_lea.hbm %s9108_s5, 12544 }
  0x2b   :  { %p7616_p2 = scmp.ne.s32.totalorder %s9108_s5, %s7615_s29  ;;  %p7619_p3 = scmp.lt.u32.totalorder %s7615_s29, %s9108_s5 }
  0x2d   :  { %p7621_p4 = pnand %p7619_p3, %p7616_p2 }
  0x2f   :  { %7624 = shalt.err (!%p7621_p4)
}
  0x30   :  { %s7625_s20 = scalar_lea.vmem %s91_s15, 12544  ;;  %p7630_p6 = scmp.lt.s32.totalorder %s91_s15, %s91_s15 }
  0x31   :  { %p7626_p5 = scmp.ne.s32.totalorder %s91_s15, %s7625_s20  ;;  %p7631_p7 = scmp.lt.s32.totalorder %s7625_s20, %s7625_s20 }
  0x33   :  { %p7632_p8 = por %p7631_p7, %p7630_p6 }
  0x35   :  { %p7633_p9 = pnand %p7632_p8, %p7626_p5 }
  0x37   :  { %7636 = shalt.err (!%p7633_p9)
}
  0x38   :  { %s7924_s3 = smov 64   ;;  %s7925_s23 = smov 4  }
  0x39   :  { %96 = dma.hbm_to_vmem [thread:$0]  %s9108_s5, 12544, %s91_s15, [#allocation14], %s7924_s3, %s7924_s3, %s7925_s23  }
  0x3a   :  { %s7926_s21 = smov [#allocation16]   ;;  %s7927_s1 = smov [#allocation19]  }
  0x3b   :  { %s112_s22 = sshll.u32 %s7926_s21, 4  ;;  %s134_s30 = sshll.u32 %s7927_s1, 4  ;;  %s113_s22 = int_to_ptr.vmem [resolvable:$true] %s112_s22  ;;  %s135_s30 = int_to_ptr.vmem [resolvable:$true] %s134_s30 }
  0x3c   :  { %s7637_s27 = scalar_lea.hbm %s9110_s7, 1024 }
  0x3d   :  { %p7638_p10 = scmp.ne.s32.totalorder %s9110_s7, %s7637_s27  ;;  %p7641_p11 = scmp.lt.u32.totalorder %s7637_s27, %s9110_s7 }
  0x3f   :  { %p7643_p12 = pnand %p7641_p11, %p7638_p10 }
  0x41   :  { %7646 = shalt.err (!%p7643_p12)
}
  0x42   :  { %s7647_s5 = scalar_lea.vmem %s113_s22, 1024  ;;  %p7652_p0 = scmp.lt.s32.totalorder %s113_s22, %s113_s22 }
  0x43   :  { %p7648_p13 = scmp.ne.s32.totalorder %s113_s22, %s7647_s5  ;;  %p7653_p1 = scmp.lt.s32.totalorder %s7647_s5, %s7647_s5 }
  0x45   :  { %p7654_p2 = por %p7653_p1, %p7652_p0 }
  0x47   :  { %p7655_p3 = pnand %p7654_p2, %p7648_p13 }
  0x49   :  { %7658 = shalt.err (!%p7655_p3)
}
  0x4a   :  { %118 = dma.hbm_to_vmem [thread:$0]  %s9110_s7, 1024, %s113_s22, [#allocation17], %s7924_s3, %s7924_s3, %s7925_s23  }
  0x4b   :  { %s7659_s28 = scalar_lea.hbm %s9112_s9, 128 }
  0x4c   :  { %p7660_p4 = scmp.ne.s32.totalorder %s9112_s9, %s7659_s28  ;;  %p7663_p5 = scmp.lt.u32.totalorder %s7659_s28, %s9112_s9 }
  0x4e   :  { %p7665_p6 = pnand %p7663_p5, %p7660_p4 }
  0x50   :  { %7668 = shalt.err (!%p7665_p6)
}
  0x51   :  { %s7669_s27 = scalar_lea.vmem %s135_s30, 128  ;;  %p7674_p8 = scmp.lt.s32.totalorder %s135_s30, %s135_s30 }
  0x52   :  { %p7670_p7 = scmp.ne.s32.totalorder %s135_s30, %s7669_s27  ;;  %p7675_p9 = scmp.lt.s32.totalorder %s7669_s27, %s7669_s27 }
  0x54   :  { %p7676_p10 = por %p7675_p9, %p7674_p8 }
  0x56   :  { %p7677_p11 = pnand %p7676_p10, %p7670_p7 }
  0x58   :  { %7680 = shalt.err (!%p7677_p11)
}
  0x59   :  { %140 = dma.hbm_to_vmem [thread:$0]  %s9112_s9, 128, %s135_s30, [#allocation20], %s7924_s3, %s7924_s3, %s7925_s23  }
  0x5a   :  { %s7928_s29 = smov [#allocation22]   ;;  %s7681_s5 = scalar_lea.hbm %s9114_s11, 7168 }
  0x5b   :  { %s156_s16 = sshll.u32 %s7928_s29, 4  ;;  %p7682_p12 = scmp.ne.s32.totalorder %s9114_s11, %s7681_s5  ;;  %s157_s16 = int_to_ptr.vmem [resolvable:$true] %s156_s16 }
  0x5c   :  { %p7685_p13 = scmp.lt.u32.totalorder %s7681_s5, %s9114_s11 }
  0x5e   :  { %p7687_p0 = pnand %p7685_p13, %p7682_p12 }
  0x60   :  { %7690 = shalt.err (!%p7687_p0)
}
  0x61   :  { %s7691_s28 = scalar_lea.vmem %s157_s16, 7168  ;;  %p7696_p2 = scmp.lt.s32.totalorder %s157_s16, %s157_s16 }
  0x62   :  { %p7692_p1 = scmp.ne.s32.totalorder %s157_s16, %s7691_s28  ;;  %p7697_p3 = scmp.lt.s32.totalorder %s7691_s28, %s7691_s28 }
  0x64   :  { %p7698_p4 = por %p7697_p3, %p7696_p2 }
  0x66   :  { %p7699_p5 = pnand %p7698_p4, %p7692_p1 }
  0x68   :  { %7702 = shalt.err (!%p7699_p5)
}
  0x69   :  { %s7929_s9 = smov 448   ;;  %s7930_s3 = smov 28  }
  0x6a   :  { %162 = dma.hbm_to_vmem [thread:$0]  %s9114_s11, 7168, %s157_s16, [#allocation23], %s7929_s9, %s7929_s9, %s7930_s3  }
  0x6b   :  { %s7931_s21 = smov [#allocation4]   ;;  %s7703_s27 = scalar_lea.hbm %s9103_s0, 1024 }
  0x6c   :  { %s34_s1 = sshll.u32 %s7931_s21, 4  ;;  %p7704_p6 = scmp.ne.s32.totalorder %s9103_s0, %s7703_s27  ;;  %s35_s1 = int_to_ptr.vmem [resolvable:$true] %s34_s1 }
  0x6d   :  { %p7707_p7 = scmp.lt.u32.totalorder %s7703_s27, %s9103_s0 }
  0x6f   :  { %p7709_p8 = pnand %p7707_p7, %p7704_p6 }
  0x71   :  { %7712 = shalt.err (!%p7709_p8)
}
  0x72   :  { %s7713_s18 = scalar_lea.vmem %s35_s1, 1024  ;;  %p7718_p10 = scmp.lt.s32.totalorder %s35_s1, %s35_s1 }
  0x73   :  { %p7714_p9 = scmp.ne.s32.totalorder %s35_s1, %s7713_s18  ;;  %p7719_p11 = scmp.lt.s32.totalorder %s7713_s18, %s7713_s18 }
  0x75   :  { %p7720_p12 = por %p7719_p11, %p7718_p10 }
  0x77   :  { %p7721_p13 = pnand %p7720_p12, %p7714_p9 }
  0x79   :  { %7724 = shalt.err (!%p7721_p13)
}
  0x7a   :  { %s7932_s11 = smov 128   ;;  %s7933_s16 = smov 8  }
  0x7b   :  { %40 = dma.hbm_to_vmem [thread:$0]  %s9103_s0, 1024, %s35_s1, [#allocation5], %s7932_s11, %s7932_s11, %s7933_s16  }
  0x7c   :  { %s7934_s19 = smov [#allocation9]   ;;  %s7935_s24 = smov [#allocation12]  }
  0x7d   :  { %s59_s20 = sshll.u32 %s7934_s19, 4  ;;  %s81_s28 = sshll.u32 %s7935_s24, 4  ;;  %s60_s20 = int_to_ptr.vmem [resolvable:$true] %s59_s20  ;;  %s82_s28 = int_to_ptr.vmem [resolvable:$true] %s81_s28 }
  0x7e   :  { %s7725_s23 = scalar_lea.hbm %s9105_s2, 64 }
  0x7f   :  { %p7726_p0 = scmp.ne.s32.totalorder %s9105_s2, %s7725_s23  ;;  %p7729_p1 = scmp.lt.u32.totalorder %s7725_s23, %s9105_s2 }
  0x81   :  { %p7731_p2 = pnand %p7729_p1, %p7726_p0 }
  0x83   :  { %7734 = shalt.err (!%p7731_p2)
}
  0x84   :  { %s7735_s0 = scalar_lea.vmem %s60_s20, 64  ;;  %p7740_p4 = scmp.lt.s32.totalorder %s60_s20, %s60_s20 }
  0x85   :  { %p7736_p3 = scmp.ne.s32.totalorder %s60_s20, %s7735_s0  ;;  %p7741_p5 = scmp.lt.s32.totalorder %s7735_s0, %s7735_s0 }
  0x87   :  { %p7742_p6 = por %p7741_p5, %p7740_p4 }
  0x89   :  { %p7743_p7 = pnand %p7742_p6, %p7736_p3 }
  0x8b   :  { %7746 = shalt.err (!%p7743_p7)
}
  0x8c   :  { %62 = dma.hbm_to_vmem [thread:$0]  %s9105_s2, 64, %s60_s20, [#allocation8]  }
  0x8d   :  { %s7747_s29 = scalar_lea.hbm %s9107_s4, 64 }
  0x8e   :  { %p7748_p8 = scmp.ne.s32.totalorder %s9107_s4, %s7747_s29  ;;  %p7751_p9 = scmp.lt.u32.totalorder %s7747_s29, %s9107_s4 }
  0x90   :  { %p7753_p10 = pnand %p7751_p9, %p7748_p8 }
  0x92   :  { %7756 = shalt.err (!%p7753_p10)
}
  0x93   :  { %s7757_s5 = scalar_lea.vmem %s82_s28, 64  ;;  %p7762_p12 = scmp.lt.s32.totalorder %s82_s28, %s82_s28 }
  0x94   :  { %p7758_p11 = scmp.ne.s32.totalorder %s82_s28, %s7757_s5  ;;  %p7763_p13 = scmp.lt.s32.totalorder %s7757_s5, %s7757_s5 }
  0x96   :  { %p7764_p0 = por %p7763_p13, %p7762_p12 }
  0x98   :  { %p7765_p1 = pnand %p7764_p0, %p7758_p11 }
  0x9a   :  { %7768 = shalt.err (!%p7765_p1)
}
  0x9b   :  { %84 = dma.hbm_to_vmem [thread:$0]  %s9107_s4, 64, %s82_s28, [#allocation11]  }
  0x9c   :  { %s7936_s19 = smov [#allocation15]   ;;  %s7937_s24 = smov [#allocation18]  }
  0x9d   :  { %s103_s20 = sshll.u32 %s7936_s19, 4  ;;  %s125_s9 = sshll.u32 %s7937_s24, 4  ;;  %s104_s20 = int_to_ptr.vmem [resolvable:$true] %s103_s20  ;;  %s126_s9 = int_to_ptr.vmem [resolvable:$true] %s125_s9 }
  0x9e   :  { %s7769_s30 = scalar_lea.hbm %s9109_s6, 16 }
  0x9f   :  { %p7770_p2 = scmp.ne.s32.totalorder %s9109_s6, %s7769_s30  ;;  %p7773_p3 = scmp.lt.u32.totalorder %s7769_s30, %s9109_s6 }
  0xa1   :  { %p7775_p4 = pnand %p7773_p3, %p7770_p2 }
  0xa3   :  { %7778 = shalt.err (!%p7775_p4)
}
  0xa4   :  { %s7779_s4 = scalar_lea.vmem %s104_s20, 16  ;;  %s7783_s28 = scalar_lea.vmem %s104_s20, 32 }
  0xa5   :  { %p7780_p5 = scmp.ne.s32.totalorder %s104_s20, %s7779_s4  ;;  %p7784_p6 = scmp.lt.s32.totalorder %s104_s20, %s104_s20 }
  0xa6   :  { %p7785_p7 = scmp.lt.s32.totalorder %s7783_s28, %s7779_s4 }
  0xa8   :  { %p7786_p8 = por %p7785_p7, %p7784_p6 }
  0xaa   :  { %p7787_p9 = pnand %p7786_p8, %p7780_p5 }
  0xac   :  { %7790 = shalt.err (!%p7787_p9)
}
  0xad   :  { %106 = dma.hbm_to_vmem [thread:$0]  %s9109_s6, 16, %s104_s20, [#allocation14]  }
  0xae   :  { %s7791_s29 = scalar_lea.hbm %s9111_s8, 16 }
  0xaf   :  { %p7792_p10 = scmp.ne.s32.totalorder %s9111_s8, %s7791_s29  ;;  %p7795_p11 = scmp.lt.u32.totalorder %s7791_s29, %s9111_s8 }
  0xb1   :  { %p7797_p12 = pnand %p7795_p11, %p7792_p10 }
  0xb3   :  { %7800 = shalt.err (!%p7797_p12)
}
  0xb4   :  { %s7801_s5 = scalar_lea.vmem %s126_s9, 16  ;;  %s7805_s2 = scalar_lea.vmem %s126_s9, 32 }
  0xb5   :  { %p7802_p13 = scmp.ne.s32.totalorder %s126_s9, %s7801_s5  ;;  %p7806_p0 = scmp.lt.s32.totalorder %s126_s9, %s126_s9 }
  0xb6   :  { %p7807_p1 = scmp.lt.s32.totalorder %s7805_s2, %s7801_s5 }
  0xb8   :  { %p7808_p2 = por %p7807_p1, %p7806_p0 }
  0xba   :  { %p7809_p3 = pnand %p7808_p2, %p7802_p13 }
  0xbc   :  { %7812 = shalt.err (!%p7809_p3)
}
  0xbd   :  { %128 = dma.hbm_to_vmem [thread:$0]  %s9111_s8, 16, %s126_s9, [#allocation17]  }
  0xbe   :  { %s7938_s19 = smov [#allocation21]   ;;  %s7939_s24 = smov [#allocation24]  }
  0xbf   :  { %s147_s20 = sshll.u32 %s7938_s19, 4  ;;  %s169_s3 = sshll.u32 %s7939_s24, 4  ;;  %s148_s20 = int_to_ptr.vmem [resolvable:$true] %s147_s20  ;;  %s170_s3 = int_to_ptr.vmem [resolvable:$true] %s169_s3 }
  0xc0   :  { %s7813_s21 = scalar_lea.hbm %s9113_s10, 16 }
  0xc1   :  { %p7814_p4 = scmp.ne.s32.totalorder %s9113_s10, %s7813_s21  ;;  %p7817_p5 = scmp.lt.u32.totalorder %s7813_s21, %s9113_s10 }
  0xc3   :  { %p7819_p6 = pnand %p7817_p5, %p7814_p4 }
  0xc5   :  { %7822 = shalt.err (!%p7819_p6)
}
  0xc6   :  { %s7823_s8 = scalar_lea.vmem %s148_s20, 16  ;;  %s7827_s9 = scalar_lea.vmem %s148_s20, 32 }
  0xc7   :  { %p7824_p7 = scmp.ne.s32.totalorder %s148_s20, %s7823_s8  ;;  %p7828_p8 = scmp.lt.s32.totalorder %s148_s20, %s148_s20 }
  0xc8   :  { %p7829_p9 = scmp.lt.s32.totalorder %s7827_s9, %s7823_s8 }
  0xca   :  { %p7830_p10 = por %p7829_p9, %p7828_p8 }
  0xcc   :  { %p7831_p11 = pnand %p7830_p10, %p7824_p7 }
  0xce   :  { %7834 = shalt.err (!%p7831_p11)
}
  0xcf   :  { %150 = dma.hbm_to_vmem [thread:$0]  %s9113_s10, 16, %s148_s20, [#allocation20]  }
  0xd0   :  { %s7835_s22 = scalar_lea.hbm %s9115_s12, 112 }
  0xd1   :  { %p7836_p12 = scmp.ne.s32.totalorder %s9115_s12, %s7835_s22  ;;  %p7839_p13 = scmp.lt.u32.totalorder %s7835_s22, %s9115_s12 }
  0xd3   :  { %p7841_p0 = pnand %p7839_p13, %p7836_p12 }
  0xd5   :  { %7844 = shalt.err (!%p7841_p0)
}
  0xd6   :  { %s7845_s16 = scalar_lea.vmem %s170_s3, 112  ;;  %s7849_s5 = scalar_lea.vmem %s170_s3, 128 }
  0xd7   :  { %p7846_p1 = scmp.ne.s32.totalorder %s170_s3, %s7845_s16  ;;  %p7850_p2 = scmp.lt.s32.totalorder %s170_s3, %s170_s3 }
  0xd8   :  { %p7851_p3 = scmp.lt.s32.totalorder %s7849_s5, %s7845_s16 }
  0xda   :  { %p7852_p4 = por %p7851_p3, %p7850_p2 }
  0xdc   :  { %p7853_p5 = pnand %p7852_p4, %p7846_p1 }
  0xde   :  { %7856 = shalt.err (!%p7853_p5)
}
  0xdf   :  { %172 = dma.hbm_to_vmem [thread:$0]  %s9115_s12, 112, %s170_s3, [#allocation23]  }
  0xe0   :  { %7901 = dma.done.wait [#allocation5], 1024  }
  0xe1   :  { %7902 = vsyncadd [#allocation5], 4294966272 }
  0xe2   :  { %7903 = dma.done.wait [#allocation8], 3136  }
  0xe3   :  { %7904 = vsyncadd [#allocation8], 4294964160 }
  0xe4   :  { %7905 = dma.done.wait [#allocation11], 21568  }
  0xe5   :  { %7906 = vsyncadd [#allocation11], 4294945728 }
  0xe6   :  { %7907 = dma.done.wait [#allocation14], 12560  }
  0xe7   :  { %7908 = vsyncadd [#allocation14], 4294954736 }
  0xe8   :  { %7909 = dma.done.wait [#allocation17], 1040  }
  0xe9   :  { %7910 = vsyncadd [#allocation17], 4294966256 }
  0xea   :  { %7911 = dma.done.wait [#allocation20], 144  }
  0xeb   :  { %7912 = vsyncadd [#allocation20], 4294967152 }
  0xec   :  { %7913 = dma.done.wait [#allocation23], 7280  }
  0xed   :  { %7914 = vsyncadd [#allocation23], 4294960016  ;;  %vm213_vm0 = vcmask 261120   ;;  %v7940_v0 = vmov 0   ;;  %v7941_v1 = vmov 0.0   ;;  %vm217_vm1 = vcmask 259072  }
  0xee   :  { %422 = vmatprep.mubr.bf16.mxu0 %v7940_v0  ;;  %452 = vmatprep.mubr.bf16.mxu1 %v7940_v0  ;;  %214 = vst.msk [vmem:[#allocation2] sm:$0xff] %vm213_vm0, %v7941_v1  ;;  %215 = vst.msk [vmem:[#allocation2 + $0x8] sm:$0xff] %vm213_vm0, %v7941_v1  ;;  %v6999_v2 = vld [vmem:[#allocation7 + $0x44] ss:$16 sps:$4 sm:$0xff]   ;;  %v7001_v3 = vld [vmem:[#allocation7 + $0x40] ss:$16 sps:$4 sm:$0xff]  }
  0xef   :  { %216 = vst.msk [vmem:[#allocation2 + $0x10] sm:$0xff] %vm213_vm0, %v7941_v1  ;;  %219 = vst.msk [vmem:[#allocation2 + $0x20] sm:$0xff] %vm213_vm0, %v7941_v1  ;;  %6888 = vmatprep.subr.bf16.mxu1 %v6999_v2  ;;  %390 = vmatprep.subr.bf16.mxu0 %v6999_v2  ;;  %v7002_v4 = vld [vmem:[#allocation7 + $0x64] ss:$16 sps:$4 sm:$0xff]   ;;  %vm231_vm2 = vcmask 228352   ;;  %vm235_vm3 = vcmask 224256  }
  0xf0   :  { %220 = vst.msk [vmem:[#allocation2 + $0x28] sm:$0xff] %vm213_vm0, %v7941_v1  ;;  %221 = vst.msk [vmem:[#allocation2 + $0x30] sm:$0xff] %vm213_vm0, %v7941_v1  ;;  %6890 = vmatpush1.bf16.msra.mxu1 %v7001_v3  ;;  %391 = vmatpush1.bf16.msra.mxu0 %v7001_v3  ;;  %v7004_v5 = vld [vmem:[#allocation7 + $0x60] ss:$16 sps:$4 sm:$0xff]   ;;  %v7007_v6 = vld [vmem:[#allocation7 + $0x4c] ss:$16 sps:$4 sm:$0xff]  }
  0xf1   :  { %1579 = vst [vmem:[#allocation3] sm:$0xff] %v7941_v1  ;;  %1582 = vst [vmem:[#allocation3 + $0x10] sm:$0xff] %v7941_v1  ;;  %6889 = vmatprep.subr.bf16.mxu1 %v7002_v4  ;;  %392 = vmatprep.subr.bf16.mxu0 %v7002_v4  ;;  %v223_v7 = vld [vmem:[#allocation4] sm:$0xff]  ;;  %v224_v8 = vld [vmem:[#allocation4 + $0x8] sm:$0xff]  ;;  %vm1580_vm4 = vcmask 785408   ;;  %vm1840_vm5 = vcmask 1042434  }
  0xf2   :  { %1584 = vst [vmem:[#allocation3 + $0x20] sm:$0xff] %v7941_v1  ;;  %1586 = vst [vmem:[#allocation3 + $0x30] sm:$0xff] %v7941_v1  ;;  %v229_v9 = vld [vmem:[#allocation4 + $0x30] sm:$0xff]  ;;  %v230_v10 = vld [vmem:[#allocation4 + $0x38] sm:$0xf]  ;;  %vm1842_vm6 = vcmask 1043459  }
  0xf3   :  { %222 = vst.msk [vmem:[#allocation2 + $0x38] sm:$0x3f] %vm217_vm1, %v7941_v1  ;;  %218 = vst.msk [vmem:[#allocation2 + $0x18] sm:$0x3f] %vm217_vm1, %v7941_v1  ;;  %v225_v11 = vld [vmem:[#allocation4 + $0x10] sm:$0xff]  ;;  %v227_v13 = vld [vmem:[#allocation4 + $0x20] sm:$0xff] }
  0xf4   :  { %232 = vst.msk [vmem:[#allocation2 + $0x1] sm:$0xff] %vm231_vm2, %v223_v7  ;;  %233 = vst.msk [vmem:[#allocation2 + $0x9] sm:$0xff] %vm231_vm2, %v224_v8  ;;  %6891 = vmatpush1.bf16.msra.mxu1 %v7004_v5  ;;  %393 = vmatpush1.bf16.msra.mxu0 %v7004_v5  ;;  %v226_v12 = vld [vmem:[#allocation4 + $0x18] sm:$0xf]  ;;  %v7021_v14 = vld [vmem:[#allocation7 + $0x4] ss:$16 sps:$4 sm:$0xff]  }
  0xf5   :  { %239 = vst.msk [vmem:[#allocation2 + $0x31] sm:$0xff] %vm231_vm2, %v229_v9  ;;  %461 = vmatprep.subr.bf16.mxu1 %v7007_v6  ;;  %234 = vst.msk [vmem:[#allocation2 + $0x11] sm:$0xff] %vm231_vm2, %v225_v11  ;;  %v228_v15 = vld [vmem:[#allocation4 + $0x28] sm:$0xff]  ;;  %584 = vmatprep.subr.bf16.mxu0 %v7021_v14  ;;  %v7019_v34 = vld [vmem:[#allocation7] ss:$16 sps:$4 sm:$0xff]   ;;  %vm1844_vm7 = vcmask 1044484  }
  0xf6   :  { %240 = vst.msk [vmem:[#allocation2 + $0x39] sm:$0xf] %vm235_vm3, %v230_v10  ;;  %236 = vst.msk [vmem:[#allocation2 + $0x19] sm:$0xf] %vm235_vm3, %v226_v12  ;;  %v7005_v23 = vld [vmem:[#allocation7 + $0x48] ss:$16 sps:$4 sm:$0xff]  }
  0xf7   :  { %237 = vst.msk [vmem:[#allocation2 + $0x21] sm:$0xff] %vm231_vm2, %v227_v13  ;;  %238 = vst.msk [vmem:[#allocation2 + $0x29] sm:$0xff] %vm231_vm2, %v228_v15  ;;  %v7013_v32 = vld [vmem:[#allocation7 + $0x6c] ss:$16 sps:$4 sm:$0xff]   ;;  %v7025_v37 = vld [vmem:[#allocation7 + $0x24] ss:$16 sps:$4 sm:$0xff]  }
  0xf8   :  { %v7011_v38 = vld [vmem:[#allocation7 + $0x68] ss:$16 sps:$4 sm:$0xff]   ;;  %v7016_v40 = vld [vmem:[#allocation7 + $0xc] ss:$16 sps:$4 sm:$0xff]   ;;  %v7023_v41 = vld [vmem:[#allocation7 + $0x20] ss:$16 sps:$4 sm:$0xff]  }
  0xf9   :  { %v7014_v45 = vld [vmem:[#allocation7 + $0x8] ss:$16 sps:$4 sm:$0xff]   ;;  %v7028_v46 = vld [vmem:[#allocation7 + $0x2c] ss:$16 sps:$4 sm:$0xff]   ;;  %v7035_v50 = vld [vmem:[#allocation7 + $0x84] ss:$16 sps:$4 sm:$0xff]  }
  0xfa   :  { %v7026_v47 = vld [vmem:[#allocation7 + $0x28] ss:$16 sps:$4 sm:$0xff]   ;;  %v7038_v53 = vld [vmem:[#allocation7 + $0x8c] ss:$16 sps:$4 sm:$0xff]   ;;  %v7033_v1 = vld [vmem:[#allocation7 + $0x80] ss:$16 sps:$4 sm:$0xff]  }
  0xfb   :  { %v289_v16 = vld [vmem:[#allocation2 + $0x1] sm:$0xff]  ;;  %v290_v17 = vld [vmem:[#allocation2 + $0x9] sm:$0xff]  ;;  %vm1846_vm8 = vcmask 1045509   ;;  %vm1848_vm9 = vcmask 1046534   ;;  %vm1850_vm10 = vcmask 1047559   ;;  %vm1904_vm11 = vcmask 785409  }
  0xfc   :  { %v295_v18 = vld [vmem:[#allocation2 + $0x31] sm:$0xff]  ;;  %v305_v19 = vcombine.high %v289_v16, %v289_v16  ;;  %v306_v20 = vcombine.high %v290_v17, %v290_v17  ;;  %v241_v48 = vld [vmem:[#allocation2] sm:$0xff]  ;;  %v242_v49 = vld [vmem:[#allocation2 + $0x8] sm:$0xff]  ;;  %vm1858_vm12 = vcmask 1041409   ;;  %vm1907_vm13 = vcmask 784384   ;;  %s7944_s12 = smov [#allocation26]  }
  0xfd   :  { %v296_v21 = vld [vmem:[#allocation2 + $0x39] sm:$0xf]  ;;  %v310_v22 = vcombine.high %v295_v18, %v295_v18  ;;  %v291_v27 = vld [vmem:[#allocation2 + $0x11] sm:$0xff]  ;;  %v257_v55 = vcombine.high %v241_v48, %v241_v48  ;;  %v258_v56 = vcombine.high %v242_v49, %v242_v49  ;;  %vm2218_vm14 = vcmask 1040384   ;;  %s6356_s6 = sshll.u32 %s7944_s12, 4  ;;  %s6357_s6 = int_to_ptr.vmem [resolvable:$true] %s6356_s6 }
  0xfe   :  { %v311_v24 = vcombine.low %v289_v16, %v305_v19  ;;  %v312_v25 = vcombine.low %v290_v17, %v306_v20  ;;  %v292_v28 = vld [vmem:[#allocation2 + $0x19] sm:$0xf]  ;;  %v293_v29 = vld [vmem:[#allocation2 + $0x21] sm:$0xff]  ;;  %v307_v33 = vcombine.high %v291_v27, %v291_v27  ;;  %v294_v39 = vld [vmem:[#allocation2 + $0x29] sm:$0xff]  ;;  %vm7943_vm2 = vmmov 0   ;;  %s7857_s15 = scalar_lea.vmem %s6357_s6, 128  ;;  %p7862_p7 = scmp.lt.s32.totalorder %s6357_s6, %s6357_s6 }
  0xff   :  { %v317_v26 = vcombine.low %v310_v22, %v296_v21  ;;  %v314_v36 = vcombine.low %v292_v28, %v293_v29  ;;  %v308_v43 = vcombine.high %v293_v29, %v293_v29  ;;  %v309_v44 = vcombine.high %v294_v39, %v294_v39  ;;  %v243_v57 = vld [vmem:[#allocation2 + $0x10] sm:$0xff]  ;;  %v244_v60 = vld [vmem:[#allocation2 + $0x18] sm:$0xf]  ;;  %v245_v61 = vld [vmem:[#allocation2 + $0x20] sm:$0xff]  ;;  %p7858_p6 = scmp.ne.s32.totalorder %s6357_s6, %s7857_s15  ;;  %p7863_p8 = scmp.lt.s32.totalorder %s7857_s15, %s7857_s15 }
 0x100   :  { %v325_v30 = vpack.c.bf16 %v312_v25, %v311_v24  ;;  %v313_v35 = vcombine.low %v291_v27, %v307_v33  ;;  %v263_v58 = vcombine.low %v241_v48, %v257_v55  ;;  %v264_v59 = vcombine.low %v242_v49, %v258_v56  ;;  %v7044_v2 = vld [vmem:[#allocation7 + $0xa4] ss:$16 sps:$4 sm:$0xff]   ;;  %v246_v3 = vld [vmem:[#allocation2 + $0x28] sm:$0xff]  ;;  %v7042_v6 = vld [vmem:[#allocation7 + $0xa0] ss:$16 sps:$4 sm:$0xff]  }
 0x101   :  { %v8202_v31 = vpack.c.bf16 %v317_v26, %v317_v26  ;;  %v315_v51 = vcombine.low %v308_v43, %v294_v39  ;;  %v316_v52 = vcombine.low %v309_v44, %v295_v18  ;;  %v259_v63 = vcombine.high %v243_v57, %v243_v57  ;;  %v247_v7 = vld [vmem:[#allocation2 + $0x30] sm:$0xff]  ;;  %v7036_v13 = vld [vmem:[#allocation7 + $0x88] ss:$16 sps:$4 sm:$0xff]   ;;  %v7047_v17 = vld [vmem:[#allocation7 + $0xac] ss:$16 sps:$4 sm:$0xff]   ;;  %p7864_p9 = por %p7863_p8, %p7862_p7 }
 0x102   :  { %6383 = vmatmul.mubr.msk.bf16.vlgmr.msra.gmra.mrb[0].mxu0 %vm213_vm0, %v325_v30  ;;  %v326_v42 = vpack.c.bf16 %v314_v36, %v313_v35  ;;  %v277_v62 = vpack.c.bf16 %v264_v59, %v263_v58  ;;  %v266_v5 = vcombine.low %v244_v60, %v245_v61  ;;  %v260_v9 = vcombine.high %v245_v61, %v245_v61  ;;  %v248_v14 = vld [vmem:[#allocation2 + $0x38] sm:$0xf]  ;;  %v726_v19 = vld [vmem:[#allocation2 + $0x2] sm:$0xff]  ;;  %v727_v20 = vld [vmem:[#allocation2 + $0xa] sm:$0xff] }
 0x103   :  { %6386 = vmatmul.mubr.msk.bf16.vlgmr.msra.gmra.mrb[0].mxu1 %vm213_vm0, %v8202_v31  ;;  %432 = vmatprep.mubr.bf16.mxu0 %v7940_v0  ;;  %v327_v54 = vpack.c.bf16 %v316_v52, %v315_v51  ;;  %v265_v4 = vcombine.low %v243_v57, %v259_v63  ;;  %v261_v10 = vcombine.high %v246_v3, %v246_v3  ;;  %v7045_v18 = vld [vmem:[#allocation7 + $0xa8] ss:$16 sps:$4 sm:$0xff]   ;;  %v7060_v48 = vld [vmem:[#allocation10 + $0x1cc] ss:$16 sps:$4 sm:$0xff]   ;;  %v7055_v49 = vld [vmem:[#allocation10 + $0x1c0] ss:$16 sps:$4 sm:$0xff]   ;;  %p7865_p10 = pnand %p7864_p9, %p7858_p6 }
 0x104   :  { %462 = vmatpush1.bf16.msra.mxu1 %v7005_v23  ;;  %493 = vmatprep.mubr.bf16.mxu1 %v7940_v0  ;;  %v267_v11 = vcombine.low %v260_v9, %v246_v3  ;;  %v262_v16 = vcombine.high %v247_v7, %v247_v7  ;;  %v742_v23 = vcombine.high %v726_v19, %v726_v19  ;;  %v728_v25 = vld [vmem:[#allocation2 + $0x12] sm:$0xff]  ;;  %v729_v28 = vld [vmem:[#allocation2 + $0x1a] sm:$0xf]  ;;  %v730_v29 = vld [vmem:[#allocation2 + $0x22] sm:$0xff]  ;;  %vm5629_vm3 = vcmask 123904  }
 0x105   :  { %463 = vmatprep.subr.bf16.mxu1 %v7013_v32  ;;  %585 = vmatpush1.bf16.msra.mxu0 %v7019_v34  ;;  %v278_v8 = vpack.c.bf16 %v266_v5, %v265_v4  ;;  %v268_v12 = vcombine.low %v261_v10, %v247_v7  ;;  %v743_v24 = vcombine.high %v727_v20, %v727_v20  ;;  %v731_v32 = vld [vmem:[#allocation2 + $0x2a] sm:$0xff]  ;;  %v732_v35 = vld [vmem:[#allocation2 + $0x32] sm:$0xff]  ;;  %vm8565_vm15 = vmor %vm2218_vm14, %vm1840_vm5 }
 0x106   :  { %586 = vmatprep.subr.bf16.mxu0 %v7025_v37  ;;  %v269_v21 = vcombine.low %v262_v16, %v248_v14  ;;  %v748_v26 = vcombine.low %v726_v19, %v742_v23  ;;  %v751_v34 = vcombine.low %v729_v28, %v730_v29  ;;  %v745_v37 = vcombine.high %v730_v29, %v730_v29  ;;  %v7063_v51 = vld [vmem:[#allocation10 + $0x1e4] ss:$16 sps:$4 sm:$0xff]   ;;  %v7066_v52 = vld [vmem:[#allocation10 + $0x1ec] ss:$16 sps:$4 sm:$0xff]   ;;  %v7067_v57 = vld [vmem:[#allocation10 + $0x200] ss:$16 sps:$4 sm:$0xff]  }
 0x107   :  { %v279_v15 = vpack.c.bf16 %v268_v12, %v267_v11  ;;  %v749_v27 = vcombine.low %v727_v20, %v743_v24  ;;  %v747_v43 = vcombine.high %v732_v35, %v732_v35  ;;  %v7069_v55 = vld [vmem:[#allocation10 + $0x204] ss:$16 sps:$4 sm:$0xff]   ;;  %v7072_v56 = vld [vmem:[#allocation10 + $0x20c] ss:$16 sps:$4 sm:$0xff]   ;;  %v7070_v58 = vld [vmem:[#allocation10 + $0x208] ss:$16 sps:$4 sm:$0xff]  }
 0x108   :  { %464 = vmatpush1.bf16.msra.mxu1 %v7011_v38  ;;  %v280_v22 = vpack.c.bf16 %v269_v21, %v269_v21  ;;  %v746_v38 = vcombine.high %v731_v32, %v731_v32  ;;  %v752_v39 = vcombine.low %v745_v37, %v731_v32  ;;  %v7075_v59 = vld [vmem:[#allocation10 + $0x224] ss:$16 sps:$4 sm:$0xff]   ;;  %v7078_v60 = vld [vmem:[#allocation10 + $0x22c] ss:$16 sps:$4 sm:$0xff]   ;;  %v7073_v61 = vld [vmem:[#allocation10 + $0x220] ss:$16 sps:$4 sm:$0xff]  }
 0x109   :  { %655 = vmatprep.subr.bf16.mxu1 %v7016_v40  ;;  %587 = vmatpush1.bf16.msra.mxu0 %v7023_v41  ;;  %v733_v41 = vld [vmem:[#allocation2 + $0x3a] sm:$0xf]  ;;  %v7084_v5 = vld [vmem:[#allocation10 + $0x24c] ss:$16 sps:$4 sm:$0xff]   ;;  %v7085_v10 = vld [vmem:[#allocation10 + $0x260] ss:$16 sps:$4 sm:$0xff]  }
 0x10a   :  { %6384 = vmatmul.mubr.msk.bf16.gmra.mrb[4].mxu0 %vm213_vm0, %v326_v42  ;;  %827 = vmatprep.subr.bf16.mxu0 %v7035_v50  ;;  %v753_v40 = vcombine.low %v746_v38, %v732_v35  ;;  %v754_v44 = vcombine.low %v747_v43, %v733_v41  ;;  %v7058_v50 = vld [vmem:[#allocation10 + $0x1c8] ss:$16 sps:$4 sm:$0xff]   ;;  %v7081_v4 = vld [vmem:[#allocation10 + $0x244] ss:$16 sps:$4 sm:$0xff]   ;;  %v7090_v9 = vld [vmem:[#allocation10 + $0x26c] ss:$16 sps:$4 sm:$0xff]  }
 0x10b   :  { %6387 = vmatmul.mubr.msk.bf16.vlgmr.msra.gmra.mrb[4].mxu1 %vm213_vm0, %v325_v30  ;;  %442 = vmatprep.mubr.bf16.mxu0 %v7940_v0  ;;  %v762_v30 = vpack.c.bf16 %v749_v27, %v748_v26  ;;  %v7082_v7 = vld [vmem:[#allocation10 + $0x248] ss:$16 sps:$4 sm:$0xff]   ;;  %v7093_v12 = vld [vmem:[#allocation10 + $0x284] ss:$16 sps:$4 sm:$0xff]   ;;  %v7091_v14 = vld [vmem:[#allocation10 + $0x280] ss:$16 sps:$4 sm:$0xff]  }
 0x10c   :  { %656 = vmatpush1.bf16.msra.mxu1 %v7014_v45  ;;  %503 = vmatprep.mubr.bf16.mxu1 %v7940_v0  ;;  %v765_v45 = vpack.c.bf16 %v754_v44, %v754_v44  ;;  %v7088_v11 = vld [vmem:[#allocation10 + $0x268] ss:$16 sps:$4 sm:$0xff]   ;;  %v7099_v16 = vld [vmem:[#allocation10 + $0x2a4] ss:$16 sps:$4 sm:$0xff]   ;;  %v7108_v21 = vld [vmem:[#allocation10 + $0x2cc] ss:$16 sps:$4 sm:$0xff]  }
 0x10d   :  { %657 = vmatprep.subr.bf16.mxu1 %v7028_v46  ;;  %v8252_v46 = vld [vmem:[#allocation3] sm:$0xff]  ;;  %v7100_v19 = vld [vmem:[#allocation10 + $0x2a8] ss:$16 sps:$4 sm:$0xff]   ;;  %v7105_v20 = vld [vmem:[#allocation10 + $0x2c4] ss:$16 sps:$4 sm:$0xff]  }
 0x10e   :  { %1581 = vst.msk [vmem:[#allocation3 + $0x8] sm:$0xff] %vm1580_vm4, %v8252_v46  ;;  %1583 = vst.msk [vmem:[#allocation3 + $0x18] sm:$0xff] %vm1580_vm4, %v8252_v46  ;;  %v7106_v23 = vld [vmem:[#allocation10 + $0x2c8] ss:$16 sps:$4 sm:$0xff]   ;;  %v7111_v24 = vld [vmem:[#allocation10 + $0x2e4] ss:$16 sps:$4 sm:$0xff]  }
 0x10f   :  { %1585 = vst.msk [vmem:[#allocation3 + $0x28] sm:$0xff] %vm1580_vm4, %v8252_v46  ;;  %1587 = vst.msk [vmem:[#allocation3 + $0x38] sm:$0xff] %vm1580_vm4, %v8252_v46  ;;  %v7109_v26 = vld [vmem:[#allocation10 + $0x2e0] ss:$16 sps:$4 sm:$0xff]   ;;  %v7112_v27 = vld [vmem:[#allocation10 + $0x2e8] ss:$16 sps:$4 sm:$0xff]  }
 0x110   :  { %658 = vmatpush1.bf16.msra.mxu1 %v7026_v47  ;;  %v7057_v47 = vld [vmem:[#allocation10 + $0x1c4] ss:$16 sps:$4 sm:$0xff]   ;;  %v7115_v32 = vld [vmem:[#allocation10 + $0x300] ss:$16 sps:$4 sm:$0xff]   ;;  %v7124_v38 = vld [vmem:[#allocation10 + $0x328] ss:$16 sps:$4 sm:$0xff]  }
 0x111   :  { %898 = vmatprep.subr.bf16.mxu1 %v7038_v53  ;;  %v7061_v53 = vld [vmem:[#allocation10 + $0x1e0] ss:$16 sps:$4 sm:$0xff]   ;;  %v7117_v29 = vld [vmem:[#allocation10 + $0x304] ss:$16 sps:$4 sm:$0xff]   ;;  %v7132_v41 = vld [vmem:[#allocation10 + $0x34c] ss:$16 sps:$4 sm:$0xff]  }
 0x112   :  { %6385 = vmatmul.mubr.msk.bf16.gmra.mrb[8].mxu0 %vm213_vm0, %v327_v54  ;;  %v7121_v35 = vld [vmem:[#allocation10 + $0x320] ss:$16 sps:$4 sm:$0xff]   ;;  %v7130_v43 = vld [vmem:[#allocation10 + $0x348] ss:$16 sps:$4 sm:$0xff]   ;;  %v7135_v44 = vld [vmem:[#allocation10 + $0x364] ss:$16 sps:$4 sm:$0xff]  }
 0x113   :  { %6388 = vmatmul.mubr.msk.bf16.gmra.mrb[8].mxu1 %vm213_vm0, %v326_v42  ;;  %616 = vmatprep.mubr.bf16.mxu0 %v7940_v0  ;;  %v764_v42 = vpack.c.bf16 %v753_v40, %v752_v39  ;;  %v7126_v39 = vld [vmem:[#allocation10 + $0x32c] ss:$16 sps:$4 sm:$0xff]   ;;  %v7129_v40 = vld [vmem:[#allocation10 + $0x344] ss:$16 sps:$4 sm:$0xff]  }
 0x114   :  { %513 = vmatprep.mubr.bf16.mxu1 %v7940_v0 }
 0x11a   :  { %6399 = vmatmul.mubr.msk.bf16.vlgmr.msra.gmra.mrb[0].mxu0 %vm213_vm0, %v277_v62 }
 0x11b   :  { %6389 = vmatmul.mubr.msk.bf16.gmra.mrb[12].mxu1 %vm213_vm0, %v327_v54  ;;  %626 = vmatprep.mubr.bf16.mxu0 %v7940_v0  ;;  %v7064_v54 = vld [vmem:[#allocation10 + $0x1e8] ss:$16 sps:$4 sm:$0xff]  }
 0x11c   :  { %523 = vmatprep.mubr.bf16.mxu1 %v7940_v0  ;;  %828 = vmatpush1.bf16.msra.mxu0 %v7033_v1 }
 0x11d   :  { %829 = vmatprep.subr.bf16.mxu0 %v7044_v2 }
 0x120   :  { %830 = vmatpush1.bf16.msra.mxu0 %v7042_v6  ;;  %v7079_v6 = vld [vmem:[#allocation10 + $0x240] ss:$16 sps:$4 sm:$0xff]  }
 0x121   :  { %2684 = vmatprep.subr.bf16.mxu0 %v7057_v47  ;;  %v999_v47 = vlaneseq }
 0x122   :  { %6400 = vmatmul.mubr.msk.bf16.gmra.mrb[4].mxu0 %vm213_vm0, %v278_v8 }
 0x123   :  { %6390 = vmatmul.mubr.msk.bf16.gmra.mrb[16].mxu1 %vm213_vm0, %v8202_v31  ;;  %636 = vmatprep.mubr.bf16.mxu0 %v7940_v0  ;;  %v744_v31 = vcombine.high %v728_v25, %v728_v25 }
 0x124   :  { %687 = vmatprep.mubr.bf16.mxu1 %v7940_v0 }
 0x125   :  { %v750_v33 = vcombine.low %v728_v25, %v744_v31  ;;  %v7114_v25 = vld [vmem:[#allocation10 + $0x2ec] ss:$16 sps:$4 sm:$0xff]  }
 0x127   :  { %v763_v36 = vpack.c.bf16 %v751_v34, %v750_v33  ;;  %v7118_v33 = vld [vmem:[#allocation10 + $0x308] ss:$16 sps:$4 sm:$0xff]  }
 0x12a   :  { %6401 = vmatmul.mubr.msk.bf16.gmra.mrb[8].mxu0 %vm213_vm0, %v279_v15 }
 0x12b   :  { %6403 = vmatmul.mubr.msk.bf16.vlgmr.msra.gmra.mrb[4].mxu1 %vm213_vm0, %v277_v62  ;;  %646 = vmatprep.mubr.bf16.mxu0 %v7940_v0  ;;  %v7076_v62 = vld [vmem:[#allocation10 + $0x228] ss:$16 sps:$4 sm:$0xff]  }
 0x12c   :  { %899 = vmatpush1.bf16.msra.mxu1 %v7036_v13  ;;  %697 = vmatprep.mubr.bf16.mxu1 %v7940_v0  ;;  %v7096_v13 = vld [vmem:[#allocation10 + $0x28c] ss:$16 sps:$4 sm:$0xff]  }
 0x12d   :  { %900 = vmatprep.subr.bf16.mxu1 %v7047_v17  ;;  %v7102_v17 = vld [vmem:[#allocation10 + $0x2ac] ss:$16 sps:$4 sm:$0xff]  }
 0x130   :  { %901 = vmatpush1.bf16.msra.mxu1 %v7045_v18  ;;  %v7097_v18 = vld [vmem:[#allocation10 + $0x2a0] ss:$16 sps:$4 sm:$0xff]  }
 0x131   :  { %2737 = vmatprep.subr.bf16.mxu1 %v7060_v48  ;;  %v7133_v48 = vld [vmem:[#allocation10 + $0x360] ss:$16 sps:$4 sm:$0xff]  }
 0x132   :  { %6402 = vmatmul.mubr.msk.bf16.gmra.mrb[12].mxu0 %vm213_vm0, %v280_v22 }
 0x133   :  { %6404 = vmatmul.mubr.msk.bf16.gmra.mrb[8].mxu1 %vm213_vm0, %v278_v8  ;;  %859 = vmatprep.mubr.bf16.mxu0 %v7940_v0  ;;  %v7087_v8 = vld [vmem:[#allocation10 + $0x264] ss:$16 sps:$4 sm:$0xff]  }
 0x134   :  { %707 = vmatprep.mubr.bf16.mxu1 %v7940_v0 }
 0x13a   :  { %6415 = vmatmul.mubr.msk.bf16.vlgmr.msra.gmra.mrb[0].mxu0 %vm213_vm0, %v762_v30 }
 0x13b   :  { %6405 = vmatmul.mubr.msk.bf16.gmra.mrb[12].mxu1 %vm213_vm0, %v279_v15  ;;  %869 = vmatprep.mubr.bf16.mxu0 %v7940_v0  ;;  %v7094_v15 = vld [vmem:[#allocation10 + $0x288] ss:$16 sps:$4 sm:$0xff]  }
 0x13c   :  { %717 = vmatprep.mubr.bf16.mxu1 %v7940_v0  ;;  %2685 = vmatpush1.bf16.msra.mxu0 %v7055_v49  ;;  %v7136_v49 = vld [vmem:[#allocation10 + $0x368] ss:$16 sps:$4 sm:$0xff]  }
 0x13d   :  { %2686 = vmatprep.subr.bf16.mxu0 %v7063_v51  ;;  %v7152_v51 = vld [vmem:[#allocation10 + $0xc] ss:$16 sps:$4 sm:$0xff]  }
 0x140   :  { %2687 = vmatpush1.bf16.msra.mxu0 %v7061_v53 }
 0x141   :  { %2688 = vmatprep.subr.bf16.mxu0 %v7069_v55 }
 0x142   :  { %6416 = vmatmul.mubr.msk.bf16.gmra.mrb[4].mxu0 %vm213_vm0, %v763_v36 }
 0x143   :  { %6406 = vmatmul.mubr.msk.bf16.gmra.mrb[20].mxu1 %vm213_vm0, %v280_v22  ;;  %879 = vmatprep.mubr.bf16.mxu0 %v7940_v0  ;;  %v7103_v22 = vld [vmem:[#allocation10 + $0x2c0] ss:$16 sps:$4 sm:$0xff]  }
 0x144   :  { %930 = vmatprep.mubr.bf16.mxu1 %v7940_v0  ;;  %2689 = vmatpush1.bf16.msra.mxu0 %v7067_v57 }
 0x145   :  { %2690 = vmatprep.subr.bf16.mxu0 %v7075_v59  ;;  %v997_v59 = vld [vmem:[#allocation9] sm:$0xf] }
 0x148   :  { %2691 = vmatpush1.bf16.msra.mxu0 %v7073_v61 }
 0x149   :  { %2692 = vmatprep.subr.bf16.mxu0 %v7081_v4 }
 0x14a   :  { %6417 = vmatmul.mubr.msk.bf16.gmra.mrb[8].mxu0 %vm213_vm0, %v764_v42 }
 0x14b   :  { %6419 = vmatmul.mubr.msk.bf16.vlgmr.msra.gmra.mrb[4].mxu1 %vm213_vm0, %v762_v30  ;;  %889 = vmatprep.mubr.bf16.mxu0 %v7940_v0  ;;  %v7120_v30 = vld [vmem:[#allocation10 + $0x30c] ss:$16 sps:$4 sm:$0xff]  }
 0x14c   :  { %940 = vmatprep.mubr.bf16.mxu1 %v7940_v0  ;;  %2738 = vmatpush1.bf16.msra.mxu1 %v7058_v50  ;;  %v7149_v50 = vld [vmem:[#allocation10 + $0x4] ss:$16 sps:$4 sm:$0xff]  }
 0x14d   :  { %2739 = vmatprep.subr.bf16.mxu1 %v7066_v52  ;;  %2693 = vmatpush1.bf16.msra.mxu0 %v7079_v6  ;;  %v8270_v52 = vshrl.u32 %v999_v47, 7 }
 0x14e   :  { %2694 = vmatprep.subr.bf16.mxu0 %v7087_v8 }
 0x150   :  { %2740 = vmatpush1.bf16.msra.mxu1 %v7064_v54 }
 0x151   :  { %2741 = vmatprep.subr.bf16.mxu1 %v7072_v56  ;;  %2695 = vmatpush1.bf16.msra.mxu0 %v7085_v10  ;;  %v8276_v56 = vsub.s32 0, %v8270_v52 }
 0x152   :  { %6418 = vmatmul.mubr.msk.bf16.gmra.mrb[16].mxu0 %vm213_vm0, %v765_v45  ;;  %2696 = vmatprep.subr.bf16.mxu0 %v7093_v12 }
 0x153   :  { %6420 = vmatmul.mubr.msk.bf16.gmra.mrb[8].mxu1 %vm213_vm0, %v763_v36  ;;  %v7123_v36 = vld [vmem:[#allocation10 + $0x324] ss:$16 sps:$4 sm:$0xff]  }
 0x154   :  { %950 = vmatprep.mubr.bf16.mxu1 %v7940_v0  ;;  %2742 = vmatpush1.bf16.msra.mxu1 %v7070_v58 }
 0x155   :  { %2743 = vmatprep.subr.bf16.mxu1 %v7078_v60  ;;  %2697 = vmatpush1.bf16.msra.mxu0 %v7091_v14  ;;  %v8282_v60 = vsub.s32 1, %v8270_v52 }
 0x156   :  { %2698 = vmatprep.subr.bf16.mxu0 %v7099_v16 }
 0x158   :  { %2744 = vmatpush1.bf16.msra.mxu1 %v7076_v62  ;;  %v8285_v62 = vrot.slane %v997_v59, %v8276_v56 }
 0x159   :  { %2745 = vmatprep.subr.bf16.mxu1 %v7084_v5  ;;  %2699 = vmatpush1.bf16.msra.mxu0 %v7097_v18 }
 0x15a   :  { %2700 = vmatprep.subr.bf16.mxu0 %v7105_v20 }
 0x15b   :  { %6421 = vmatmul.mubr.msk.bf16.gmra.mrb[12].mxu1 %vm213_vm0, %v764_v42  ;;  %v7127_v42 = vld [vmem:[#allocation10 + $0x340] ss:$16 sps:$4 sm:$0xff]  }
 0x15c   :  { %960 = vmatprep.mubr.bf16.mxu1 %v7940_v0  ;;  %2746 = vmatpush1.bf16.msra.mxu1 %v7082_v7 }
 0x15d   :  { %2747 = vmatprep.subr.bf16.mxu1 %v7090_v9  ;;  %2701 = vmatpush1.bf16.msra.mxu0 %v7103_v22 }
 0x15e   :  { %2702 = vmatprep.subr.bf16.mxu0 %v7111_v24 }
 0x160   :  { %2748 = vmatpush1.bf16.msra.mxu1 %v7088_v11  ;;  %v7942_v11 = vmov 1983009808  }
 0x161   :  { %2749 = vmatprep.subr.bf16.mxu1 %v7096_v13  ;;  %2703 = vmatpush1.bf16.msra.mxu0 %v7109_v26  ;;  %v1080_v12 = vunpack.c.l.s4 %v7942_v11 }
 0x162   :  { %2704 = vmatprep.subr.bf16.mxu0 %v7117_v29 }
 0x163   :  { %6422 = vmatmul.mubr.msk.bf16.gmra.mrb[24].mxu1 %vm213_vm0, %v765_v45  ;;  %v7138_v45 = vld [vmem:[#allocation10 + $0x36c] ss:$16 sps:$4 sm:$0xff]   ;;  %v1081_v22 = vunpack.c.0.s8 %v1080_v12  ;;  %vm2220_vm0 = vmor %vm8565_vm15, %vm1844_vm7 }
 0x164   :  { %2750 = vmatpush1.bf16.msra.mxu1 %v7094_v15  ;;  %vm8602_vm1 = vmor %vm2220_vm0, %vm1848_vm9 }
 0x165   :  { %2751 = vmatprep.subr.bf16.mxu1 %v7102_v17  ;;  %2705 = vmatpush1.bf16.msra.mxu0 %v7115_v32  ;;  %v8295_v17 = vsub.s32 2, %v8270_v52 }
 0x166   :  { %2706 = vmatprep.subr.bf16.mxu0 %v7123_v36 }
 0x168   :  { %2752 = vmatpush1.bf16.msra.mxu1 %v7100_v19 }
 0x169   :  { %2753 = vmatprep.subr.bf16.mxu1 %v7108_v21  ;;  %2707 = vmatpush1.bf16.msra.mxu0 %v7121_v35  ;;  %v8311_v35 = vrot.slane %v997_v59, %v8295_v17 }
 0x16a   :  { %2708 = vmatprep.subr.bf16.mxu0 %v7129_v40 }
 0x16c   :  { %2754 = vmatpush1.bf16.msra.mxu1 %v7106_v23 }
 0x16d   :  { %2755 = vmatprep.subr.bf16.mxu1 %v7114_v25  ;;  %2709 = vmatpush1.bf16.msra.mxu0 %v7127_v42 }
 0x16e   :  { %2710 = vmatprep.subr.bf16.mxu0 %v7135_v44 }
 0x170   :  { %2756 = vmatpush1.bf16.msra.mxu1 %v7112_v27  ;;  %v8306_v27 = vsub.s32 3, %v8270_v52 }
 0x171   :  { %2757 = vmatprep.subr.bf16.mxu1 %v7120_v30  ;;  %2711 = vmatpush1.bf16.msra.mxu0 %v7133_v48 }
 0x172   :  { %3076 = vmatprep.subr.bf16.mxu0 %v7149_v50 }
 0x174   :  { %2758 = vmatpush1.bf16.msra.mxu1 %v7118_v33 }
 0x175   :  { %2759 = vmatprep.subr.bf16.mxu1 %v7126_v39 }
 0x178   :  { %2760 = vmatpush1.bf16.msra.mxu1 %v7124_v38  ;;  %v8317_v38 = vrot.slane %v997_v59, %v8306_v27 }
 0x179   :  { %2761 = vmatprep.subr.bf16.mxu1 %v7132_v41 }
 0x17c   :  { %2762 = vmatpush1.bf16.msra.mxu1 %v7130_v43 }
 0x17d   :  { %2763 = vmatprep.subr.bf16.mxu1 %v7138_v45 }
 0x180   :  { %2764 = vmatpush1.bf16.msra.mxu1 %v7136_v49 }
 0x181   :  { %3129 = vmatprep.subr.bf16.mxu1 %v7152_v51 }
 0x1d6   :  { %v8262_v63 = vpop.f32.mrb[0].mxu1 }
 0x1d7   :  { %v8264_v1 = vpop.f32.mrb[1].mxu1 }
 0x1d8   :  { %v458_v2 = vpop.f32.mrb[2].mxu1 }
 0x1d9   :  { %v459_v3 = vpop.f32.mrb[3].mxu1  ;;  %v8288_v2 = vrot.slane %v997_v59, %v8282_v60 }
 0x1f6   :  { %v8266_v28 = vpop.f32.mrb[16].mxu1 }
 0x1f7   :  { %v8268_v31 = vpop.f32.mrb[17].mxu1 }
 0x1f8   :  { %v529_v34 = vpop.f32.mrb[18].mxu1 }
 0x1f9   :  { %v530_v37 = vpop.f32.mrb[19].mxu1 }
 0x205   :  { %v648_v53 = vpop.f32.mrb[12].mxu0 }
 0x206   :  { %v8273_v54 = vadd.f32 %v648_v53, %v8262_v63  ;;  %v650_v55 = vpop.f32.mrb[13].mxu0 }
 0x207   :  { %v8279_v57 = vadd.f32 %v650_v55, %v8264_v1  ;;  %v652_v58 = vpop.f32.mrb[14].mxu0 }
 0x208   :  { %v653_v61 = vpop.f32.mrb[15].mxu0 }
 0x20d   :  { %v861_v63 = vpop.f32.mrb[0].mxu0 }
 0x20e   :  { %v1019_v3 = vadd.f32 %v8285_v62, %v861_v63  ;;  %v863_v4 = vpop.f32.mrb[1].mxu0 }
 0x20f   :  { %v1020_v5 = vadd.f32 %v8288_v2, %v863_v4  ;;  %v865_v1 = vpop.f32.mrb[2].mxu0 }
 0x210   :  { %v1023_v6 = vadd.f32 %v8285_v62, %v865_v1  ;;  %v867_v7 = vpop.f32.mrb[3].mxu0 }
 0x211   :  { %v1075_v8 = vcombine.low %v1019_v3, %v1020_v5  ;;  %v1076_v9 = vcombine.high %v1019_v3, %v1020_v5  ;;  %v1024_v10 = vadd.f32 %v8288_v2, %v867_v7 }
 0x213   :  { %v1111_v13 = vcombine.low %v1023_v6, %v1024_v10  ;;  %v1112_v14 = vcombine.high %v1023_v6, %v1024_v10 }
 0x215   :  { %v871_v16 = vpop.f32.mrb[4].mxu0 }
 0x216   :  { %v719_v15 = vpop.f32.mrb[20].mxu1  ;;  %v1027_v19 = vadd.f32 %v8285_v62, %v871_v16  ;;  %v873_v21 = vpop.f32.mrb[5].mxu0 }
 0x217   :  { %v8298_v18 = vadd.f32 %v719_v15, %v8266_v28  ;;  %v721_v20 = vpop.f32.mrb[21].mxu1  ;;  %v1028_v24 = vadd.f32 %v8288_v2, %v873_v21  ;;  %v875_v26 = vpop.f32.mrb[6].mxu0 }
 0x218   :  { %v8302_v23 = vadd.f32 %v721_v20, %v8268_v31  ;;  %v723_v25 = vpop.f32.mrb[22].mxu1  ;;  %v1031_v29 = vadd.f32 %v8285_v62, %v875_v26  ;;  %v877_v28 = vpop.f32.mrb[7].mxu0  ;;  %v8314_v31 = vsub.s32 %v1081_v22, %v8270_v52 }
 0x219   :  { %v724_v30 = vpop.f32.mrb[23].mxu1  ;;  %v1147_v32 = vcombine.low %v1027_v19, %v1028_v24  ;;  %v1148_v33 = vcombine.high %v1027_v19, %v1028_v24  ;;  %v1032_v34 = vadd.f32 %v8288_v2, %v877_v28 }
 0x21a   :  { %v1085_v45 = vrot.slane %v1075_v8, %v8314_v31  ;;  %v1092_v47 = vrot.slane %v1076_v9, %v8314_v31  ;;  %v1121_v53 = vrot.slane %v1111_v13, %v8314_v31  ;;  %v1128_v55 = vrot.slane %v1112_v14, %v8314_v31 }
 0x21b   :  { %v1183_v36 = vcombine.low %v1031_v29, %v1032_v34  ;;  %v1184_v37 = vcombine.high %v1031_v29, %v1032_v34  ;;  %v8332_v6 = vrot.slane %v1147_v32, %v8314_v31  ;;  %v8335_v7 = vrot.slane %v1148_v33, %v8314_v31 }
 0x21d   :  { %v881_v39 = vpop.f32.mrb[8].mxu0  ;;  %v8342_v10 = vrot.slane %v1183_v36, %v8314_v31  ;;  %v8345_v11 = vrot.slane %v1184_v37, %v8314_v31 }
 0x21e   :  { %v932_v40 = vpop.f32.mrb[4].mxu1  ;;  %v1035_v41 = vadd.f32 %v8285_v62, %v881_v39  ;;  %v883_v43 = vpop.f32.mrb[9].mxu0 }
 0x21f   :  { %v1021_v42 = vadd.f32 %v8311_v35, %v932_v40  ;;  %v934_v44 = vpop.f32.mrb[5].mxu1  ;;  %v1036_v48 = vadd.f32 %v8288_v2, %v883_v43  ;;  %v885_v50 = vpop.f32.mrb[10].mxu0 }
 0x220   :  { %v1022_v49 = vadd.f32 %v8317_v38, %v934_v44  ;;  %v936_v51 = vpop.f32.mrb[6].mxu1  ;;  %v8328_v58 = vadd.f32 %v8285_v62, %v885_v50  ;;  %v887_v61 = vpop.f32.mrb[11].mxu0 }
 0x221   :  { %v1025_v59 = vadd.f32 %v8311_v35, %v936_v51  ;;  %v938_v63 = vpop.f32.mrb[7].mxu1  ;;  %v1219_v3 = vcombine.low %v1035_v41, %v1036_v48  ;;  %v1220_v4 = vcombine.high %v1035_v41, %v1036_v48  ;;  %v8338_v8 = vadd.f32 %v8288_v2, %v887_v61 }
 0x222   :  { %v1077_v5 = vcombine.low %v1021_v42, %v1022_v49  ;;  %v1078_v1 = vcombine.high %v1021_v42, %v1022_v49  ;;  %v1026_v9 = vadd.f32 %v8317_v38, %v938_v63 }
 0x223   :  { %v1255_v14 = vcombine.low %v8328_v58, %v8338_v8  ;;  %v1256_v15 = vcombine.high %v8328_v58, %v8338_v8  ;;  %v8358_v29 = vrot.slane %v1219_v3, %v8314_v31  ;;  %v8361_v30 = vrot.slane %v1220_v4, %v8314_v31 }
 0x224   :  { %v1099_v12 = vrot.slane %v1077_v5, %v8314_v31  ;;  %v1106_v13 = vrot.slane %v1078_v1, %v8314_v31  ;;  %v1113_v16 = vcombine.low %v1025_v59, %v1026_v9  ;;  %v1114_v19 = vcombine.high %v1025_v59, %v1026_v9 }
 0x225   :  { %v8353_v25 = vpop.f32.mrb[16].mxu0 }
 0x226   :  { %v1107_v20 = vcombine.low %v1085_v45, %v1099_v12  ;;  %v1108_v21 = vcombine.high %v1085_v45, %v1099_v12  ;;  %v1109_v22 = vcombine.low %v1092_v47, %v1106_v13  ;;  %v1110_v24 = vcombine.high %v1092_v47, %v1106_v13  ;;  %v8355_v26 = vpop.f32.mrb[8].mxu1  ;;  %v8365_v33 = vpop.f32.mrb[17].mxu0 }
 0x227   :  { %v1135_v28 = vrot.slane %v1113_v16, %v8314_v31  ;;  %v1142_v32 = vrot.slane %v1114_v19, %v8314_v31  ;;  %v8367_v34 = vpop.f32.mrb[9].mxu1  ;;  %v895_v42 = vpop.f32.mrb[18].mxu0 }
 0x228   :  { %v6423_v36 = vrot.slane %v1107_v20, 9  ;;  %v6424_v37 = vrot.slane %v1108_v21, 9  ;;  %v6425_v39 = vrot.slane %v1109_v22, 9  ;;  %v6426_v40 = vrot.slane %v1110_v24, 9  ;;  %v8369_v41 = vpop.f32.mrb[10].mxu1  ;;  %v896_v49 = vpop.f32.mrb[19].mxu0 }
 0x229   :  { %v1143_v43 = vcombine.low %v1121_v53, %v1135_v28  ;;  %v1144_v44 = vcombine.high %v1121_v53, %v1135_v28  ;;  %v1145_v45 = vcombine.low %v1128_v55, %v1142_v32  ;;  %v1146_v47 = vcombine.high %v1128_v55, %v1142_v32  ;;  %v8371_v48 = vpop.f32.mrb[11].mxu1 }
 0x22a   :  { %v1439_v50 = vmax.f32 %v1107_v20, %v6423_v36  ;;  %v1440_v51 = vmax.f32 %v1108_v21, %v6424_v37  ;;  %v1441_v59 = vmax.f32 %v1109_v22, %v6425_v39  ;;  %v1442_v61 = vmax.f32 %v1110_v24, %v6426_v40 }
 0x22b   :  { %v6427_v63 = vrot.slane %v1143_v43, 9  ;;  %v6428_v3 = vrot.slane %v1144_v44, 9  ;;  %v6429_v4 = vrot.slane %v1145_v45, 9  ;;  %v6430_v5 = vrot.slane %v1146_v47, 9 }
 0x22c   :  { %v1495_v1 = vrot.slane %v1439_v50, 4  ;;  %v1496_v9 = vrot.slane %v1440_v51, 4  ;;  %v1497_v12 = vrot.slane %v1441_v59, 4  ;;  %v1498_v13 = vrot.slane %v1442_v61, 4 }
 0x22d   :  { %v1443_v53 = vmax.f32 %v1143_v43, %v6427_v63  ;;  %v1444_v16 = vmax.f32 %v1144_v44, %v6428_v3  ;;  %v1445_v55 = vmax.f32 %v1145_v45, %v6429_v4  ;;  %v1446_v19 = vmax.f32 %v1146_v47, %v6430_v5 }
 0x22e   :  { %v1551_v28 = vmax.f32 %v1439_v50, %v1495_v1  ;;  %v1552_v20 = vmax.f32 %v1440_v51, %v1496_v9  ;;  %v1553_v21 = vmax.f32 %v1441_v59, %v1497_v12  ;;  %v1554_v22 = vmax.f32 %v1442_v61, %v1498_v13  ;;  %v952_v24 = vpop.f32.mrb[12].mxu1 }
 0x22f   :  { %v1499_v32 = vrot.slane %v1443_v53, 4  ;;  %v1500_v36 = vrot.slane %v1444_v16, 4  ;;  %v1501_v37 = vrot.slane %v1445_v55, 4  ;;  %v1502_v39 = vrot.slane %v1446_v19, 4  ;;  %v954_v40 = vpop.f32.mrb[13].mxu1 }
 0x230   :  { %v1619_v42 = vrot.slane %v1551_v28, %v8276_v56  ;;  %v1623_v49 = vrot.slane %v1551_v28, %v8295_v17  ;;  %v1627_v43 = vrot.slane %v1552_v20, %v8276_v56  ;;  %v1631_v44 = vrot.slane %v1552_v20, %v8295_v17  ;;  %v956_v45 = vpop.f32.mrb[14].mxu1 }
 0x231   :  { %v1635_v47 = vrot.slane %v1553_v21, %v8276_v56  ;;  %v1639_v50 = vrot.slane %v1553_v21, %v8295_v17  ;;  %v1643_v51 = vrot.slane %v1554_v22, %v8276_v56  ;;  %v1647_v59 = vrot.slane %v1554_v22, %v8295_v17  ;;  %v958_v61 = vpop.f32.mrb[15].mxu1 }
 0x232   :  { %v1841_v63 = vsel %vm1840_vm5, %v1627_v43, %v1619_v42  ;;  %v1852_v3 = vsel %vm1840_vm5, %v1631_v44, %v1623_v49  ;;  %v1555_v4 = vmax.f32 %v1443_v53, %v1499_v32  ;;  %v1556_v5 = vmax.f32 %v1444_v16, %v1500_v36 }
 0x233   :  { %v1843_v1 = vsel %vm1842_vm6, %v1635_v47, %v1841_v63  ;;  %v1853_v9 = vsel %vm1842_vm6, %v1639_v50, %v1852_v3  ;;  %v8389_v12 = vrot.slane %v1255_v14, %v8314_v31  ;;  %v1557_v13 = vmax.f32 %v1445_v55, %v1501_v37 }
 0x234   :  { %v1845_v28 = vsel %vm1844_vm7, %v1643_v51, %v1843_v1  ;;  %v1854_v20 = vsel %vm1844_vm7, %v1647_v59, %v1853_v9  ;;  %v1651_v21 = vrot.slane %v1555_v4, %v8276_v56  ;;  %v1655_v53 = vrot.slane %v1555_v4, %v8295_v17 }
 0x235   :  { %v8399_v16 = vrot.slane %v1256_v15, %v8314_v31  ;;  %v8401_v22 = vmax.f32 %v1446_v19, %v1502_v39  ;;  %v1659_v14 = vrot.slane %v1556_v5, %v8276_v56  ;;  %v1663_v55 = vrot.slane %v1556_v5, %v8295_v17 }
 0x236   :  { %v1667_v32 = vrot.slane %v1557_v13, %v8276_v56  ;;  %v1671_v36 = vrot.slane %v1557_v13, %v8295_v17  ;;  %v1847_v37 = vsel %vm1846_vm8, %v1651_v21, %v1845_v28  ;;  %v1855_v42 = vsel %vm1846_vm8, %v1655_v53, %v1854_v20  ;;  %v8409_v49 = vpop.f32.mrb[24].mxu1 }
 0x237   :  { %v1849_v58 = vsel %vm1848_vm9, %v1659_v14, %v1847_v37  ;;  %v1856_v8 = vsel %vm1848_vm9, %v1663_v55, %v1855_v42  ;;  %v993_v15 = vadd.f32 %v8353_v25, %v8273_v54  ;;  %v1029_v19 = vadd.f32 %v8311_v35, %v8355_v26  ;;  %v8417_v39 = vpop.f32.mrb[25].mxu1 }
 0x238   :  { %v1851_v43 = vsel %vm1850_vm10, %v1667_v32, %v1849_v58  ;;  %v1857_v44 = vsel %vm1850_vm10, %v1671_v36, %v1856_v8  ;;  %v994_v47 = vadd.f32 %v8365_v33, %v8279_v57  ;;  %v1030_v50 = vadd.f32 %v8317_v38, %v8367_v34  ;;  %v966_v51 = vpop.f32.mrb[26].mxu1 }
 0x239   :  { %1903 = vst [vmem:[#allocation3] sm:$0xfe] %v1851_v43  ;;  %1905 = vst.msk [vmem:[#allocation3 + $0x8] sm:$0xfe] %vm1904_vm11, %v1857_v44  ;;  %v8427_v54 = vadd.f32 %v8285_v62, %v993_v15  ;;  %v1033_v25 = vadd.f32 %v8311_v35, %v8369_v41  ;;  %v1034_v26 = vadd.f32 %v8317_v38, %v8371_v48  ;;  %v967_v57 = vpop.f32.mrb[27].mxu1 }
 0x23a   :  { %v8434_v59 = vadd.f32 %v8311_v35, %v952_v24  ;;  %v8437_v33 = vadd.f32 %v8288_v2, %v994_v47  ;;  %v1149_v34 = vcombine.low %v1029_v19, %v1030_v50  ;;  %v1150_v63 = vcombine.high %v1029_v19, %v1030_v50 }
 0x23b   :  { %v8440_v3 = vadd.f32 %v8317_v38, %v954_v40  ;;  %v1675_v62 = vrot.slane %v8401_v22, %v8276_v56  ;;  %v1679_v41 = vrot.slane %v8401_v22, %v8295_v17  ;;  %v1185_v4 = vcombine.low %v1033_v25, %v1034_v26 }
 0x23c   :  { %v1186_v48 = vcombine.high %v1033_v25, %v1034_v26  ;;  %v1291_v24 = vcombine.low %v8427_v54, %v8437_v33  ;;  %v1292_v2 = vcombine.high %v8427_v54, %v8437_v33  ;;  %v1171_v5 = vrot.slane %v1149_v34, %v8314_v31 }
 0x23d   :  { %v1178_v1 = vrot.slane %v1150_v63, %v8314_v31  ;;  %v1207_v40 = vrot.slane %v1185_v4, %v8314_v31  ;;  %v1221_v13 = vcombine.low %v8434_v59, %v8440_v3  ;;  %v1222_v28 = vcombine.high %v8434_v59, %v8440_v3 }
 0x23e   :  { %v1214_v9 = vrot.slane %v1186_v48, %v8314_v31  ;;  %v1179_v20 = vcombine.low %v8332_v6, %v1171_v5  ;;  %v1180_v21 = vcombine.high %v8332_v6, %v1171_v5  ;;  %v8461_v53 = vadd.f32 %v8311_v35, %v956_v45 }
 0x23f   :  { %v8464_v14 = vadd.f32 %v8317_v38, %v958_v61  ;;  %v1181_v55 = vcombine.low %v8335_v7, %v1178_v1  ;;  %v1182_v32 = vcombine.high %v8335_v7, %v1178_v1  ;;  %v1215_v36 = vcombine.low %v8342_v10, %v1207_v40 }
 0x240   :  { %v1216_v37 = vcombine.high %v8342_v10, %v1207_v40  ;;  %v6431_v42 = vrot.slane %v1179_v20, 9  ;;  %v6432_v58 = vrot.slane %v1180_v21, 9  ;;  %v1217_v8 = vcombine.low %v8345_v11, %v1214_v9 }
 0x241   :  { %v1218_v6 = vcombine.high %v8345_v11, %v1214_v9  ;;  %v6433_v45 = vrot.slane %v1181_v55, 9  ;;  %v6434_v15 = vrot.slane %v1182_v32, 9  ;;  %v6435_v19 = vrot.slane %v1215_v36, 9 }
 0x242   :  { %v6436_v61 = vrot.slane %v1216_v37, 9  ;;  %v1447_v43 = vmax.f32 %v1179_v20, %v6431_v42  ;;  %v1448_v44 = vmax.f32 %v1180_v21, %v6432_v58  ;;  %v6437_v47 = vrot.slane %v1217_v8, 9 }
 0x243   :  { %v6438_v50 = vrot.slane %v1218_v6, 9  ;;  %v1449_v7 = vmax.f32 %v1181_v55, %v6433_v45  ;;  %v1450_v51 = vmax.f32 %v1182_v32, %v6434_v15  ;;  %v1451_v25 = vmax.f32 %v1215_v36, %v6435_v19 }
 0x244   :  { %v1452_v26 = vmax.f32 %v1216_v37, %v6436_v61  ;;  %v1503_v57 = vrot.slane %v1447_v43, 4  ;;  %v1504_v10 = vrot.slane %v1448_v44, 4  ;;  %v1453_v34 = vmax.f32 %v1217_v8, %v6437_v47 }
 0x245   :  { %v1454_v63 = vmax.f32 %v1218_v6, %v6438_v50  ;;  %v1505_v4 = vrot.slane %v1449_v7, 4  ;;  %v1506_v48 = vrot.slane %v1450_v51, 4  ;;  %v1507_v5 = vrot.slane %v1451_v25, 4 }
 0x246   :  { %v1508_v11 = vrot.slane %v1452_v26, 4  ;;  %v1559_v1 = vmax.f32 %v1447_v43, %v1503_v57  ;;  %v1560_v40 = vmax.f32 %v1448_v44, %v1504_v10  ;;  %v1509_v9 = vrot.slane %v1453_v34, 4 }
 0x247   :  { %v1510_v20 = vrot.slane %v1454_v63, 4  ;;  %v1561_v21 = vmax.f32 %v1449_v7, %v1505_v4  ;;  %v1562_v42 = vmax.f32 %v1450_v51, %v1506_v48  ;;  %v1563_v58 = vmax.f32 %v1451_v25, %v1507_v5 }
 0x248   :  { %v1564_v55 = vmax.f32 %v1452_v26, %v1508_v11  ;;  %v1683_v32 = vrot.slane %v1559_v1, %v8276_v56  ;;  %v1687_v36 = vrot.slane %v1559_v1, %v8295_v17  ;;  %v1691_v37 = vrot.slane %v1560_v40, %v8276_v56 }
 0x249   :  { %v1695_v8 = vrot.slane %v1560_v40, %v8295_v17  ;;  %v1699_v6 = vrot.slane %v1561_v21, %v8276_v56  ;;  %v1703_v45 = vrot.slane %v1561_v21, %v8295_v17  ;;  %v1707_v15 = vrot.slane %v1562_v42, %v8276_v56 }
 0x24a   :  { %v1711_v19 = vrot.slane %v1562_v42, %v8295_v17  ;;  %v1859_v61 = vsel %vm1858_vm12, %v1683_v32, %v1675_v62  ;;  %v1865_v43 = vsel %vm1858_vm12, %v1687_v36, %v1679_v41  ;;  %v1565_v44 = vmax.f32 %v1453_v34, %v1509_v9 }
 0x24b   :  { %v1566_v47 = vmax.f32 %v1454_v63, %v1510_v20  ;;  %v1860_v50 = vsel %vm1840_vm5, %v1691_v37, %v1859_v61  ;;  %v1866_v7 = vsel %vm1840_vm5, %v1695_v8, %v1865_v43  ;;  %v1715_v51 = vrot.slane %v1563_v58, %v8276_v56 }
 0x24c   :  { %v1719_v25 = vrot.slane %v1563_v58, %v8295_v17  ;;  %v1861_v26 = vsel %vm1842_vm6, %v1699_v6, %v1860_v50  ;;  %v1867_v57 = vsel %vm1842_vm6, %v1703_v45, %v1866_v7  ;;  %v1723_v62 = vrot.slane %v1564_v55, %v8276_v56 }
 0x24d   :  { %v1727_v22 = vrot.slane %v1564_v55, %v8295_v17  ;;  %v1862_v41 = vsel %vm1844_vm7, %v1707_v15, %v1861_v26  ;;  %v1868_v10 = vsel %vm1844_vm7, %v1711_v19, %v1867_v57  ;;  %v1731_v34 = vrot.slane %v1565_v44, %v8276_v56 }
 0x24e   :  { %v1735_v63 = vrot.slane %v1565_v44, %v8295_v17  ;;  %v1739_v4 = vrot.slane %v1566_v47, %v8276_v56  ;;  %v1743_v48 = vrot.slane %v1566_v47, %v8295_v17  ;;  %v1863_v5 = vsel %vm1846_vm8, %v1715_v51, %v1862_v41 }
 0x24f   :  { %v1869_v11 = vsel %vm1846_vm8, %v1719_v25, %v1868_v10  ;;  %v1864_v1 = vsel %vm1848_vm9, %v1723_v62, %v1863_v5  ;;  %v1243_v9 = vrot.slane %v1221_v13, %v8314_v31  ;;  %v1250_v20 = vrot.slane %v1222_v28, %v8314_v31 }
 0x250   :  { %v1870_v40 = vsel %vm1848_vm9, %v1727_v22, %v1869_v11  ;;  %v1871_v21 = vsel %vm1840_vm5, %v1739_v4, %v1731_v34  ;;  %v1877_v42 = vsel %vm1840_vm5, %v1743_v48, %v1735_v63  ;;  %1906 = vst [vmem:[#allocation3 + $0x10] sm:$0x7f] %v1864_v1  ;;  %v1257_v58 = vcombine.low %v8461_v53, %v8464_v14 }
 0x251   :  { %1908 = vst.msk [vmem:[#allocation3 + $0x18] sm:$0x7f] %vm1907_vm13, %v1870_v40  ;;  %v1258_v55 = vcombine.high %v8461_v53, %v8464_v14  ;;  %v1251_v13 = vcombine.low %v8358_v29, %v1243_v9  ;;  %v1252_v32 = vcombine.high %v8358_v29, %v1243_v9  ;;  %v1253_v59 = vcombine.low %v8361_v30, %v1250_v20 }
 0x252   :  { %v1254_v3 = vcombine.high %v8361_v30, %v1250_v20  ;;  %v1279_v28 = vrot.slane %v1257_v58, %v8314_v31  ;;  %v8529_v37 = vadd.f32 %v8409_v49, %v8298_v18  ;;  %v8533_v8 = vadd.f32 %v8417_v39, %v8302_v23 }
 0x253   :  { %v1286_v36 = vrot.slane %v1258_v55, %v8314_v31  ;;  %v6439_v53 = vrot.slane %v1251_v13, 9  ;;  %v6440_v14 = vrot.slane %v1252_v32, 9  ;;  %v6441_v6 = vrot.slane %v1253_v59, 9 }
 0x254   :  { %v6442_v29 = vrot.slane %v1254_v3, 9  ;;  %v1287_v45 = vcombine.low %v8389_v12, %v1279_v28  ;;  %v1288_v30 = vcombine.high %v8389_v12, %v1279_v28 }
 0x255   :  { %v1289_v15 = vcombine.low %v8399_v16, %v1286_v36  ;;  %v1290_v19 = vcombine.high %v8399_v16, %v1286_v36  ;;  %v1455_v61 = vmax.f32 %v1251_v13, %v6439_v53  ;;  %v1456_v43 = vmax.f32 %v1252_v32, %v6440_v14 }
 0x256   :  { %v1457_v18 = vmax.f32 %v1253_v59, %v6441_v6  ;;  %v1458_v49 = vmax.f32 %v1254_v3, %v6442_v29  ;;  %v6443_v44 = vrot.slane %v1287_v45, 9  ;;  %v6444_v47 = vrot.slane %v1288_v30, 9 }
 0x257   :  { %v6445_v23 = vrot.slane %v1289_v15, 9  ;;  %v6446_v39 = vrot.slane %v1290_v19, 9  ;;  %v1511_v50 = vrot.slane %v1455_v61, 4  ;;  %v1512_v7 = vrot.slane %v1456_v43, 4 }
 0x258   :  { %v1513_v51 = vrot.slane %v1457_v18, 4  ;;  %v1514_v25 = vrot.slane %v1458_v49, 4  ;;  %v1459_v26 = vmax.f32 %v1287_v45, %v6443_v44  ;;  %v1460_v57 = vmax.f32 %v1288_v30, %v6444_v47 }
 0x259   :  { %v1461_v12 = vmax.f32 %v1289_v15, %v6445_v23  ;;  %v1462_v62 = vmax.f32 %v1290_v19, %v6446_v39  ;;  %v1567_v22 = vmax.f32 %v1455_v61, %v1511_v50  ;;  %v1568_v41 = vmax.f32 %v1456_v43, %v1512_v7  ;;  %v7139_v15 = vld [vmem:[#allocation3] ss:$8 sps:$4 sm:$0xee]   ;;  %v7142_v23 = vld [vmem:[#allocation3 + $0x10] ss:$8 sps:$4 sm:$0xff]  }
 0x25a   :  { %v1569_v16 = vmax.f32 %v1457_v18, %v1513_v51  ;;  %v1570_v10 = vmax.f32 %v1458_v49, %v1514_v25  ;;  %v1515_v34 = vrot.slane %v1459_v26, 4  ;;  %v1516_v63 = vrot.slane %v1460_v57, 4 }
 0x25b   :  { %v1517_v4 = vrot.slane %v1461_v12, 4  ;;  %v1518_v48 = vrot.slane %v1462_v62, 4  ;;  %v1747_v5 = vrot.slane %v1567_v22, %v8276_v56  ;;  %v1751_v11 = vrot.slane %v1567_v22, %v8295_v17  ;;  %v7144_v22 = vld [vmem:[#allocation3 + $0x14] ss:$8 sps:$4 sm:$0x77]  }
 0x25c   :  { %v1755_v1 = vrot.slane %v1568_v41, %v8276_v56  ;;  %v1759_v40 = vrot.slane %v1568_v41, %v8295_v17  ;;  %v1763_v9 = vrot.slane %v1569_v16, %v8276_v56  ;;  %v1767_v20 = vrot.slane %v1569_v16, %v8295_v17 }
 0x25d   :  { %v1771_v58 = vrot.slane %v1570_v10, %v8276_v56  ;;  %v1775_v55 = vrot.slane %v1570_v10, %v8295_v17  ;;  %v1872_v13 = vsel %vm1842_vm6, %v1747_v5, %v1871_v21  ;;  %v1878_v32 = vsel %vm1842_vm6, %v1751_v11, %v1877_v42  ;;  %v7141_v21 = vld [vmem:[#allocation3 + $0x4] ss:$8 sps:$4 sm:$0xff]  }
 0x25e   :  { %v1571_v59 = vmax.f32 %v1459_v26, %v1515_v34  ;;  %v1572_v3 = vmax.f32 %v1460_v57, %v1516_v63  ;;  %v1873_v28 = vsel %vm1844_vm7, %v1755_v1, %v1872_v13  ;;  %v1879_v36 = vsel %vm1844_vm7, %v1759_v40, %v1878_v32 }
 0x25f   :  { %v1573_v53 = vmax.f32 %v1461_v12, %v1517_v4  ;;  %v1574_v14 = vmax.f32 %v1462_v62, %v1518_v48  ;;  %v1874_v6 = vsel %vm1846_vm8, %v1763_v9, %v1873_v28  ;;  %v1880_v29 = vsel %vm1846_vm8, %v1767_v20, %v1879_v36 }
 0x260   :  { %v1779_v45 = vrot.slane %v1571_v59, %v8276_v56  ;;  %v1783_v30 = vrot.slane %v1571_v59, %v8295_v17  ;;  %v1875_v42 = vsel %vm1848_vm9, %v1771_v58, %v1874_v6  ;;  %v1881_v19 = vsel %vm1848_vm9, %v1775_v55, %v1880_v29 }
 0x261   :  { %v1787_v61 = vrot.slane %v1572_v3, %v8276_v56  ;;  %v1791_v43 = vrot.slane %v1572_v3, %v8295_v17  ;;  %v1795_v18 = vrot.slane %v1573_v53, %v8276_v56  ;;  %v1799_v49 = vrot.slane %v1573_v53, %v8295_v17 }
 0x262   :  { %v1803_v44 = vrot.slane %v1574_v14, %v8276_v56  ;;  %v1807_v47 = vrot.slane %v1574_v14, %v8295_v17  ;;  %v1876_v50 = vsel %vm1850_vm10, %v1779_v45, %v1875_v42  ;;  %v1882_v7 = vsel %vm1850_vm10, %v1783_v30, %v1881_v19 }
 0x263   :  { %v1045_v51 = vadd.f32 %v8311_v35, %v8529_v37  ;;  %v1046_v25 = vadd.f32 %v8317_v38, %v8533_v8  ;;  %v1883_v26 = vsel %vm1858_vm12, %v1795_v18, %v1787_v61  ;;  %v1889_v57 = vsel %vm1858_vm12, %v1799_v49, %v1791_v43  ;;  %1909 = vst [vmem:[#allocation3 + $0x20] sm:$0xfe] %v1876_v50 }
 0x264   :  { %1910 = vst.msk [vmem:[#allocation3 + $0x28] sm:$0xfe] %vm1904_vm11, %v1882_v7  ;;  %v2154_v12 = vrot.slane %v7139_v15, %v8314_v31  ;;  %v2161_v62 = vrot.slane %v7141_v21, %v8314_v31  ;;  %v8581_v41 = vsel %vm1840_vm5, %v1803_v44, %v1883_v26  ;;  %v8584_v35 = vsel %vm1840_vm5, %v1807_v47, %v1889_v57 }
 0x265   :  { %v1293_v37 = vcombine.low %v1045_v51, %v1046_v25  ;;  %v1294_v38 = vcombine.high %v1045_v51, %v1046_v25  ;;  %v1301_v8 = vrot.slane %v1291_v24, %v8314_v31  ;;  %v2172_v34 = vrot.slane %v7142_v23, %v8314_v31 }
 0x266   :  { %v2162_v16 = vcombine.high %v2154_v12, %v2154_v12  ;;  %v2163_v10 = vcombine.high %v2161_v62, %v2161_v62  ;;  %v1308_v63 = vrot.slane %v1292_v2, %v8314_v31  ;;  %v2227_v5 = vrot.slane %v2161_v62, 7 }
 0x267   :  { %v1315_v4 = vrot.slane %v1293_v37, %v8314_v31  ;;  %v1322_v48 = vrot.slane %v1294_v38, %v8314_v31  ;;  %v2179_v11 = vrot.slane %v7144_v22, %v8314_v31  ;;  %v6451_v1 = vrot.slane %v2154_v12, 9 }
 0x268   :  { %v2224_v40 = vrot.slane %v2162_v16, 7  ;;  %v2230_v9 = vrot.slane %v2163_v10, 7  ;;  %v2180_v33 = vcombine.high %v2172_v34, %v2172_v34  ;;  %v2229_v13 = vrot.slane %v2227_v5, 2 }
 0x269   :  { %v1323_v20 = vcombine.low %v1301_v8, %v1315_v4  ;;  %v1324_v58 = vcombine.high %v1301_v8, %v1315_v4  ;;  %v1325_v55 = vcombine.low %v1308_v63, %v1322_v48  ;;  %v1326_v54 = vcombine.high %v1308_v63, %v1322_v48 }
 0x26a   :  { %v2226_v2 = vrot.slane %v2224_v40, 2  ;;  %v2232_v32 = vrot.slane %v2230_v9, 2  ;;  %v2181_v53 = vcombine.high %v2179_v11, %v2179_v11  ;;  %v2225_v6 = vsel %vm8602_vm1, %v6451_v1, %v2224_v40 }
 0x26b   :  { %v6447_v59 = vrot.slane %v1323_v20, 9  ;;  %v6448_v3 = vrot.slane %v1324_v58, 9  ;;  %v6449_v28 = vrot.slane %v1325_v55, 9  ;;  %v6450_v36 = vrot.slane %v1326_v54, 9 }
 0x26c   :  { %v7145_v14 = vld [vmem:[#allocation3 + $0x20] ss:$8 sps:$4 sm:$0xee]   ;;  %v2228_v29 = vsel %vm8602_vm1, %v2226_v2, %v2227_v5  ;;  %v2233_v45 = vrot.slane %v2172_v34, 7  ;;  %v2231_v61 = vsel %vm8602_vm1, %v2229_v13, %v2230_v9  ;;  %v2236_v18 = vrot.slane %v2180_v33, 7 }
 0x26d   :  { %v1463_v30 = vmax.f32 %v1323_v20, %v6447_v59  ;;  %v1464_v15 = vmax.f32 %v1324_v58, %v6448_v3  ;;  %v1465_v21 = vmax.f32 %v1325_v55, %v6449_v28  ;;  %v1466_v42 = vmax.f32 %v1326_v54, %v6450_v36  ;;  %v7165_v33 = vld [vmem:[#allocation3 + $0x24] ss:$8 sps:$4 sm:$0xff]  }
 0x26e   :  { %v2190_v19 = vrot.slane %v7145_v14, %v8314_v31  ;;  %v2235_v43 = vrot.slane %v2233_v45, 2  ;;  %v2234_v50 = vsel %vm8602_vm1, %v2232_v32, %v2233_v45  ;;  %v2238_v7 = vrot.slane %v2236_v18, 2  ;;  %v7175_v45 = vld [vmem:[#allocation3] ss:$8 sps:$4 sm:$0xff]  }
 0x26f   :  { %v1519_v49 = vrot.slane %v1463_v30, 4  ;;  %v1520_v44 = vrot.slane %v1464_v15, 4  ;;  %v1521_v47 = vrot.slane %v1465_v21, 4  ;;  %v1522_v23 = vrot.slane %v1466_v42, 4 }
 0x270   :  { %v2198_v39 = vcombine.high %v2190_v19, %v2190_v19  ;;  %v2239_v51 = vrot.slane %v2179_v11, 7  ;;  %v2237_v62 = vsel %vm8602_vm1, %v2235_v43, %v2236_v18  ;;  %v2242_v38 = vrot.slane %v2181_v53, 7  ;;  %v7178_v43 = vld [vmem:[#allocation3 + $0x10] ss:$8 sps:$4 sm:$0xff]   ;;  %v7150_v18 = vld [vmem:[#allocation10 + $0x8] ss:$16 sps:$4 sm:$0xff]  }
 0x271   :  { %v1575_v25 = vmax.f32 %v1463_v30, %v1519_v49  ;;  %v1576_v26 = vmax.f32 %v1464_v15, %v1520_v44  ;;  %v1577_v57 = vmax.f32 %v1465_v21, %v1521_v47  ;;  %v1578_v12 = vmax.f32 %v1466_v42, %v1522_v23  ;;  %v7177_v30 = vld [vmem:[#allocation3 + $0x4] ss:$8 sps:$4 sm:$0xff]   ;;  %v7155_v49 = vld [vmem:[#allocation10 + $0x24] ss:$16 sps:$4 sm:$0xff]   ;;  %v7158_v44 = vld [vmem:[#allocation10 + $0x2c] ss:$16 sps:$4 sm:$0xff]  }
 0x272   :  { %v2240_v22 = vsel %vm8602_vm1, %v2238_v7, %v2239_v51  ;;  %v2241_v37 = vrot.slane %v2239_v51, 2  ;;  %v6452_v5 = vrot.slane %v2190_v19, 9  ;;  %v8631_v9 = vrot.slane %v2198_v39, 7  ;;  %v7180_v51 = vld [vmem:[#allocation3 + $0x14] ss:$8 sps:$4 sm:$0x33]  }
 0x273   :  { %v1811_v8 = vrot.slane %v1575_v25, %v8276_v56  ;;  %v1815_v16 = vrot.slane %v1575_v25, %v8295_v17  ;;  %v1819_v10 = vrot.slane %v1576_v26, %v8276_v56  ;;  %v1823_v34 = vrot.slane %v1576_v26, %v8295_v17  ;;  %v7181_v25 = vld [vmem:[#allocation3 + $0x20] ss:$8 sps:$4 sm:$0xff]  }
 0x274   :  { %v1827_v63 = vrot.slane %v1577_v57, %v8276_v56  ;;  %v1831_v4 = vrot.slane %v1577_v57, %v8295_v17  ;;  %v1835_v48 = vrot.slane %v1578_v12, %v8276_v56  ;;  %v1839_v11 = vrot.slane %v1578_v12, %v8295_v17 }
 0x275   :  { %v1885_v1 = vsel %vm1842_vm6, %v1811_v8, %v8581_v41  ;;  %v1891_v40 = vsel %vm1842_vm6, %v1815_v16, %v8584_v35  ;;  %v2266_v55 = vcombine.low %v2225_v6, %v2228_v29  ;;  %v2267_v54 = vcombine.low %v2231_v61, %v2234_v50  ;;  %v7147_v61 = vld [vmem:[#allocation10] ss:$16 sps:$4 sm:$0xff]   ;;  %v7156_v16 = vld [vmem:[#allocation10 + $0x28] ss:$16 sps:$4 sm:$0xff]  }
 0x276   :  { %v1886_v20 = vsel %vm1844_vm7, %v1819_v10, %v1885_v1  ;;  %v1892_v58 = vsel %vm1844_vm7, %v1823_v34, %v1891_v40  ;;  %v2247_v41 = vsel %vm8602_vm1, %v6452_v5, %v8631_v9  ;;  %v2284_v32 = vcombine.low %v2237_v62, %v2240_v22  ;;  %v7153_v8 = vld [vmem:[#allocation10 + $0x20] ss:$16 sps:$4 sm:$0xff]   ;;  %v7164_v5 = vld [vmem:[#allocation10 + $0x4c] ss:$16 sps:$4 sm:$0xff]  }
 0x277   :  { %v1887_v2 = vsel %vm1846_vm8, %v1827_v63, %v1886_v20  ;;  %v1893_v13 = vsel %vm1846_vm8, %v1831_v4, %v1892_v58  ;;  %v2243_v3 = vsel %vm8602_vm1, %v2241_v37, %v2242_v38  ;;  %v2281_v28 = vrot.slane %v2267_v54, %v8314_v31 }
 0x278   :  { %v1888_v35 = vsel %vm1848_vm9, %v1835_v48, %v1887_v2  ;;  %v1894_v59 = vsel %vm1848_vm9, %v1839_v11, %v1893_v13  ;;  %v2285_v36 = vcombine.low %v2243_v3, %v2247_v41  ;;  %v2197_v53 = vrot.slane %v7165_v33, %v8314_v31  ;;  %v7161_v48 = vld [vmem:[#allocation10 + $0x44] ss:$16 sps:$4 sm:$0xff]   ;;  %v7159_v41 = vld [vmem:[#allocation10 + $0x40] ss:$16 sps:$4 sm:$0xff]  }
 0x279   :  { %1911 = vst [vmem:[#allocation3 + $0x30] sm:$0x7f] %v1888_v35  ;;  %1912 = vst.msk [vmem:[#allocation3 + $0x38] sm:$0x7f] %vm1907_vm13, %v1894_v59  ;;  %v2274_v14 = vrot.slane %v2266_v55, %v8314_v31  ;;  %v2292_v6 = vrot.slane %v2284_v32, %v8314_v31  ;;  %v1937_v7 = vrot.slane %v7175_v45, %v8314_v31  ;;  %v2248_v62 = vrot.slane %v8631_v9, 2 }
 0x27a   :  { %v2299_v29 = vrot.slane %v2285_v36, %v8314_v31  ;;  %v2199_v47 = vcombine.high %v2197_v53, %v2197_v53  ;;  %v2249_v50 = vrot.slane %v2197_v53, 7  ;;  %v1944_v57 = vrot.slane %v7177_v30, %v8314_v31  ;;  %v7162_v32 = vld [vmem:[#allocation10 + $0x48] ss:$16 sps:$4 sm:$0xff]   ;;  %v7174_v45 = vld [vmem:[#allocation10 + $0x6c] ss:$16 sps:$4 sm:$0xff]  }
 0x27b   :  { %v2282_v15 = vcombine.low %v2274_v14, %v2281_v28  ;;  %v2283_v21 = vcombine.high %v2274_v14, %v2281_v28  ;;  %v1955_v22 = vrot.slane %v7178_v43, %v8314_v31  ;;  %v1945_v63 = vcombine.high %v1937_v7, %v1937_v7 }
 0x27c   :  { %v2300_v42 = vcombine.low %v2292_v6, %v2299_v29  ;;  %v2301_v19 = vcombine.high %v2292_v6, %v2299_v29  ;;  %v2252_v38 = vrot.slane %v2199_v47, 7  ;;  %v2251_v34 = vrot.slane %v2249_v50, 2  ;;  %v7171_v29 = vld [vmem:[#allocation10 + $0x64] ss:$16 sps:$4 sm:$0xff]  }
 0x27d   :  { %v8659_v4 = vrot.slane %v7181_v25, %v8314_v31  ;;  %v1946_v40 = vcombine.high %v1944_v57, %v1944_v57  ;;  %v1962_v9 = vrot.slane %v7180_v51, %v8314_v31  ;;  %v2250_v58 = vsel %vm8602_vm1, %v2248_v62, %v2249_v50  ;;  %v7188_v50 = vld [vmem:[#allocation10 + $0x8c] ss:$16 sps:$4 sm:$0xff]  }
 0x27e   :  { %v2338_v23 = vpack.c.bf16 %v2301_v19, %v2283_v21  ;;  %v2337_v39 = vpack.c.bf16 %v2300_v42, %v2282_v15  ;;  %v1963_v54 = vcombine.high %v1955_v22, %v1955_v22  ;;  %v2254_v33 = vrot.slane %v2252_v38, 2 }
 0x27f   :  { %v2253_v35 = vsel %vm8602_vm1, %v2251_v34, %v2252_v38  ;;  %v2018_v28 = vcombine.low %v1962_v9, %v8659_v4  ;;  %v1999_v15 = vcombine.low %v1937_v7, %v1945_v63  ;;  %v2000_v21 = vcombine.low %v1944_v57, %v1946_v40  ;;  %v7191_v34 = vld [vmem:[#allocation10 + $0xa4] ss:$16 sps:$4 sm:$0xff]   ;;  %v7194_v63 = vld [vmem:[#allocation10 + $0xac] ss:$16 sps:$4 sm:$0xff]   ;;  %v7195_v40 = vld [vmem:[#allocation10 + $0xc0] ss:$16 sps:$4 sm:$0xff]  }
 0x280   :  { %v7166_v26 = vld [vmem:[#allocation3 + $0x30] ss:$8 sps:$4 sm:$0xff]   ;;  %6509 = vmatprep.mubr.msk.bf16.mxu0 %vm1580_vm4, %v2338_v23  ;;  %6511 = vmatprep.mubr.msk.bf16.mxu1 %vm1580_vm4, %v2338_v23  ;;  %v7168_v12 = vld [vmem:[#allocation3 + $0x34] ss:$8 sps:$4 sm:$0x77]   ;;  %v2302_v6 = vcombine.low %v2250_v58, %v2253_v35  ;;  %v2017_v42 = vcombine.low %v1955_v22, %v1963_v54 }
 0x281   :  { %2717 = vmatmul.mubr.bf16.vlgmr.msra.gmra.mrb[20].mxu0 %v2337_v39  ;;  %2770 = vmatmul.mubr.bf16.vlgmr.msra.gmra.mrb[28].mxu1 %v2337_v39  ;;  %v2208_v37 = vrot.slane %v7166_v26, %v8314_v31  ;;  %v2215_v10 = vrot.slane %v7168_v12, %v8314_v31  ;;  %v8677_v47 = vrot.slane %v2018_v28, %v8314_v31  ;;  %v7185_v39 = vld [vmem:[#allocation10 + $0x84] ss:$16 sps:$4 sm:$0xff]   ;;  %v7198_v9 = vld [vmem:[#allocation10 + $0xc8] ss:$16 sps:$4 sm:$0xff]   ;;  %v7206_v58 = vld [vmem:[#allocation10 + $0xec] ss:$16 sps:$4 sm:$0xff]  }
 0x282   :  { %3077 = vmatpush1.bf16.msra.mxu0 %v7147_v61  ;;  %3130 = vmatpush1.bf16.msra.mxu1 %v7150_v18  ;;  %v2310_v23 = vrot.slane %v2302_v6, %v8314_v31  ;;  %v8682_v24 = vrot.slane %v1999_v15, %v8314_v31  ;;  %v8685_v51 = vrot.slane %v2000_v21, %v8314_v31  ;;  %v7204_v54 = vld [vmem:[#allocation10 + $0xe8] ss:$16 sps:$4 sm:$0xff]   ;;  %v7218_v35 = vld [vmem:[#allocation10 + $0x12c] ss:$16 sps:$4 sm:$0xff]   ;;  %v7227_v15 = vld [vmem:[#allocation10 + $0x164] ss:$16 sps:$4 sm:$0xff]  }
 0x283   :  { %3078 = vmatprep.subr.bf16.mxu0 %v7155_v49  ;;  %3131 = vmatprep.subr.bf16.mxu1 %v7158_v44  ;;  %v2216_v11 = vcombine.high %v2208_v37, %v2208_v37  ;;  %v2255_v1 = vrot.slane %v2208_v37, 7  ;;  %v2217_v20 = vcombine.high %v2215_v10, %v2215_v10  ;;  %v2261_v55 = vrot.slane %v2215_v10, 7  ;;  %v7169_v49 = vld [vmem:[#allocation10 + $0x60] ss:$16 sps:$4 sm:$0xff]   ;;  %v7172_v44 = vld [vmem:[#allocation10 + $0x68] ss:$16 sps:$4 sm:$0xff]  }
 0x284   :  { %v8688_v25 = vrot.slane %v2017_v42, %v8314_v31  ;;  %v2016_v37 = vcombine.high %v8682_v24, %v8685_v51  ;;  %v7216_v28 = vld [vmem:[#allocation10 + $0x128] ss:$16 sps:$4 sm:$0xff]   ;;  %v7230_v21 = vld [vmem:[#allocation10 + $0x16c] ss:$16 sps:$4 sm:$0xff]  }
 0x285   :  { %v2257_v2 = vrot.slane %v2255_v1, 2  ;;  %v2258_v13 = vrot.slane %v2216_v11, 7  ;;  %v2263_v59 = vrot.slane %v2261_v55, 2  ;;  %v2264_v3 = vrot.slane %v2217_v20, 7  ;;  %v7197_v11 = vld [vmem:[#allocation10 + $0xc4] ss:$16 sps:$4 sm:$0xff]  }
 0x286   :  { %3079 = vmatpush1.bf16.msra.mxu0 %v7153_v8  ;;  %3132 = vmatpush1.bf16.msra.mxu1 %v7156_v16  ;;  %v2256_v36 = vsel %vm8602_vm1, %v2254_v33, %v2255_v1  ;;  %v2034_v62 = vcombine.high %v8688_v25, %v8677_v47  ;;  %v7183_v8 = vld [vmem:[#allocation10 + $0x80] ss:$16 sps:$4 sm:$0xff]   ;;  %v7186_v16 = vld [vmem:[#allocation10 + $0x88] ss:$16 sps:$4 sm:$0xff]   ;;  %v7200_v1 = vld [vmem:[#allocation10 + $0xcc] ss:$16 sps:$4 sm:$0xff]  }
 0x287   :  { %3080 = vmatprep.subr.bf16.mxu0 %v7161_v48  ;;  %3133 = vmatprep.subr.bf16.mxu1 %v7164_v5  ;;  %v2259_v53 = vsel %vm8602_vm1, %v2257_v2, %v2258_v13  ;;  %v2260_v14 = vrot.slane %v2258_v13, 2  ;;  %v2265_v61 = vsel %vm8602_vm1, %v2263_v59, %v2264_v3  ;;  %v7189_v48 = vld [vmem:[#allocation10 + $0xa0] ss:$16 sps:$4 sm:$0xff]   ;;  %v7192_v5 = vld [vmem:[#allocation10 + $0xa8] ss:$16 sps:$4 sm:$0xff]  }
 0x288   :  { %v2303_v30 = vcombine.low %v2256_v36, %v2259_v53  ;;  %v2071_v10 = vpack.c.bf16 %v2034_v62, %v2016_v37  ;;  %v7203_v20 = vld [vmem:[#allocation10 + $0xe4] ss:$16 sps:$4 sm:$0xff]   ;;  %v7212_v2 = vld [vmem:[#allocation10 + $0x10c] ss:$16 sps:$4 sm:$0xff]   ;;  %v7207_v13 = vld [vmem:[#allocation10 + $0x100] ss:$16 sps:$4 sm:$0xff]  }
 0x289   :  { %v2262_v19 = vsel %vm8602_vm1, %v2260_v14, %v2261_v55  ;;  %v7201_v55 = vld [vmem:[#allocation10 + $0xe0] ss:$16 sps:$4 sm:$0xff]   ;;  %v7209_v33 = vld [vmem:[#allocation10 + $0x104] ss:$16 sps:$4 sm:$0xff]   ;;  %v7224_v53 = vld [vmem:[#allocation10 + $0x14c] ss:$16 sps:$4 sm:$0xff]  }
 0x28a   :  { %3081 = vmatpush1.bf16.msra.mxu0 %v7159_v41  ;;  %3134 = vmatpush1.bf16.msra.mxu1 %v7162_v32  ;;  %v2317_v43 = vrot.slane %v2303_v30, %v8314_v31  ;;  %v2320_v18 = vcombine.low %v2262_v19, %v2265_v61  ;;  %v7210_v41 = vld [vmem:[#allocation10 + $0x108] ss:$16 sps:$4 sm:$0xff]   ;;  %v7215_v32 = vld [vmem:[#allocation10 + $0x124] ss:$16 sps:$4 sm:$0xff]   ;;  %v7213_v3 = vld [vmem:[#allocation10 + $0x120] ss:$16 sps:$4 sm:$0xff]  }
 0x28b   :  { %3082 = vmatprep.subr.bf16.mxu0 %v7171_v29  ;;  %3135 = vmatprep.subr.bf16.mxu1 %v7174_v45  ;;  %v7250_v59 = vld [vmem:[#allocation3 + $0x30] ss:$8 sps:$4 sm:$0xff]   ;;  %v7249_v14 = vld [vmem:[#allocation3 + $0x24] ss:$8 sps:$4 sm:$0xff]  }
 0x28c   :  { %v2327_v7 = vrot.slane %v2320_v18, %v8314_v31  ;;  %v2318_v26 = vcombine.low %v2310_v23, %v2317_v43  ;;  %v2319_v57 = vcombine.high %v2310_v23, %v2317_v43  ;;  %v7221_v36 = vld [vmem:[#allocation10 + $0x144] ss:$16 sps:$4 sm:$0xff]   ;;  %v1990_v6 = vrot.slane %v7250_v59, %v8314_v31  ;;  %v7219_v29 = vld [vmem:[#allocation10 + $0x140] ss:$16 sps:$4 sm:$0xff]   ;;  %v7222_v45 = vld [vmem:[#allocation10 + $0x148] ss:$16 sps:$4 sm:$0xff]  }
 0x28d   :  { %v7252_v30 = vld [vmem:[#allocation3 + $0x34] ss:$8 sps:$4 sm:$0x33]   ;;  %v1979_v42 = vrot.slane %v7249_v14, %v8314_v31  ;;  %v7233_v18 = vld [vmem:[#allocation10 + $0x184] ss:$16 sps:$4 sm:$0xff]  }
 0x28e   :  { %v2328_v12 = vcombine.high %v2327_v7, %v2327_v7  ;;  %3083 = vmatpush1.bf16.msra.mxu0 %v7169_v49  ;;  %3136 = vmatpush1.bf16.msra.mxu1 %v7172_v44  ;;  %v2339_v38 = vpack.c.bf16 %v2327_v7, %v2318_v26  ;;  %v1998_v19 = vcombine.high %v1990_v6, %v1990_v6  ;;  %v7225_v61 = vld [vmem:[#allocation10 + $0x160] ss:$16 sps:$4 sm:$0xff]   ;;  %v7228_v43 = vld [vmem:[#allocation10 + $0x168] ss:$16 sps:$4 sm:$0xff]   ;;  %v7268_v44 = vld [vmem:[#allocation3 + $0x10] ss:$8 sps:$4 sm:$0xff]  }
 0x28f   :  { %3084 = vmatprep.subr.bf16.mxu0 %v7185_v39  ;;  %3137 = vmatprep.subr.bf16.mxu1 %v7188_v50  ;;  %v1997_v49 = vrot.slane %v7252_v30, %v8314_v31  ;;  %v7236_v23 = vld [vmem:[#allocation10 + $0x18c] ss:$16 sps:$4 sm:$0xff]   ;;  %v1980_v39 = vcombine.high %v8659_v4, %v8659_v4  ;;  %v1981_v7 = vcombine.high %v1979_v42, %v1979_v42  ;;  %v7231_v62 = vld [vmem:[#allocation10 + $0x180] ss:$16 sps:$4 sm:$0xff]   ;;  %v7255_v14 = vld [vmem:[#allocation10 + $0x3a4] ss:$16 sps:$4 sm:$0xff]  }
 0x290   :  { %v2340_v22 = vpack.c.bf16 %v2328_v12, %v2319_v57  ;;  %v7265_v50 = vld [vmem:[#allocation3] ss:$8 sps:$4 sm:$0xcc]   ;;  %v7267_v57 = vld [vmem:[#allocation3 + $0x4] ss:$8 sps:$4 sm:$0xff]  }
 0x291   :  { %v2053_v26 = vcombine.low %v1998_v19, %v1997_v49  ;;  %v7271_v12 = vld [vmem:[#allocation3 + $0x20] ss:$8 sps:$4 sm:$0xcc]   ;;  %v2036_v37 = vcombine.low %v1981_v7, %v1990_v6  ;;  %v7253_v30 = vld [vmem:[#allocation10 + $0x3a0] ss:$16 sps:$4 sm:$0xff]  }
 0x292   :  { %6510 = vmatprep.mubr.msk.bf16.mxu0 %vm1580_vm4, %v2340_v22  ;;  %6512 = vmatprep.mubr.msk.bf16.mxu1 %vm1580_vm4, %v2340_v22  ;;  %v7234_v22 = vld [vmem:[#allocation10 + $0x188] ss:$16 sps:$4 sm:$0xff]   ;;  %v7258_v6 = vld [vmem:[#allocation10 + $0x3ac] ss:$16 sps:$4 sm:$0xff]  }
 0x293   :  { %2727 = vmatmul.mubr.bf16.gmra.mrb[24].mxu0 %v2339_v38  ;;  %2780 = vmatmul.mubr.bf16.gmra.mrb[32].mxu1 %v2339_v38  ;;  %v7270_v38 = vld [vmem:[#allocation3 + $0x14] ss:$8 sps:$4 sm:$0xff]   ;;  %v2060_v4 = vrot.slane %v2053_v26, %v8314_v31  ;;  %v7264_v19 = vld [vmem:[#allocation10 + $0x3cc] ss:$16 sps:$4 sm:$0xff]  }
 0x294   :  { %6569 = vmatprep.mubr.msk.bf16.mxu0 %vm1580_vm4, %v2071_v10  ;;  %6571 = vmatprep.mubr.msk.bf16.mxu1 %vm1580_vm4, %v2071_v10  ;;  %v7242_v10 = vld [vmem:[#allocation10 + $0x1ac] ss:$16 sps:$4 sm:$0xff]   ;;  %v7273_v26 = vld [vmem:[#allocation10 + $0x3e0] ss:$16 sps:$4 sm:$0xff]  }
 0x295   :  { %3085 = vmatpush1.bf16.msra.mxu0 %v7183_v8  ;;  %3138 = vmatpush1.bf16.msra.mxu1 %v7186_v16  ;;  %v3224_v8 = vrot.slane %v7268_v44, %v8314_v31  ;;  %v7239_v16 = vld [vmem:[#allocation10 + $0x1a4] ss:$16 sps:$4 sm:$0xff]   ;;  %v7259_v44 = vld [vmem:[#allocation10 + $0x3c0] ss:$16 sps:$4 sm:$0xff]   ;;  %v7278_v7 = vld [vmem:[#allocation10 + $0x3ec] ss:$16 sps:$4 sm:$0xff]  }
 0x296   :  { %3086 = vmatprep.subr.bf16.mxu0 %v7191_v34  ;;  %3139 = vmatprep.subr.bf16.mxu1 %v7194_v63  ;;  %v2035_v34 = vcombine.low %v1980_v39, %v1979_v42  ;;  %v3206_v63 = vrot.slane %v7265_v50, %v8314_v31  ;;  %v7261_v42 = vld [vmem:[#allocation10 + $0x3c4] ss:$16 sps:$4 sm:$0xff]  }
 0x297   :  { %v7275_v50 = vld [vmem:[#allocation10 + $0x3e4] ss:$16 sps:$4 sm:$0xff]  }
 0x299   :  { %3087 = vmatpush1.bf16.msra.mxu0 %v7189_v48  ;;  %3140 = vmatpush1.bf16.msra.mxu1 %v7192_v5  ;;  %v3213_v48 = vrot.slane %v7267_v57, %v8314_v31  ;;  %v3242_v5 = vrot.slane %v7271_v12, %v8314_v31  ;;  %v7276_v57 = vld [vmem:[#allocation10 + $0x3e8] ss:$16 sps:$4 sm:$0xff]   ;;  %v7281_v12 = vld [vmem:[#allocation10 + $0x404] ss:$16 sps:$4 sm:$0xff]  }
 0x29a   :  { %3088 = vmatprep.subr.bf16.mxu0 %v7197_v11  ;;  %3141 = vmatprep.subr.bf16.mxu1 %v7200_v1  ;;  %v7237_v11 = vld [vmem:[#allocation10 + $0x1a0] ss:$16 sps:$4 sm:$0xff]   ;;  %v7240_v1 = vld [vmem:[#allocation10 + $0x1a8] ss:$16 sps:$4 sm:$0xff]  }
 0x29d   :  { %3089 = vmatpush1.bf16.msra.mxu0 %v7195_v40  ;;  %3142 = vmatpush1.bf16.msra.mxu1 %v7198_v9  ;;  %v2050_v40 = vrot.slane %v2036_v37, %v8314_v31  ;;  %v3231_v9 = vrot.slane %v7270_v38, %v8314_v31  ;;  %v7282_v37 = vld [vmem:[#allocation10 + $0x408] ss:$16 sps:$4 sm:$0xff]   ;;  %v7287_v38 = vld [vmem:[#allocation10 + $0x424] ss:$16 sps:$4 sm:$0xff]  }
 0x29e   :  { %3090 = vmatprep.subr.bf16.mxu0 %v7203_v20  ;;  %3143 = vmatprep.subr.bf16.mxu1 %v7206_v58  ;;  %v3232_v20 = vcombine.high %v3224_v8, %v3224_v8  ;;  %v2033_v58 = vcombine.low %v8688_v25, %v8677_v47  ;;  %v7243_v47 = vld [vmem:[#allocation10 + $0x380] ss:$16 sps:$4 sm:$0xff]   ;;  %v7246_v25 = vld [vmem:[#allocation10 + $0x388] ss:$16 sps:$4 sm:$0xff]  }
 0x2a1   :  { %3091 = vmatpush1.bf16.msra.mxu0 %v7201_v55  ;;  %3144 = vmatpush1.bf16.msra.mxu1 %v7204_v54  ;;  %v7245_v55 = vld [vmem:[#allocation10 + $0x384] ss:$16 sps:$4 sm:$0xff]   ;;  %v7248_v54 = vld [vmem:[#allocation10 + $0x38c] ss:$16 sps:$4 sm:$0xff]  }
 0x2a2   :  { %3092 = vmatprep.subr.bf16.mxu0 %v7209_v33  ;;  %3145 = vmatprep.subr.bf16.mxu1 %v7212_v2  ;;  %v2043_v33 = vrot.slane %v2035_v34, %v8314_v31  ;;  %v2061_v2 = vcombine.high %v2060_v4, %v2060_v4  ;;  %v7293_v34 = vld [vmem:[#allocation10 + $0x444] ss:$16 sps:$4 sm:$0xff]  }
 0x2a4   :  { %v2052_v59 = vcombine.high %v2043_v33, %v2050_v40 }
 0x2a5   :  { %3093 = vmatpush1.bf16.msra.mxu0 %v7207_v13  ;;  %3146 = vmatpush1.bf16.msra.mxu1 %v7210_v41  ;;  %v3214_v13 = vcombine.high %v3206_v63, %v3206_v63  ;;  %v3215_v41 = vcombine.high %v3213_v48, %v3213_v48  ;;  %v7291_v63 = vld [vmem:[#allocation10 + $0x440] ss:$16 sps:$4 sm:$0xff]  }
 0x2a6   :  { %3094 = vmatprep.subr.bf16.mxu0 %v7215_v32  ;;  %3147 = vmatprep.subr.bf16.mxu1 %v7218_v35  ;;  %v6573_v32 = vcombine.high %v3231_v9, %v3242_v5  ;;  %v2015_v35 = vcombine.low %v8682_v24, %v8685_v51  ;;  %v7299_v5 = vld [vmem:[#allocation10 + $0x464] ss:$16 sps:$4 sm:$0xff]  }
 0x2a9   :  { %3095 = vmatpush1.bf16.msra.mxu0 %v7213_v3  ;;  %3148 = vmatpush1.bf16.msra.mxu1 %v7216_v28  ;;  %v3271_v3 = vcombine.low %v3215_v41, %v3224_v8  ;;  %v3288_v28 = vcombine.low %v3232_v20, %v3231_v9  ;;  %v7290_v8 = vld [vmem:[#allocation10 + $0x42c] ss:$16 sps:$4 sm:$0xff]   ;;  %v7305_v9 = vld [vmem:[#allocation10 + $0x484] ss:$16 sps:$4 sm:$0xff]   ;;  %v7309_v41 = vld [vmem:[#allocation10 + $0x4a0] ss:$16 sps:$4 sm:$0xff]  }
 0x2aa   :  { %3096 = vmatprep.subr.bf16.mxu0 %v7221_v36  ;;  %3149 = vmatprep.subr.bf16.mxu1 %v7224_v53  ;;  %v2070_v36 = vpack.c.bf16 %v2033_v58, %v2015_v35  ;;  %v2073_v53 = vpack.c.bf16 %v2061_v2, %v2052_v59  ;;  %v7308_v20 = vld [vmem:[#allocation10 + $0x48c] ss:$16 sps:$4 sm:$0xff]   ;;  %v7303_v58 = vld [vmem:[#allocation10 + $0x480] ss:$16 sps:$4 sm:$0xff]   ;;  %v7317_v59 = vld [vmem:[#allocation10 + $0x4c4] ss:$16 sps:$4 sm:$0xff]  }
 0x2ab   :  { %v8721_v24 = vrot.slane %v3271_v3, %v8314_v31  ;;  %v8724_v51 = vrot.slane %v3288_v28, %v8314_v31  ;;  %v7340_v2 = vld [vmem:[#allocation3 + $0x30] ss:$8 sps:$4 sm:$0xff]   ;;  %v7339_v35 = vld [vmem:[#allocation3 + $0x24] ss:$8 sps:$4 sm:$0xff]  }
 0x2ac   :  { %v7320_v3 = vld [vmem:[#allocation10 + $0x4cc] ss:$16 sps:$4 sm:$0xff]   ;;  %v3260_v28 = vrot.slane %v7340_v2, %v8314_v31  ;;  %v7358_v2 = vld [vmem:[#allocation13 + $0x40] sm:$0xff]  }
 0x2ad   :  { %3097 = vmatpush1.bf16.msra.mxu0 %v7219_v29  ;;  %3150 = vmatpush1.bf16.msra.mxu1 %v7222_v45  ;;  %v3270_v29 = vcombine.low %v3214_v13, %v3213_v48  ;;  %v8716_v45 = vrot.slane %v6573_v32, %v8314_v31  ;;  %v7294_v48 = vld [vmem:[#allocation10 + $0x448] ss:$16 sps:$4 sm:$0xff]  }
 0x2ae   :  { %3098 = vmatprep.subr.bf16.mxu0 %v7227_v15  ;;  %3151 = vmatprep.subr.bf16.mxu1 %v7230_v21  ;;  %v7256_v15 = vld [vmem:[#allocation10 + $0x3a8] ss:$16 sps:$4 sm:$0xff]   ;;  %v2051_v21 = vcombine.low %v2043_v33, %v2050_v40  ;;  %v7314_v33 = vld [vmem:[#allocation10 + $0x4ac] ss:$16 sps:$4 sm:$0xff]  }
 0x2af   :  { %v7300_v40 = vld [vmem:[#allocation10 + $0x468] ss:$16 sps:$4 sm:$0xff]  }
 0x2b0   :  { %v2072_v49 = vpack.c.bf16 %v2060_v4, %v2051_v21  ;;  %v7296_v4 = vld [vmem:[#allocation10 + $0x44c] ss:$16 sps:$4 sm:$0xff]   ;;  %v7342_v13 = vld [vmem:[#allocation3 + $0x34] ss:$8 sps:$4 sm:$0xff]  }
 0x2b1   :  { %3099 = vmatpush1.bf16.msra.mxu0 %v7225_v61  ;;  %3152 = vmatpush1.bf16.msra.mxu1 %v7228_v43  ;;  %v8727_v61 = vrot.slane %v3270_v29, %v8314_v31  ;;  %v3305_v43 = vcombine.high %v8724_v51, %v8716_v45  ;;  %v7312_v32 = vld [vmem:[#allocation10 + $0x4a8] ss:$16 sps:$4 sm:$0xff]   ;;  %v3268_v29 = vcombine.high %v3260_v28, %v3260_v28 }
 0x2b2   :  { %3100 = vmatprep.subr.bf16.mxu0 %v7233_v18  ;;  %3153 = vmatprep.subr.bf16.mxu1 %v7236_v23  ;;  %v7262_v23 = vld [vmem:[#allocation10 + $0x3c8] ss:$16 sps:$4 sm:$0xff]  }
 0x2b3   :  { %v3287_v18 = vcombine.high %v8727_v61, %v8721_v24  ;;  %v7324_v21 = vld [vmem:[#allocation10 + $0x4e8] ss:$16 sps:$4 sm:$0xff]  }
 0x2b5   :  { %3101 = vmatpush1.bf16.msra.mxu0 %v7231_v62  ;;  %3154 = vmatpush1.bf16.msra.mxu1 %v7234_v22  ;;  %v3342_v39 = vpack.c.bf16 %v3305_v43, %v3287_v18  ;;  %v7284_v62 = vld [vmem:[#allocation10 + $0x40c] ss:$16 sps:$4 sm:$0xff]   ;;  %v7279_v22 = vld [vmem:[#allocation10 + $0x400] ss:$16 sps:$4 sm:$0xff]   ;;  %v3307_v18 = vcombine.low %v3260_v28, %v3268_v29  ;;  %v7365_v28 = vld [vmem:[#allocation13 + $0xc0] sm:$0xff]  }
 0x2b6   :  { %3102 = vmatprep.subr.bf16.mxu0 %v7239_v16  ;;  %3155 = vmatprep.subr.bf16.mxu1 %v7242_v10  ;;  %v7285_v16 = vld [vmem:[#allocation10 + $0x420] ss:$16 sps:$4 sm:$0xff]   ;;  %v7288_v10 = vld [vmem:[#allocation10 + $0x428] ss:$16 sps:$4 sm:$0xff]   ;;  %v7332_v43 = vld [vmem:[#allocation10 + $0x50c] ss:$16 sps:$4 sm:$0xff]  }
 0x2b9   :  { %3103 = vmatpush1.bf16.msra.mxu0 %v7237_v11  ;;  %3156 = vmatpush1.bf16.msra.mxu1 %v7240_v1  ;;  %v7302_v11 = vld [vmem:[#allocation10 + $0x46c] ss:$16 sps:$4 sm:$0xff]   ;;  %v7297_v1 = vld [vmem:[#allocation10 + $0x460] ss:$16 sps:$4 sm:$0xff]  }
 0x2ba   :  { %3688 = vmatprep.subr.bf16.mxu0 %v7245_v55  ;;  %3741 = vmatprep.subr.bf16.mxu1 %v7248_v54  ;;  %v7306_v55 = vld [vmem:[#allocation10 + $0x488] ss:$16 sps:$4 sm:$0xff]   ;;  %v7311_v54 = vld [vmem:[#allocation10 + $0x4a4] ss:$16 sps:$4 sm:$0xff]  }
 0x2bc   :  { %3109 = vmatmul.mubr.bf16.vlgmr.msra.gmra.mrb[20].mxu0 %v2070_v36  ;;  %3162 = vmatmul.mubr.bf16.vlgmr.msra.gmra.mrb[28].mxu1 %v2070_v36  ;;  %v3267_v36 = vrot.slane %v7342_v13, %v8314_v31  ;;  %v7359_v13 = vld [vmem:[#allocation13 + $0xa8] sm:$0xff]  }
 0x2bd   :  { %6570 = vmatprep.mubr.msk.bf16.mxu0 %vm1580_vm4, %v2073_v53  ;;  %6572 = vmatprep.mubr.msk.bf16.mxu1 %vm1580_vm4, %v2073_v53  ;;  %v3249_v53 = vrot.slane %v7339_v35, %v8314_v31  ;;  %v7362_v35 = vld [vmem:[#allocation13 + $0x50] sm:$0xff]  }
 0x2be   :  { %3689 = vmatpush1.bf16.msra.mxu0 %v7243_v47  ;;  %3742 = vmatpush1.bf16.msra.mxu1 %v7246_v25  ;;  %v7315_v47 = vld [vmem:[#allocation10 + $0x4c0] ss:$16 sps:$4 sm:$0xff]   ;;  %v7318_v25 = vld [vmem:[#allocation10 + $0x4c8] ss:$16 sps:$4 sm:$0xff]  }
 0x2bf   :  { %3690 = vmatprep.subr.bf16.mxu0 %v7255_v14  ;;  %3743 = vmatprep.subr.bf16.mxu1 %v7258_v6  ;;  %v7323_v14 = vld [vmem:[#allocation10 + $0x4e4] ss:$16 sps:$4 sm:$0xff]   ;;  %v7326_v6 = vld [vmem:[#allocation10 + $0x4ec] ss:$16 sps:$4 sm:$0xff]  }
 0x2c2   :  { %3691 = vmatpush1.bf16.msra.mxu0 %v7253_v30  ;;  %3744 = vmatpush1.bf16.msra.mxu1 %v7256_v15  ;;  %v3269_v30 = vcombine.high %v3267_v36, %v3267_v36  ;;  %v7321_v15 = vld [vmem:[#allocation10 + $0x4e0] ss:$16 sps:$4 sm:$0xff]  }
 0x2c3   :  { %3692 = vmatprep.subr.bf16.mxu0 %v7261_v42  ;;  %3745 = vmatprep.subr.bf16.mxu1 %v7264_v19  ;;  %v3251_v42 = vcombine.high %v3249_v53, %v3249_v53  ;;  %v7329_v19 = vld [vmem:[#allocation10 + $0x504] ss:$16 sps:$4 sm:$0xff]  }
 0x2c4   :  { %3119 = vmatmul.mubr.bf16.gmra.mrb[24].mxu0 %v2072_v49  ;;  %3172 = vmatmul.mubr.bf16.gmra.mrb[32].mxu1 %v2072_v49  ;;  %v3324_v49 = vcombine.low %v3267_v36, %v3269_v30  ;;  %v7366_v36 = vld [vmem:[#allocation13 + $0x60] sm:$0xff]  }
 0x2c5   :  { %6630 = vmatprep.mubr.msk.bf16.mxu0 %vm1580_vm4, %v3342_v39  ;;  %6632 = vmatprep.mubr.msk.bf16.mxu1 %vm1580_vm4, %v3342_v39  ;;  %v3306_v39 = vcombine.low %v3249_v53, %v3251_v42  ;;  %v7369_v53 = vld [vmem:[#allocation13 + $0xd0] sm:$0xff]  }
 0x2c6   :  { %3693 = vmatpush1.bf16.msra.mxu0 %v7259_v44  ;;  %3746 = vmatpush1.bf16.msra.mxu1 %v7262_v23  ;;  %v7327_v44 = vld [vmem:[#allocation10 + $0x500] ss:$16 sps:$4 sm:$0xff]   ;;  %v7330_v23 = vld [vmem:[#allocation10 + $0x508] ss:$16 sps:$4 sm:$0xff]  }
 0x2c7   :  { %3694 = vmatprep.subr.bf16.mxu0 %v7275_v50  ;;  %3747 = vmatprep.subr.bf16.mxu1 %v7278_v7  ;;  %v7335_v50 = vld [vmem:[#allocation10 + $0x524] ss:$16 sps:$4 sm:$0xff]   ;;  %v7338_v7 = vld [vmem:[#allocation10 + $0x52c] ss:$16 sps:$4 sm:$0xff]  }
 0x2ca   :  { %3695 = vmatpush1.bf16.msra.mxu0 %v7273_v26  ;;  %3748 = vmatpush1.bf16.msra.mxu1 %v7276_v57  ;;  %v3321_v26 = vrot.slane %v3307_v18, %v8314_v31  ;;  %v3331_v57 = vrot.slane %v3324_v49, %v8314_v31 }
 0x2cb   :  { %3696 = vmatprep.subr.bf16.mxu0 %v7281_v12  ;;  %3749 = vmatprep.subr.bf16.mxu1 %v7284_v62  ;;  %v7333_v12 = vld [vmem:[#allocation10 + $0x520] ss:$16 sps:$4 sm:$0xff]   ;;  %v7336_v62 = vld [vmem:[#allocation10 + $0x528] ss:$16 sps:$4 sm:$0xff]  }
 0x2ce   :  { %3697 = vmatpush1.bf16.msra.mxu0 %v7279_v22  ;;  %3750 = vmatpush1.bf16.msra.mxu1 %v7282_v37  ;;  %v3314_v22 = vrot.slane %v3306_v39, %v8314_v31  ;;  %v3304_v37 = vcombine.low %v8724_v51, %v8716_v45  ;;  %v7344_v51 = vld [vmem:[#allocation13 + $0x8] sm:$0xff]  }
 0x2cf   :  { %3698 = vmatprep.subr.bf16.mxu0 %v7287_v38  ;;  %3751 = vmatprep.subr.bf16.mxu1 %v7290_v8  ;;  %v3332_v8 = vcombine.high %v3331_v57, %v3331_v57 }
 0x2d0   :  { %v3323_v38 = vcombine.high %v3314_v22, %v3321_v26  ;;  %v3322_v45 = vcombine.low %v3314_v22, %v3321_v26 }
 0x2d2   :  { %3699 = vmatpush1.bf16.msra.mxu0 %v7285_v16  ;;  %3752 = vmatpush1.bf16.msra.mxu1 %v7288_v10  ;;  %v3286_v16 = vcombine.low %v8727_v61, %v8721_v24  ;;  %v7347_v24 = vld [vmem:[#allocation13 + $0x78] sm:$0xff]   ;;  %v3343_v61 = vpack.c.bf16 %v3331_v57, %v3322_v45 }
 0x2d3   :  { %3700 = vmatprep.subr.bf16.mxu0 %v7293_v34  ;;  %3753 = vmatprep.subr.bf16.mxu1 %v7296_v4  ;;  %v7343_v34 = vld [vmem:[#allocation13] sm:$0xff]   ;;  %v7345_v4 = vld [vmem:[#allocation13 + $0x70] sm:$0xff]  }
 0x2d4   :  { %v3341_v10 = vpack.c.bf16 %v3304_v37, %v3286_v16 }
 0x2d6   :  { %3701 = vmatpush1.bf16.msra.mxu0 %v7291_v63  ;;  %3754 = vmatpush1.bf16.msra.mxu1 %v7294_v48  ;;  %v3344_v63 = vpack.c.bf16 %v3332_v8, %v3323_v38  ;;  %v7346_v48 = vld [vmem:[#allocation13 + $0x10] sm:$0xff]  }
 0x2d7   :  { %3702 = vmatprep.subr.bf16.mxu0 %v7299_v5  ;;  %3755 = vmatprep.subr.bf16.mxu1 %v7302_v11  ;;  %v7349_v5 = vld [vmem:[#allocation13 + $0x80] sm:$0xff]   ;;  %v7348_v11 = vld [vmem:[#allocation13 + $0x18] sm:$0xff]  }
 0x2da   :  { %3703 = vmatpush1.bf16.msra.mxu0 %v7297_v1  ;;  %3756 = vmatpush1.bf16.msra.mxu1 %v7300_v40  ;;  %v7351_v1 = vld [vmem:[#allocation13 + $0x88] sm:$0xff]   ;;  %v7350_v40 = vld [vmem:[#allocation13 + $0x20] sm:$0xff]  }
 0x2db   :  { %3704 = vmatprep.subr.bf16.mxu0 %v7305_v9  ;;  %3757 = vmatprep.subr.bf16.mxu1 %v7308_v20  ;;  %v7353_v9 = vld [vmem:[#allocation13 + $0x90] sm:$0xff]   ;;  %v7352_v20 = vld [vmem:[#allocation13 + $0x28] sm:$0xff]  }
 0x2de   :  { %3705 = vmatpush1.bf16.msra.mxu0 %v7303_v58  ;;  %3758 = vmatpush1.bf16.msra.mxu1 %v7306_v55  ;;  %v7354_v58 = vld [vmem:[#allocation13 + $0x30] sm:$0xff]   ;;  %v7355_v55 = vld [vmem:[#allocation13 + $0x98] sm:$0xff]  }
 0x2df   :  { %3706 = vmatprep.subr.bf16.mxu0 %v7311_v54  ;;  %3759 = vmatprep.subr.bf16.mxu1 %v7314_v33  ;;  %v7356_v54 = vld [vmem:[#allocation13 + $0x38] sm:$0xff]   ;;  %v7357_v33 = vld [vmem:[#allocation13 + $0xa0] sm:$0xff]  }
 0x2e2   :  { %3707 = vmatpush1.bf16.msra.mxu0 %v7309_v41  ;;  %3760 = vmatpush1.bf16.msra.mxu1 %v7312_v32  ;;  %v7360_v41 = vld [vmem:[#allocation13 + $0x48] sm:$0xff]   ;;  %v7361_v32 = vld [vmem:[#allocation13 + $0xb0] sm:$0xff]  }
 0x2e3   :  { %3708 = vmatprep.subr.bf16.mxu0 %v7317_v59  ;;  %3761 = vmatprep.subr.bf16.mxu1 %v7320_v3  ;;  %v7363_v59 = vld [vmem:[#allocation13 + $0xb8] sm:$0xff]  }
 0x2e4   :  { %v7364_v3 = vld [vmem:[#allocation13 + $0x58] sm:$0xff]  }
 0x2e6   :  { %3709 = vmatpush1.bf16.msra.mxu0 %v7315_v47  ;;  %3762 = vmatpush1.bf16.msra.mxu1 %v7318_v25  ;;  %v7367_v47 = vld [vmem:[#allocation13 + $0xc8] sm:$0xff]  }
 0x2e7   :  { %3710 = vmatprep.subr.bf16.mxu0 %v7323_v14  ;;  %3763 = vmatprep.subr.bf16.mxu1 %v7326_v6  ;;  %v7368_v25 = vld [vmem:[#allocation13 + $0x68] sm:$0xff]   ;;  %v7371_v14 = vld [vmem:[#allocation13 + $0xd8] sm:$0xff]  }
 0x2e8   :  { %v3810_v6 = vld [vmem:[#allocation12] sm:$0xf] }
 0x2e9   :  { %v8778_v29 = vrot.slane %v3810_v6, %v8276_v56  ;;  %v8781_v30 = vrot.slane %v3810_v6, %v8295_v17 }
 0x2ea   :  { %3711 = vmatpush1.bf16.msra.mxu0 %v7321_v15  ;;  %3764 = vmatpush1.bf16.msra.mxu1 %v7324_v21  ;;  %v8784_v15 = vrot.slane %v3810_v6, %v8282_v60  ;;  %v8787_v21 = vrot.slane %v3810_v6, %v8306_v27 }
 0x2eb   :  { %3712 = vmatprep.subr.bf16.mxu0 %v7329_v19  ;;  %3765 = vmatprep.subr.bf16.mxu1 %v7332_v43 }
 0x2ee   :  { %3713 = vmatpush1.bf16.msra.mxu0 %v7327_v44  ;;  %3766 = vmatpush1.bf16.msra.mxu1 %v7330_v23 }
 0x2ef   :  { %3714 = vmatprep.subr.bf16.mxu0 %v7335_v50  ;;  %3767 = vmatprep.subr.bf16.mxu1 %v7338_v7 }
 0x2f2   :  { %3715 = vmatpush1.bf16.msra.mxu0 %v7333_v12  ;;  %3768 = vmatpush1.bf16.msra.mxu1 %v7336_v62 }
 0x2f3   :  { %4469 = vmatprep.subr.bf16.mxu1 %v7940_v0  ;;  %4327 = vmatprep.subr.bf16.mxu0 %v7940_v0 }
 0x2f5   :  { %3721 = vmatmul.mubr.bf16.vlgmr.msra.gmra.mrb[20].mxu0 %v3341_v10  ;;  %3774 = vmatmul.mubr.bf16.vlgmr.msra.gmra.mrb[28].mxu1 %v3341_v10 }
 0x2f6   :  { %6631 = vmatprep.mubr.msk.bf16.mxu0 %vm1580_vm4, %v3344_v63  ;;  %6633 = vmatprep.mubr.msk.bf16.mxu1 %vm1580_vm4, %v3344_v63 }
 0x2f7   :  { %4470 = vmatpush1.bf16.msra.mxu1 %v7343_v34  ;;  %4328 = vmatpush1.bf16.msra.mxu0 %v7345_v4 }
 0x2f8   :  { %4471 = vmatprep.subr.bf16.mxu1 %v7940_v0  ;;  %4329 = vmatprep.subr.bf16.mxu0 %v7940_v0 }
 0x2fb   :  { %4472 = vmatpush1.bf16.msra.mxu1 %v7344_v51  ;;  %4330 = vmatpush1.bf16.msra.mxu0 %v7347_v24 }
 0x2fc   :  { %4473 = vmatprep.subr.bf16.mxu1 %v7940_v0  ;;  %4331 = vmatprep.subr.bf16.mxu0 %v7940_v0 }
 0x2fd   :  { %3731 = vmatmul.mubr.bf16.gmra.mrb[24].mxu0 %v3343_v61  ;;  %3784 = vmatmul.mubr.bf16.gmra.mrb[32].mxu1 %v3343_v61 }
 0x2ff   :  { %4474 = vmatpush1.bf16.msra.mxu1 %v7346_v48  ;;  %4332 = vmatpush1.bf16.msra.mxu0 %v7349_v5 }
 0x300   :  { %4475 = vmatprep.subr.bf16.mxu1 %v7940_v0  ;;  %4333 = vmatprep.subr.bf16.mxu0 %v7940_v0 }
 0x303   :  { %4476 = vmatpush1.bf16.msra.mxu1 %v7348_v11  ;;  %4334 = vmatpush1.bf16.msra.mxu0 %v7351_v1 }
 0x304   :  { %4477 = vmatprep.subr.bf16.mxu1 %v7940_v0  ;;  %4335 = vmatprep.subr.bf16.mxu0 %v7940_v0 }
 0x307   :  { %4478 = vmatpush1.bf16.msra.mxu1 %v7350_v40  ;;  %4336 = vmatpush1.bf16.msra.mxu0 %v7353_v9 }
 0x308   :  { %4479 = vmatprep.subr.bf16.mxu1 %v7940_v0  ;;  %4337 = vmatprep.subr.bf16.mxu0 %v7940_v0 }
 0x30b   :  { %4480 = vmatpush1.bf16.msra.mxu1 %v7352_v20  ;;  %4338 = vmatpush1.bf16.msra.mxu0 %v7355_v55 }
 0x30c   :  { %4481 = vmatprep.subr.bf16.mxu1 %v7940_v0  ;;  %4339 = vmatprep.subr.bf16.mxu0 %v7940_v0 }
 0x30f   :  { %4482 = vmatpush1.bf16.msra.mxu1 %v7354_v58  ;;  %4340 = vmatpush1.bf16.msra.mxu0 %v7357_v33 }
 0x310   :  { %4483 = vmatprep.subr.bf16.mxu1 %v7940_v0  ;;  %4341 = vmatprep.subr.bf16.mxu0 %v7940_v0 }
 0x313   :  { %4484 = vmatpush1.bf16.msra.mxu1 %v7356_v54  ;;  %4342 = vmatpush1.bf16.msra.mxu0 %v7359_v13 }
 0x314   :  { %4485 = vmatprep.subr.bf16.mxu1 %v7940_v0  ;;  %4343 = vmatprep.subr.bf16.mxu0 %v7940_v0 }
 0x317   :  { %4486 = vmatpush1.bf16.msra.mxu1 %v7358_v2  ;;  %4344 = vmatpush1.bf16.msra.mxu0 %v7361_v32 }
 0x318   :  { %4487 = vmatprep.subr.bf16.mxu1 %v7940_v0  ;;  %4345 = vmatprep.subr.bf16.mxu0 %v7940_v0 }
 0x31b   :  { %4488 = vmatpush1.bf16.msra.mxu1 %v7360_v41  ;;  %4346 = vmatpush1.bf16.msra.mxu0 %v7363_v59 }
 0x31c   :  { %4489 = vmatprep.subr.bf16.mxu1 %v7940_v0  ;;  %4347 = vmatprep.subr.bf16.mxu0 %v7940_v0 }
 0x31f   :  { %4490 = vmatpush1.bf16.msra.mxu1 %v7362_v35  ;;  %4348 = vmatpush1.bf16.msra.mxu0 %v7365_v28 }
 0x320   :  { %4491 = vmatprep.subr.bf16.mxu1 %v7940_v0  ;;  %4349 = vmatprep.subr.bf16.mxu0 %v7940_v0 }
 0x323   :  { %4492 = vmatpush1.bf16.msra.mxu1 %v7364_v3  ;;  %4350 = vmatpush1.bf16.msra.mxu0 %v7367_v47 }
 0x324   :  { %4493 = vmatprep.subr.bf16.mxu1 %v7940_v0  ;;  %4351 = vmatprep.subr.bf16.mxu0 %v7940_v0 }
 0x327   :  { %4494 = vmatpush1.bf16.msra.mxu1 %v7366_v36  ;;  %4352 = vmatpush1.bf16.msra.mxu0 %v7369_v53 }
 0x328   :  { %4495 = vmatprep.subr.bf16.mxu1 %v7940_v0  ;;  %4353 = vmatprep.subr.bf16.mxu0 %v7940_v0 }
 0x32b   :  { %4496 = vmatpush1.bf16.msra.mxu1 %v7368_v25  ;;  %4354 = vmatpush1.bf16.msra.mxu0 %v7371_v14 }
 0x32c   :  { %4864 = vmatprep.subr.bf16.mxu1 %v7940_v0  ;;  %4666 = vmatprep.subr.bf16.mxu0 %v7940_v0 }
 0x3c8   :  { %v3722_v42 = vpop.f32.mrb[20].mxu0  ;;  %v3775_v19 = vpop.f32.mrb[28].mxu1 }
 0x3c9   :  { %v3832_v43 = vadd.f32 %v8778_v29, %v3722_v42  ;;  %v3834_v18 = vadd.f32 %v8781_v30, %v3775_v19  ;;  %v3724_v49 = vpop.f32.mrb[21].mxu0  ;;  %v3777_v44 = vpop.f32.mrb[29].mxu1 }
 0x3ca   :  { %v3833_v23 = vadd.f32 %v8784_v15, %v3724_v49  ;;  %v3835_v39 = vadd.f32 %v8787_v21, %v3777_v44  ;;  %v3726_v50 = vpop.f32.mrb[22].mxu0  ;;  %v3779_v7 = vpop.f32.mrb[30].mxu1 }
 0x3cb   :  { %v3836_v26 = vadd.f32 %v8778_v29, %v3726_v50  ;;  %v3838_v57 = vadd.f32 %v8781_v30, %v3779_v7  ;;  %v3728_v12 = vpop.f32.mrb[23].mxu0  ;;  %v3781_v62 = vpop.f32.mrb[31].mxu1 }
 0x3cc   :  { %v3864_v22 = vcombine.low %v3832_v43, %v3833_v23  ;;  %v3865_v37 = vcombine.high %v3832_v43, %v3833_v23  ;;  %v3866_v38 = vcombine.low %v3834_v18, %v3835_v39  ;;  %v3867_v8 = vcombine.high %v3834_v18, %v3835_v39 }
 0x3cd   :  { %v3837_v16 = vadd.f32 %v8784_v15, %v3728_v12  ;;  %v3839_v10 = vadd.f32 %v8787_v21, %v3781_v62 }
 0x3ce   :  { %v3874_v34 = vrot.slane %v3864_v22, %v8314_v31  ;;  %v3881_v4 = vrot.slane %v3865_v37, %v8314_v31  ;;  %v3888_v63 = vrot.slane %v3866_v38, %v8314_v31  ;;  %v3895_v45 = vrot.slane %v3867_v8, %v8314_v31 }
 0x3cf   :  { %v3900_v51 = vcombine.low %v3836_v26, %v3837_v16  ;;  %v3901_v24 = vcombine.high %v3836_v26, %v3837_v16  ;;  %v3902_v61 = vcombine.low %v3838_v57, %v3839_v10  ;;  %v3903_v48 = vcombine.high %v3838_v57, %v3839_v10 }
 0x3d0   :  { %v3896_v5 = vcombine.low %v3874_v34, %v3888_v63  ;;  %v3897_v11 = vcombine.high %v3874_v34, %v3888_v63  ;;  %v3898_v1 = vcombine.low %v3881_v4, %v3895_v45  ;;  %v3899_v40 = vcombine.high %v3881_v4, %v3895_v45  ;;  %v3732_v9 = vpop.f32.mrb[24].mxu0  ;;  %v3785_v20 = vpop.f32.mrb[32].mxu1 }
 0x3d1   :  { %v3910_v58 = vrot.slane %v3900_v51, %v8314_v31  ;;  %v3917_v55 = vrot.slane %v3901_v24, %v8314_v31  ;;  %v3924_v54 = vrot.slane %v3902_v61, %v8314_v31  ;;  %v3931_v33 = vrot.slane %v3903_v48, %v8314_v31  ;;  %v8805_v2 = vpop.f32.mrb[25].mxu0  ;;  %v8807_v13 = vpop.f32.mrb[33].mxu1 }
 0x3d2   :  { %v6634_v41 = vrot.slane %v3896_v5, 9  ;;  %v6635_v32 = vrot.slane %v3897_v11, 9  ;;  %v6636_v35 = vrot.slane %v3898_v1, 9  ;;  %v6637_v59 = vrot.slane %v3899_v40, 9  ;;  %v3736_v3 = vpop.f32.mrb[26].mxu0  ;;  %v3789_v28 = vpop.f32.mrb[34].mxu1 }
 0x3d3   :  { %v3932_v36 = vcombine.low %v3910_v58, %v3924_v54  ;;  %v3933_v47 = vcombine.high %v3910_v58, %v3924_v54  ;;  %v3934_v25 = vcombine.low %v3917_v55, %v3931_v33  ;;  %v3935_v53 = vcombine.high %v3917_v55, %v3931_v33  ;;  %v8809_v14 = vpop.f32.mrb[27].mxu0  ;;  %v8811_v6 = vpop.f32.mrb[35].mxu1 }
 0x3d4   :  { %v4046_v42 = vmax.f32 %v3896_v5, %v6634_v41  ;;  %v4047_v19 = vmax.f32 %v3897_v11, %v6635_v32  ;;  %v4048_v43 = vmax.f32 %v3898_v1, %v6636_v35  ;;  %v4049_v18 = vmax.f32 %v3899_v40, %v6637_v59 }
 0x3d5   :  { %v6638_v49 = vrot.slane %v3932_v36, 9  ;;  %v6639_v44 = vrot.slane %v3933_v47, 9  ;;  %v6640_v23 = vrot.slane %v3934_v25, 9  ;;  %v6641_v39 = vrot.slane %v3935_v53, 9 }
 0x3d6   :  { %v4074_v50 = vrot.slane %v4046_v42, 4  ;;  %v4075_v7 = vrot.slane %v4047_v19, 4  ;;  %v4076_v26 = vrot.slane %v4048_v43, 4  ;;  %v4077_v57 = vrot.slane %v4049_v18, 4 }
 0x3d7   :  { %v4050_v12 = vmax.f32 %v3932_v36, %v6638_v49  ;;  %v4051_v62 = vmax.f32 %v3933_v47, %v6639_v44  ;;  %v4052_v22 = vmax.f32 %v3934_v25, %v6640_v23  ;;  %v4053_v37 = vmax.f32 %v3935_v53, %v6641_v39 }
 0x3d8   :  { %v4102_v38 = vmax.f32 %v4046_v42, %v4074_v50  ;;  %v4103_v8 = vmax.f32 %v4047_v19, %v4075_v7  ;;  %v4104_v16 = vmax.f32 %v4048_v43, %v4076_v26  ;;  %v4105_v10 = vmax.f32 %v4049_v18, %v4077_v57 }
 0x3d9   :  { %v4078_v34 = vrot.slane %v4050_v12, 4  ;;  %v4079_v4 = vrot.slane %v4051_v62, 4  ;;  %v4080_v63 = vrot.slane %v4052_v22, 4  ;;  %v4081_v45 = vrot.slane %v4053_v37, 4 }
 0x3da   :  { %v4121_v51 = vrot.slane %v4102_v38, %v8276_v56  ;;  %v4125_v24 = vrot.slane %v4102_v38, %v8295_v17  ;;  %v4175_v61 = vrot.slane %v4103_v8, %v8276_v56  ;;  %v8817_v48 = vrot.slane %v4103_v8, %v8295_v17 }
 0x3db   :  { %v8820_v5 = vrot.slane %v4104_v16, %v8276_v56  ;;  %v8823_v11 = vrot.slane %v4104_v16, %v8295_v17  ;;  %v8826_v1 = vrot.slane %v4105_v10, %v8276_v56  ;;  %v8829_v40 = vrot.slane %v4105_v10, %v8295_v17 }
 0x3dc   :  { %v4138_v58 = vpack.c.bf16 %v4121_v51, %v4121_v51  ;;  %v4192_v55 = vpack.c.bf16 %v4175_v61, %v4175_v61  ;;  %v4106_v54 = vmax.f32 %v4050_v12, %v4078_v34  ;;  %v4107_v33 = vmax.f32 %v4051_v62, %v4079_v4 }
 0x3dd   :  { %v4108_v41 = vmax.f32 %v4052_v22, %v4080_v63  ;;  %v4109_v32 = vmax.f32 %v4053_v37, %v4081_v45  ;;  %v3840_v35 = vadd.f32 %v8778_v29, %v3732_v9  ;;  %v3842_v59 = vadd.f32 %v8781_v30, %v3785_v20 }
 0x3de   :  { %v8833_v36 = vunpack.c.l.b16 %v4192_v55  ;;  %v4371_v47 = vunpack.c.l.b16 %v4138_v58  ;;  %v8836_v25 = vrot.slane %v4106_v54, %v8276_v56  ;;  %v8839_v53 = vrot.slane %v4106_v54, %v8295_v17 }
 0x3df   :  { %v4129_v42 = vrot.slane %v4109_v32, %v8276_v56  ;;  %v4133_v19 = vrot.slane %v4109_v32, %v8295_v17  ;;  %v8844_v43 = vrot.slane %v4107_v33, %v8276_v56  ;;  %v8847_v9 = vrot.slane %v4107_v33, %v8295_v17 }
 0x3e0   :  { %v8850_v20 = vrot.slane %v4108_v41, %v8276_v56  ;;  %v8853_v18 = vrot.slane %v4108_v41, %v8295_v17  ;;  %v3841_v49 = vadd.f32 %v8784_v15, %v8805_v2  ;;  %v3843_v44 = vadd.f32 %v8787_v21, %v8807_v13 }
 0x3e1   :  { %v4140_v23 = vpack.c.bf16 %v4129_v42, %v4129_v42  ;;  %v4141_v39 = vpack.c.bf16 %v4133_v19, %v4133_v19  ;;  %v3844_v50 = vadd.f32 %v8778_v29, %v3736_v3  ;;  %v3846_v7 = vadd.f32 %v8781_v30, %v3789_v28 }
 0x3e2   :  { %v3936_v26 = vcombine.low %v3840_v35, %v3841_v49  ;;  %v3937_v57 = vcombine.high %v3840_v35, %v3841_v49  ;;  %v3938_v12 = vcombine.low %v3842_v59, %v3843_v44  ;;  %v3939_v62 = vcombine.high %v3842_v59, %v3843_v44 }
 0x3e3   :  { %v4373_v22 = vunpack.c.l.b16 %v4140_v23  ;;  %v3845_v37 = vadd.f32 %v8784_v15, %v8809_v14  ;;  %v3847_v2 = vadd.f32 %v8787_v21, %v8811_v6  ;;  %v4139_v38 = vpack.c.bf16 %v4125_v24, %v4125_v24 }
 0x3e4   :  { %v3946_v13 = vrot.slane %v3936_v26, %v8314_v31  ;;  %v3953_v8 = vrot.slane %v3937_v57, %v8314_v31  ;;  %v3960_v29 = vrot.slane %v3938_v12, %v8314_v31  ;;  %v3967_v30 = vrot.slane %v3939_v62, %v8314_v31  ;;  %v7370_v62 = vld [vmem:[#allocation13 + $0x150] sm:$0xff]  }
 0x3e5   :  { %v4375_v3 = vrot.slane %v4373_v22, 7  ;;  %v3972_v28 = vcombine.low %v3844_v50, %v3845_v37  ;;  %v3973_v16 = vcombine.low %v3846_v7, %v3847_v2  ;;  %v4372_v10 = vunpack.c.l.b16 %v4139_v38 }
 0x3e6   :  { %v3968_v34 = vcombine.low %v3946_v13, %v3960_v29  ;;  %v3969_v4 = vcombine.high %v3946_v13, %v3960_v29  ;;  %v3970_v63 = vcombine.low %v3953_v8, %v3967_v30  ;;  %v3971_v15 = vcombine.high %v3953_v8, %v3967_v30 }
 0x3e7   :  { %v3980_v14 = vrot.slane %v3972_v28, %v8314_v31  ;;  %v3987_v21 = vrot.slane %v3973_v16, %v8314_v31  ;;  %v4374_v6 = vunpack.c.l.b16 %v4141_v39  ;;  %v4376_v45 = vsel %vm1858_vm12, %v4375_v3, %v4371_v47 }
 0x3e8   :  { %v6642_v51 = vrot.slane %v3968_v34, 9  ;;  %v6643_v24 = vrot.slane %v3969_v4, 9  ;;  %v6644_v61 = vrot.slane %v3970_v63, 9  ;;  %v6645_v58 = vrot.slane %v3971_v15, 9 }
 0x3e9   :  { %v3988_v55 = vcombine.low %v3980_v14, %v3987_v21  ;;  %v3989_v54 = vcombine.high %v3980_v14, %v3987_v21  ;;  %v4377_v33 = vrot.slane %v4374_v6, 7  ;;  %v4379_v41 = vpack.c.b16 %v4376_v45, %v4376_v45 }
 0x3ea   :  { %v4054_v32 = vmax.f32 %v3968_v34, %v6642_v51  ;;  %v4055_v35 = vmax.f32 %v3969_v4, %v6643_v24  ;;  %v4056_v59 = vmax.f32 %v3970_v63, %v6644_v61  ;;  %v4057_v42 = vmax.f32 %v3971_v15, %v6645_v58 }
 0x3eb   :  { %v6646_v19 = vrot.slane %v3988_v55, 9  ;;  %v6647_v49 = vrot.slane %v3989_v54, 9  ;;  %v4378_v44 = vsel %vm1858_vm12, %v4377_v33, %v4372_v10  ;;  %v4193_v23 = vpack.c.bf16 %v8817_v48, %v8817_v48 }
 0x3ec   :  { %v4082_v47 = vrot.slane %v4054_v32, 4  ;;  %v4083_v39 = vrot.slane %v4055_v35, 4  ;;  %v4084_v50 = vrot.slane %v4056_v59, 4  ;;  %v4085_v7 = vrot.slane %v4057_v42, 4 }
 0x3ed   :  { %v4058_v26 = vmax.f32 %v3988_v55, %v6646_v19  ;;  %v4059_v57 = vmax.f32 %v3989_v54, %v6647_v49  ;;  %v4380_v12 = vpack.c.b16 %v4378_v44, %v4378_v44  ;;  %v4230_v22 = vunpack.c.l.b16 %v4193_v23 }
 0x3ee   :  { %v4110_v37 = vmax.f32 %v4054_v32, %v4082_v47  ;;  %v4111_v2 = vmax.f32 %v4055_v35, %v4083_v39  ;;  %v4112_v38 = vmax.f32 %v4056_v59, %v4084_v50  ;;  %v4113_v13 = vmax.f32 %v4057_v42, %v4085_v7  ;;  %v7374_v42 = vld [vmem:[#allocation13 + $0x160] sm:$0xff]  }
 0x3ef   :  { %v4086_v8 = vrot.slane %v4058_v26, 4  ;;  %v4087_v29 = vrot.slane %v4059_v57, 4  ;;  %6677 = vmatprep.mubr.msk.bf16.mxu1 %vm1580_vm4, %v4380_v12  ;;  %v4730_v48 = vpack.c.bf16 %v8829_v40, %v8829_v40  ;;  %v4532_v30 = vpack.c.bf16 %v8823_v11, %v8823_v11  ;;  %v7372_v11 = vld [vmem:[#allocation13 + $0x158] sm:$0xff]  }
 0x3f0   :  { %v4183_v3 = vrot.slane %v4110_v37, %v8276_v56  ;;  %v4187_v28 = vrot.slane %v4110_v37, %v8295_v17  ;;  %v4522_v16 = vrot.slane %v4111_v2, %v8276_v56  ;;  %v4526_v10 = vrot.slane %v4111_v2, %v8295_v17  ;;  %4502 = vmatmul.mubr.bf16.vlgmr.msra.gmra.mrb[36].mxu1 %v4379_v41 }
 0x3f1   :  { %v4720_v34 = vrot.slane %v4112_v38, %v8276_v56  ;;  %v4724_v4 = vrot.slane %v4112_v38, %v8295_v17  ;;  %v8887_v63 = vrot.slane %v4113_v13, %v8276_v56  ;;  %v8890_v40 = vrot.slane %v4113_v13, %v8295_v17  ;;  %4865 = vmatpush1.bf16.msra.mxu1 %v7370_v62 }
 0x3f2   :  { %v4194_v15 = vpack.c.bf16 %v4183_v3, %v4183_v3  ;;  %v4195_v14 = vpack.c.bf16 %v4187_v28, %v4187_v28  ;;  %v4533_v21 = vpack.c.bf16 %v4522_v16, %v4522_v16  ;;  %v4534_v6 = vpack.c.bf16 %v4526_v10, %v4526_v10  ;;  %4866 = vmatprep.subr.bf16.mxu1 %v7940_v0 }
 0x3f3   :  { %v4731_v45 = vpack.c.bf16 %v4720_v34, %v4720_v34  ;;  %v4732_v51 = vpack.c.bf16 %v4724_v4, %v4724_v4  ;;  %v4929_v24 = vpack.c.bf16 %v8887_v63, %v8887_v63  ;;  %v4930_v61 = vpack.c.bf16 %v8890_v40, %v8890_v40  ;;  %v7382_v63 = vld [vmem:[#allocation13 + $0x180] sm:$0xff]  }
 0x3f4   :  { %v4231_v58 = vunpack.c.l.b16 %v4194_v15  ;;  %v4114_v55 = vmax.f32 %v4058_v26, %v4086_v8  ;;  %v4115_v54 = vmax.f32 %v4059_v57, %v4087_v29  ;;  %v4232_v33 = vunpack.c.l.b16 %v4195_v14  ;;  %v7376_v8 = vld [vmem:[#allocation13 + $0x168] sm:$0xff]  }
 0x3f5   :  { %4867 = vmatpush1.bf16.msra.mxu1 %v7372_v11  ;;  %v4767_v41 = vunpack.c.l.b16 %v4730_v48  ;;  %v4769_v32 = vunpack.c.l.b16 %v4732_v51  ;;  %v4569_v35 = vunpack.c.l.b16 %v4532_v30  ;;  %v4571_v59 = vunpack.c.l.b16 %v4534_v6  ;;  %v7373_v30 = vld [vmem:[#allocation13 + $0xe0] sm:$0xff]  }
 0x3f6   :  { %v4233_v19 = vrot.slane %v4231_v58, 7  ;;  %v5116_v49 = vrot.slane %v4114_v55, %v8276_v56  ;;  %v5120_v44 = vrot.slane %v4114_v55, %v8295_v17  ;;  %v8900_v23 = vrot.slane %v4115_v54, %v8276_v56  ;;  %4868 = vmatprep.subr.bf16.mxu1 %v7940_v0 }
 0x3f7   :  { %v5318_v47 = vrot.slane %v4115_v54, %v8295_v17  ;;  %v4235_v39 = vrot.slane %v4232_v33, 7  ;;  %v4772_v50 = vrot.slane %v4769_v32, 7  ;;  %v4574_v7 = vrot.slane %v4571_v59, 7 }
 0x3f8   :  { %v5127_v26 = vpack.c.bf16 %v5116_v49, %v5116_v49  ;;  %v5128_v57 = vpack.c.bf16 %v5120_v44, %v5120_v44  ;;  %v5325_v12 = vpack.c.bf16 %v8900_v23, %v8900_v23  ;;  %v4234_v62 = vsel %vm1858_vm12, %v4233_v19, %v8833_v36 }
 0x3f9   :  { %v5326_v37 = vpack.c.bf16 %v5318_v47, %v5318_v47  ;;  %v4236_v2 = vsel %vm1858_vm12, %v4235_v39, %v4230_v22  ;;  %v4773_v38 = vsel %vm1858_vm12, %v4772_v50, %v4767_v41  ;;  %v4237_v13 = vpack.c.b16 %v4234_v62, %v4234_v62  ;;  %4869 = vmatpush1.bf16.msra.mxu1 %v7374_v42  ;;  %v7380_v41 = vld [vmem:[#allocation13 + $0x178] sm:$0xff]   ;;  %v7377_v42 = vld [vmem:[#allocation13 + $0xf0] sm:$0xff]  }
 0x3fa   :  { %v4238_v29 = vpack.c.b16 %v4236_v2, %v4236_v2  ;;  %v4775_v48 = vpack.c.b16 %v4773_v38, %v4773_v38  ;;  %v4575_v3 = vsel %vm1858_vm12, %v4574_v7, %v4569_v35  ;;  %4870 = vmatprep.subr.bf16.mxu1 %v7940_v0  ;;  %v4729_v28 = vpack.c.bf16 %v8826_v1, %v8826_v1  ;;  %v7378_v1 = vld [vmem:[#allocation13 + $0x170] sm:$0xff]   ;;  %v7381_v2 = vld [vmem:[#allocation13 + $0x100] sm:$0xff]  }
 0x3fb   :  { %v4577_v16 = vpack.c.b16 %v4575_v3, %v4575_v3  ;;  %v4768_v36 = vunpack.c.l.b16 %v4731_v45  ;;  %v5126_v22 = vpack.c.bf16 %v8847_v9, %v8847_v9  ;;  %v5165_v10 = vunpack.c.l.b16 %v5128_v57  ;;  %v7375_v45 = vld [vmem:[#allocation13 + $0xe8] sm:$0xff]   ;;  %v7386_v38 = vld [vmem:[#allocation13 + $0x190] sm:$0xff]  }
 0x3fc   :  { %6662 = vmatprep.mubr.msk.bf16.mxu0 %vm1580_vm4, %v4238_v29  ;;  %6707 = vmatprep.mubr.msk.bf16.mxu1 %vm1580_vm4, %v4775_v48  ;;  %v4766_v34 = vunpack.c.l.b16 %v4729_v28  ;;  %v4531_v4 = vpack.c.bf16 %v8820_v5, %v8820_v5  ;;  %v4570_v40 = vunpack.c.l.b16 %v4533_v21  ;;  %v4928_v11 = vpack.c.bf16 %v8839_v53, %v8839_v53  ;;  %v7385_v29 = vld [vmem:[#allocation13 + $0x110] sm:$0xff]   ;;  %v7390_v48 = vld [vmem:[#allocation13 + $0x1a0] sm:$0xff]   ;;  %v7392_v3 = vld [vmem:[#allocation13 + $0x1a8] sm:$0xff]  }
 0x3fd   :  { %4360 = vmatmul.mubr.bf16.vlgmr.msra.gmra.mrb[28].mxu0 %v4237_v13  ;;  %4871 = vmatpush1.bf16.msra.mxu1 %v7376_v8  ;;  %v4770_v15 = vrot.slane %v4768_v36, 7  ;;  %v5163_v14 = vunpack.c.l.b16 %v5126_v22  ;;  %v5168_v6 = vrot.slane %v5165_v10, 7  ;;  %v4967_v9 = vunpack.c.l.b16 %v4930_v61  ;;  %v7383_v13 = vld [vmem:[#allocation13 + $0x108] sm:$0xff]   ;;  %v7388_v8 = vld [vmem:[#allocation13 + $0x198] sm:$0xff]   ;;  %v7389_v28 = vld [vmem:[#allocation13 + $0x120] sm:$0xff]  }
 0x3fe   :  { %4667 = vmatpush1.bf16.msra.mxu0 %v7373_v30  ;;  %6692 = vmatprep.mubr.msk.bf16.mxu0 %vm1580_vm4, %v4577_v16  ;;  %v4568_v51 = vunpack.c.l.b16 %v4531_v4  ;;  %v4572_v58 = vrot.slane %v4570_v40, 7  ;;  %v4965_v55 = vunpack.c.l.b16 %v4928_v11  ;;  %v5125_v5 = vpack.c.bf16 %v8844_v43, %v8844_v43  ;;  %v7387_v30 = vld [vmem:[#allocation13 + $0x118] sm:$0xff]   ;;  %v7394_v16 = vld [vmem:[#allocation13 + $0x1b0] sm:$0xff]   ;;  %v7391_v36 = vld [vmem:[#allocation13 + $0x128] sm:$0xff]  }
 0x3ff   :  { %4668 = vmatprep.subr.bf16.mxu0 %v7940_v0  ;;  %4872 = vmatprep.subr.bf16.mxu1 %v7940_v0  ;;  %v8928_v53 = vsel %vm1858_vm12, %v4770_v15, %v4766_v34  ;;  %v8931_v21 = vsel %vm1858_vm12, %v5168_v6, %v5163_v14  ;;  %v4970_v61 = vrot.slane %v4967_v9, 7  ;;  %v5164_v54 = vunpack.c.l.b16 %v5127_v26  ;;  %v7396_v22 = vld [vmem:[#allocation13 + $0x1b8] sm:$0xff]   ;;  %v7393_v10 = vld [vmem:[#allocation13 + $0x130] sm:$0xff]   ;;  %v7397_v15 = vld [vmem:[#allocation13 + $0x140] sm:$0xff]  }
 0x400   :  { %v8934_v33 = vsel %vm1858_vm12, %v4572_v58, %v4568_v51  ;;  %v5162_v43 = vunpack.c.l.b16 %v5125_v5  ;;  %v4927_v59 = vpack.c.bf16 %v8836_v25, %v8836_v25  ;;  %v4966_v19 = vunpack.c.l.b16 %v4929_v24  ;;  %v7398_v34 = vld [vmem:[#allocation13 + $0x230] sm:$0xff]   ;;  %v7395_v4 = vld [vmem:[#allocation13 + $0x138] sm:$0xff]   ;;  %v7402_v14 = vld [vmem:[#allocation13 + $0x240] sm:$0xff]  }
 0x401   :  { %4873 = vmatpush1.bf16.msra.mxu1 %v7378_v1  ;;  %v8937_v32 = vsel %vm1858_vm12, %v4970_v61, %v4965_v55  ;;  %v5166_v35 = vrot.slane %v5164_v54, 7  ;;  %v5324_v49 = vpack.c.bf16 %v8853_v18, %v8853_v18  ;;  %v5363_v44 = vunpack.c.l.b16 %v5326_v37  ;;  %v7379_v18 = vld [vmem:[#allocation13 + $0xf8] sm:$0xff]   ;;  %v7399_v6 = vld [vmem:[#allocation13 + $0x148] sm:$0xff]   ;;  %v7406_v55 = vld [vmem:[#allocation13 + $0x250] sm:$0xff]  }
 0x402   :  { %4669 = vmatpush1.bf16.msra.mxu0 %v7375_v45  ;;  %4874 = vmatprep.subr.bf16.mxu1 %v7940_v0  ;;  %v5323_v25 = vpack.c.bf16 %v8850_v20, %v8850_v20  ;;  %v5362_v47 = vunpack.c.l.b16 %v5325_v12  ;;  %v4964_v39 = vunpack.c.l.b16 %v4927_v59  ;;  %v4968_v50 = vrot.slane %v4966_v19, 7  ;;  %v7384_v12 = vld [vmem:[#allocation13 + $0x188] sm:$0xff]   ;;  %v7400_v1 = vld [vmem:[#allocation13 + $0x238] sm:$0xff]   ;;  %v7401_v45 = vld [vmem:[#allocation13 + $0x1c0] sm:$0xff]  }
 0x403   :  { %4670 = vmatprep.subr.bf16.mxu0 %v7940_v0  ;;  %v8949_v23 = vsel %vm1858_vm12, %v5166_v35, %v5162_v43  ;;  %v5361_v7 = vunpack.c.l.b16 %v5324_v49  ;;  %v5366_v26 = vrot.slane %v5363_v44, 7  ;;  %v4774_v40 = vpack.c.b16 %v8928_v53, %v8928_v53  ;;  %v7404_v9 = vld [vmem:[#allocation13 + $0x248] sm:$0xff]   ;;  %v7408_v53 = vld [vmem:[#allocation13 + $0x258] sm:$0xff]   ;;  %v7410_v61 = vld [vmem:[#allocation13 + $0x260] sm:$0xff]  }
 0x404   :  { %v5360_v24 = vunpack.c.l.b16 %v5323_v25  ;;  %v5364_v57 = vrot.slane %v5362_v47, 7  ;;  %v8955_v62 = vsel %vm1858_vm12, %v4968_v50, %v4964_v39  ;;  %v5171_v11 = vpack.c.b16 %v8931_v21, %v8931_v21  ;;  %v7403_v5 = vld [vmem:[#allocation13 + $0x1c8] sm:$0xff]   ;;  %v7405_v21 = vld [vmem:[#allocation13 + $0x1d0] sm:$0xff]   ;;  %v7407_v54 = vld [vmem:[#allocation13 + $0x1d8] sm:$0xff]  }
 0x405   :  { %4875 = vmatpush1.bf16.msra.mxu1 %v7380_v41  ;;  %v8958_v37 = vsel %vm1858_vm12, %v5366_v26, %v5361_v7  ;;  %v4576_v51 = vpack.c.b16 %v8934_v33, %v8934_v33  ;;  %v4973_v58 = vpack.c.b16 %v8937_v32, %v8937_v32  ;;  %v7412_v33 = vld [vmem:[#allocation13 + $0x268] sm:$0xff]   ;;  %v7409_v41 = vld [vmem:[#allocation13 + $0x1e0] sm:$0xff]   ;;  %v7414_v32 = vld [vmem:[#allocation13 + $0x270] sm:$0xff]   ;;  %v5170_v26 = vpack.c.b16 %v8949_v23, %v8949_v23 }
 0x406   :  { %4671 = vmatpush1.bf16.msra.mxu0 %v7377_v42  ;;  %4876 = vmatprep.subr.bf16.mxu1 %v7940_v0  ;;  %v8962_v20 = vsel %vm1858_vm12, %v5364_v57, %v5360_v24  ;;  %v7411_v43 = vld [vmem:[#allocation13 + $0x1e8] sm:$0xff]   ;;  %v7416_v35 = vld [vmem:[#allocation13 + $0x278] sm:$0xff]   ;;  %v7413_v59 = vld [vmem:[#allocation13 + $0x1f0] sm:$0xff]   ;;  %v5369_v23 = vpack.c.b16 %v8958_v37, %v8958_v37 }
 0x407   :  { %4672 = vmatprep.subr.bf16.mxu0 %v7940_v0  ;;  %v7418_v42 = vld [vmem:[#allocation13 + $0x280] sm:$0xff]   ;;  %v7415_v19 = vld [vmem:[#allocation13 + $0x1f8] sm:$0xff]   ;;  %v7420_v49 = vld [vmem:[#allocation13 + $0x288] sm:$0xff]  }
 0x408   :  { %v7417_v44 = vld [vmem:[#allocation13 + $0x200] sm:$0xff]   ;;  %v7422_v25 = vld [vmem:[#allocation13 + $0x290] sm:$0xff]   ;;  %v7419_v47 = vld [vmem:[#allocation13 + $0x208] sm:$0xff]  }
 0x409   :  { %4877 = vmatpush1.bf16.msra.mxu1 %v7382_v63  ;;  %v7424_v39 = vld [vmem:[#allocation13 + $0x298] sm:$0xff]   ;;  %v7421_v50 = vld [vmem:[#allocation13 + $0x210] sm:$0xff]   ;;  %v7425_v63 = vld [vmem:[#allocation13 + $0x220] sm:$0xff]  }
 0x40a   :  { %4673 = vmatpush1.bf16.msra.mxu0 %v7379_v18  ;;  %4878 = vmatprep.subr.bf16.mxu1 %v7940_v0  ;;  %v7423_v7 = vld [vmem:[#allocation13 + $0x218] sm:$0xff]   ;;  %v7426_v24 = vld [vmem:[#allocation13 + $0x228] sm:$0xff]   ;;  %v7427_v57 = vld [vmem:[#allocation13 + $0x2a0] sm:$0xff]   ;;  %v4972_v18 = vpack.c.b16 %v8955_v62, %v8955_v62 }
 0x40b   :  { %4674 = vmatprep.subr.bf16.mxu0 %v7940_v0  ;;  %v7431_v62 = vld [vmem:[#allocation13 + $0x2c0] sm:$0xff]   ;;  %v7432_v37 = vld [vmem:[#allocation13 + $0x2c8] sm:$0xff]  }
 0x40d   :  { %4879 = vmatpush1.bf16.msra.mxu1 %v7384_v12  ;;  %v7428_v12 = vld [vmem:[#allocation13 + $0x2a8] sm:$0xff]  }
 0x40e   :  { %4675 = vmatpush1.bf16.msra.mxu0 %v7381_v2  ;;  %4880 = vmatprep.subr.bf16.mxu1 %v7940_v0  ;;  %v7429_v2 = vld [vmem:[#allocation13 + $0x2b0] sm:$0xff]  }
 0x40f   :  { %4676 = vmatprep.subr.bf16.mxu0 %v7940_v0 }
 0x411   :  { %4881 = vmatpush1.bf16.msra.mxu1 %v7386_v38  ;;  %v7430_v38 = vld [vmem:[#allocation13 + $0x2b8] sm:$0xff]  }
 0x412   :  { %4677 = vmatpush1.bf16.msra.mxu0 %v7383_v13  ;;  %4882 = vmatprep.subr.bf16.mxu1 %v7940_v0  ;;  %v7433_v13 = vld [vmem:[#allocation13 + $0x2d0] sm:$0xff]  }
 0x413   :  { %4678 = vmatprep.subr.bf16.mxu0 %v7940_v0 }
 0x415   :  { %4883 = vmatpush1.bf16.msra.mxu1 %v7388_v8  ;;  %v7434_v8 = vld [vmem:[#allocation13 + $0x2d8] sm:$0xff]  }
 0x416   :  { %4679 = vmatpush1.bf16.msra.mxu0 %v7385_v29  ;;  %4884 = vmatprep.subr.bf16.mxu1 %v7940_v0  ;;  %v7435_v29 = vld [vmem:[#allocation13 + $0x2e0] sm:$0xff]  }
 0x417   :  { %4680 = vmatprep.subr.bf16.mxu0 %v7940_v0 }
 0x419   :  { %4885 = vmatpush1.bf16.msra.mxu1 %v7390_v48  ;;  %v7436_v48 = vld [vmem:[#allocation13 + $0x2e8] sm:$0xff]  }
 0x41a   :  { %4681 = vmatpush1.bf16.msra.mxu0 %v7387_v30  ;;  %4886 = vmatprep.subr.bf16.mxu1 %v7940_v0  ;;  %v7437_v30 = vld [vmem:[#allocation13 + $0x2f0] sm:$0xff]  }
 0x41b   :  { %4682 = vmatprep.subr.bf16.mxu0 %v7940_v0 }
 0x41d   :  { %4887 = vmatpush1.bf16.msra.mxu1 %v7392_v3  ;;  %v7438_v3 = vld [vmem:[#allocation13 + $0x2f8] sm:$0xff]  }
 0x41e   :  { %4683 = vmatpush1.bf16.msra.mxu0 %v7389_v28  ;;  %4888 = vmatprep.subr.bf16.mxu1 %v7940_v0  ;;  %v7439_v28 = vld [vmem:[#allocation13 + $0x300] sm:$0xff]  }
 0x41f   :  { %4684 = vmatprep.subr.bf16.mxu0 %v7940_v0 }
 0x421   :  { %4889 = vmatpush1.bf16.msra.mxu1 %v7394_v16  ;;  %v7440_v16 = vld [vmem:[#allocation13 + $0x308] sm:$0xff]  }
 0x422   :  { %4685 = vmatpush1.bf16.msra.mxu0 %v7391_v36  ;;  %4890 = vmatprep.subr.bf16.mxu1 %v7940_v0  ;;  %v5368_v36 = vpack.c.b16 %v8962_v20, %v8962_v20 }
 0x423   :  { %4686 = vmatprep.subr.bf16.mxu0 %v7940_v0 }
 0x425   :  { %4891 = vmatpush1.bf16.msra.mxu1 %v7396_v22 }
 0x426   :  { %4687 = vmatpush1.bf16.msra.mxu0 %v7393_v10  ;;  %5260 = vmatprep.subr.bf16.mxu1 %v7940_v0 }
 0x427   :  { %4688 = vmatprep.subr.bf16.mxu0 %v7940_v0 }
 0x428   :  { %4897 = vmatmul.mubr.bf16.vlgmr.msra.gmra.mrb[40].mxu1 %v4774_v40 }
 0x429   :  { %5261 = vmatpush1.bf16.msra.mxu1 %v7398_v34  ;;  %6737 = vmatprep.mubr.msk.bf16.mxu1 %vm1580_vm4, %v5171_v11 }
 0x42a   :  { %4689 = vmatpush1.bf16.msra.mxu0 %v7395_v4  ;;  %5262 = vmatprep.subr.bf16.mxu1 %v7940_v0 }
 0x42b   :  { %4690 = vmatprep.subr.bf16.mxu0 %v7940_v0 }
 0x42d   :  { %5263 = vmatpush1.bf16.msra.mxu1 %v7400_v1 }
 0x42e   :  { %4691 = vmatpush1.bf16.msra.mxu0 %v7397_v15  ;;  %5264 = vmatprep.subr.bf16.mxu1 %v7940_v0 }
 0x42f   :  { %4692 = vmatprep.subr.bf16.mxu0 %v7940_v0 }
 0x431   :  { %5265 = vmatpush1.bf16.msra.mxu1 %v7402_v14 }
 0x432   :  { %4693 = vmatpush1.bf16.msra.mxu0 %v7399_v6  ;;  %5266 = vmatprep.subr.bf16.mxu1 %v7940_v0 }
 0x433   :  { %5062 = vmatprep.subr.bf16.mxu0 %v7940_v0 }
 0x435   :  { %4699 = vmatmul.mubr.bf16.vlgmr.msra.gmra.mrb[32].mxu0 %v4576_v51  ;;  %5267 = vmatpush1.bf16.msra.mxu1 %v7404_v9 }
 0x436   :  { %5063 = vmatpush1.bf16.msra.mxu0 %v7401_v45  ;;  %6722 = vmatprep.mubr.msk.bf16.mxu0 %vm1580_vm4, %v4973_v58 }
 0x437   :  { %5064 = vmatprep.subr.bf16.mxu0 %v7940_v0  ;;  %5268 = vmatprep.subr.bf16.mxu1 %v7940_v0 }
 0x439   :  { %5269 = vmatpush1.bf16.msra.mxu1 %v7406_v55 }
 0x43a   :  { %5065 = vmatpush1.bf16.msra.mxu0 %v7403_v5  ;;  %5270 = vmatprep.subr.bf16.mxu1 %v7940_v0 }
 0x43b   :  { %5066 = vmatprep.subr.bf16.mxu0 %v7940_v0 }
 0x43d   :  { %5271 = vmatpush1.bf16.msra.mxu1 %v7408_v53 }
 0x43e   :  { %5067 = vmatpush1.bf16.msra.mxu0 %v7405_v21  ;;  %5272 = vmatprep.subr.bf16.mxu1 %v7940_v0 }
 0x43f   :  { %5068 = vmatprep.subr.bf16.mxu0 %v7940_v0 }
 0x441   :  { %5273 = vmatpush1.bf16.msra.mxu1 %v7410_v61  ;;  %v7441_v61 = vld [vmem:[#allocation16] sm:$0xff]  }
 0x442   :  { %5069 = vmatpush1.bf16.msra.mxu0 %v7407_v54  ;;  %5274 = vmatprep.subr.bf16.mxu1 %v7940_v0  ;;  %v7442_v54 = vld [vmem:[#allocation16 + $0x8] sm:$0xff]  }
 0x443   :  { %5070 = vmatprep.subr.bf16.mxu0 %v7940_v0 }
 0x445   :  { %5275 = vmatpush1.bf16.msra.mxu1 %v7412_v33  ;;  %v7443_v33 = vld [vmem:[#allocation16 + $0x10] sm:$0xff]  }
 0x446   :  { %5071 = vmatpush1.bf16.msra.mxu0 %v7409_v41  ;;  %5276 = vmatprep.subr.bf16.mxu1 %v7940_v0  ;;  %v7444_v41 = vld [vmem:[#allocation16 + $0x18] sm:$0xff]  }
 0x447   :  { %5072 = vmatprep.subr.bf16.mxu0 %v7940_v0 }
 0x449   :  { %5277 = vmatpush1.bf16.msra.mxu1 %v7414_v32  ;;  %v7445_v32 = vld [vmem:[#allocation16 + $0x20] sm:$0xff]  }
 0x44a   :  { %5073 = vmatpush1.bf16.msra.mxu0 %v7411_v43  ;;  %5278 = vmatprep.subr.bf16.mxu1 %v7940_v0  ;;  %v7446_v43 = vld [vmem:[#allocation16 + $0x28] sm:$0xff]  }
 0x44b   :  { %5074 = vmatprep.subr.bf16.mxu0 %v7940_v0 }
 0x44d   :  { %5279 = vmatpush1.bf16.msra.mxu1 %v7416_v35  ;;  %v7447_v35 = vld [vmem:[#allocation16 + $0x30] sm:$0xff]  }
 0x44e   :  { %5075 = vmatpush1.bf16.msra.mxu0 %v7413_v59  ;;  %5280 = vmatprep.subr.bf16.mxu1 %v7940_v0  ;;  %v7448_v59 = vld [vmem:[#allocation16 + $0x38] sm:$0xff]  }
 0x44f   :  { %5076 = vmatprep.subr.bf16.mxu0 %v7940_v0 }
 0x451   :  { %5281 = vmatpush1.bf16.msra.mxu1 %v7418_v42 }
 0x452   :  { %5077 = vmatpush1.bf16.msra.mxu0 %v7415_v19  ;;  %5282 = vmatprep.subr.bf16.mxu1 %v7940_v0 }
 0x453   :  { %5078 = vmatprep.subr.bf16.mxu0 %v7940_v0 }
 0x455   :  { %5283 = vmatpush1.bf16.msra.mxu1 %v7420_v49 }
 0x456   :  { %5079 = vmatpush1.bf16.msra.mxu0 %v7417_v44  ;;  %5284 = vmatprep.subr.bf16.mxu1 %v7940_v0 }
 0x457   :  { %5080 = vmatprep.subr.bf16.mxu0 %v7940_v0 }
 0x459   :  { %5285 = vmatpush1.bf16.msra.mxu1 %v7422_v25 }
 0x45a   :  { %5081 = vmatpush1.bf16.msra.mxu0 %v7419_v47  ;;  %5286 = vmatprep.subr.bf16.mxu1 %v7940_v0 }
 0x45b   :  { %5082 = vmatprep.subr.bf16.mxu0 %v7940_v0 }
 0x45d   :  { %5287 = vmatpush1.bf16.msra.mxu1 %v7424_v39 }
 0x45e   :  { %5083 = vmatpush1.bf16.msra.mxu0 %v7421_v50  ;;  %6842 = vmatprep.subr.bf16.mxu1 %v8252_v46 }
 0x45f   :  { %5084 = vmatprep.subr.bf16.mxu0 %v7940_v0 }
 0x460   :  { %5293 = vmatmul.mubr.bf16.vlgmr.msra.gmra.mrb[44].mxu1 %v5170_v26 }
 0x461   :  { %6858 = vmatprep.mubr.msk.bf16.mxu1 %vm7943_vm2, %v8252_v46  ;;  %6843 = vmatpush3.bf16.msra.mxu1 %v7441_v61  ;;  %v7461_v61 = vld [vmem:[#allocation22 + $0x44] ss:$28 sps:$4 sm:$0xff]  }
 0x462   :  { %5085 = vmatpush1.bf16.msra.mxu0 %v7423_v7  ;;  %6844 = vmatprep.subr.bf16.mxu1 %v8252_v46 }
 0x463   :  { %5086 = vmatprep.subr.bf16.mxu0 %v7940_v0 }
 0x465   :  { %6845 = vmatpush3.bf16.msra.mxu1 %v7442_v54  ;;  %v7456_v54 = vld [vmem:[#allocation22 + $0x38] ss:$28 sps:$4 sm:$0xff]  }
 0x466   :  { %5087 = vmatpush1.bf16.msra.mxu0 %v7425_v63  ;;  %6846 = vmatprep.subr.bf16.mxu1 %v8252_v46 }
 0x467   :  { %5088 = vmatprep.subr.bf16.mxu0 %v7940_v0 }
 0x469   :  { %6847 = vmatpush3.bf16.msra.mxu1 %v7443_v33  ;;  %v7459_v33 = vld [vmem:[#allocation22 + $0x40] ss:$28 sps:$4 sm:$0xff]  }
 0x46a   :  { %5089 = vmatpush1.bf16.msra.mxu0 %v7426_v24  ;;  %6848 = vmatprep.subr.bf16.mxu1 %v8252_v46  ;;  %v6753_v24 = vld [vmem:[#allocation15] ss:$0 sm:$0xff] }
 0x46b   :  { %5458 = vmatprep.subr.bf16.mxu0 %v7940_v0 }
 0x46d   :  { %5095 = vmatmul.mubr.bf16.vlgmr.msra.gmra.mrb[36].mxu0 %v4972_v18  ;;  %6849 = vmatpush3.bf16.msra.mxu1 %v7444_v41  ;;  %v7464_v41 = vld [vmem:[#allocation22 + $0x74] ss:$28 sps:$4 sm:$0xff]  }
 0x46e   :  { %5459 = vmatpush1.bf16.msra.mxu0 %v7427_v57  ;;  %6752 = vmatprep.mubr.msk.bf16.mxu0 %vm1580_vm4, %v5369_v23  ;;  %vm5637_vm4 = vcmask 130048  }
 0x46f   :  { %5460 = vmatprep.subr.bf16.mxu0 %v7940_v0  ;;  %6850 = vmatprep.subr.bf16.mxu1 %v8252_v46 }
 0x471   :  { %6851 = vmatpush3.bf16.msra.mxu1 %v7445_v32  ;;  %v7467_v32 = vld [vmem:[#allocation22 + $0x7c] ss:$28 sps:$4 sm:$0xff]  }
 0x472   :  { %5461 = vmatpush1.bf16.msra.mxu0 %v7428_v12  ;;  %6852 = vmatprep.subr.bf16.mxu1 %v8252_v46 }
 0x473   :  { %5462 = vmatprep.subr.bf16.mxu0 %v7940_v0 }
 0x475   :  { %6853 = vmatpush3.bf16.msra.mxu1 %v7446_v43  ;;  %v7462_v43 = vld [vmem:[#allocation22 + $0x70] ss:$28 sps:$4 sm:$0xff]  }
 0x476   :  { %5463 = vmatpush1.bf16.msra.mxu0 %v7429_v2  ;;  %6854 = vmatprep.subr.bf16.mxu1 %v8252_v46 }
 0x477   :  { %5464 = vmatprep.subr.bf16.mxu0 %v7940_v0 }
 0x479   :  { %6855 = vmatpush3.bf16.msra.mxu1 %v7447_v35  ;;  %v7465_v35 = vld [vmem:[#allocation22 + $0x78] ss:$28 sps:$4 sm:$0xff]  }
 0x47a   :  { %5465 = vmatpush1.bf16.msra.mxu0 %v7430_v38  ;;  %6856 = vmatprep.subr.bf16.mxu1 %v8252_v46 }
 0x47b   :  { %5466 = vmatprep.subr.bf16.mxu0 %v7940_v0 }
 0x47d   :  { %6857 = vmatpush3.bf16.msra.mxu1 %v7448_v59  ;;  %v7470_v59 = vld [vmem:[#allocation22 + $0xac] ss:$28 sps:$4 sm:$0xff]  }
 0x47e   :  { %5467 = vmatpush1.bf16.msra.mxu0 %v7431_v62  ;;  %6862 = vmatprep.subr.bf16.mxu1 %v8252_v46 }
 0x47f   :  { %5468 = vmatprep.subr.bf16.mxu0 %v7940_v0 }
 0x482   :  { %5469 = vmatpush1.bf16.msra.mxu0 %v7432_v37 }
 0x483   :  { %5470 = vmatprep.subr.bf16.mxu0 %v7940_v0 }
 0x486   :  { %5471 = vmatpush1.bf16.msra.mxu0 %v7433_v13 }
 0x487   :  { %5472 = vmatprep.subr.bf16.mxu0 %v7940_v0 }
 0x48a   :  { %5473 = vmatpush1.bf16.msra.mxu0 %v7434_v8 }
 0x48b   :  { %5474 = vmatprep.subr.bf16.mxu0 %v7940_v0 }
 0x48e   :  { %5475 = vmatpush1.bf16.msra.mxu0 %v7435_v29 }
 0x48f   :  { %5476 = vmatprep.subr.bf16.mxu0 %v7940_v0 }
 0x492   :  { %5477 = vmatpush1.bf16.msra.mxu0 %v7436_v48  ;;  %v7449_v48 = vld [vmem:[#allocation19] sm:$0xff]  }
 0x493   :  { %5478 = vmatprep.subr.bf16.mxu0 %v7940_v0 }
 0x496   :  { %5479 = vmatpush1.bf16.msra.mxu0 %v7437_v30  ;;  %v6754_v30 = vld [vmem:[#allocation18] ss:$0 sm:$0xff] }
 0x497   :  { %5480 = vmatprep.subr.bf16.mxu0 %v7940_v0 }
 0x49a   :  { %5481 = vmatpush1.bf16.msra.mxu0 %v7438_v3 }
 0x49b   :  { %5482 = vmatprep.subr.bf16.mxu0 %v7940_v0 }
 0x49e   :  { %5483 = vmatpush1.bf16.msra.mxu0 %v7439_v28 }
 0x49f   :  { %5484 = vmatprep.subr.bf16.mxu0 %v7940_v0 }
 0x4a2   :  { %5485 = vmatpush1.bf16.msra.mxu0 %v7440_v16 }
 0x4a5   :  { %5491 = vmatmul.mubr.bf16.vlgmr.msra.gmra.mrb[40].mxu0 %v5368_v36 }
 0x4a6   :  { %6166 = vmatprep.mubr.bf16.mxu0 %v7940_v0 }
 0x4c3   :  { %v4503_v22 = vpop.f32.mrb[36].mxu1 }
 0x4c4   :  { %v4505_v10 = vpop.f32.mrb[37].mxu1 }
 0x4c5   :  { %v4506_v34 = vpop.f32.mrb[38].mxu1 }
 0x4c6   :  { %v4507_v4 = vpop.f32.mrb[39].mxu1 }
 0x4d0   :  { %v4361_v40 = vpop.f32.mrb[28].mxu0 }
 0x4d1   :  { %v4504_v11 = vadd.f32 %v4503_v22, %v4361_v40  ;;  %v4363_v1 = vpop.f32.mrb[29].mxu0 }
 0x4d2   :  { %v4364_v15 = vpop.f32.mrb[30].mxu0 }
 0x4d3   :  { %v4365_v14 = vpop.f32.mrb[31].mxu0 }
 0x4fb   :  { %v4898_v6 = vpop.f32.mrb[40].mxu1 }
 0x4fc   :  { %v4900_v9 = vpop.f32.mrb[41].mxu1 }
 0x4fd   :  { %v4901_v45 = vpop.f32.mrb[42].mxu1 }
 0x4fe   :  { %v4902_v51 = vpop.f32.mrb[43].mxu1 }
 0x508   :  { %v4700_v58 = vpop.f32.mrb[32].mxu0 }
 0x509   :  { %v4706_v55 = vadd.f32 %v4700_v58, %v4504_v11  ;;  %v4702_v5 = vpop.f32.mrb[33].mxu0 }
 0x50a   :  { %v4703_v20 = vpop.f32.mrb[34].mxu0  ;;  %v7455_v5 = vld [vmem:[#allocation22 + $0xc] ss:$28 sps:$4 sm:$0xff]  }
 0x50b   :  { %v4704_v53 = vpop.f32.mrb[35].mxu0  ;;  %v4904_v21 = vadd.f32 %v4898_v6, %v4706_v55  ;;  %v7452_v55 = vld [vmem:[#allocation22 + $0x4] ss:$28 sps:$4 sm:$0xff]   ;;  %6134 = vmatprep.subr.bf16.mxu0 %v7455_v5  ;;  %v7517_v5 = vld [vmem:[#allocation22 + $0xf8] ss:$28 sps:$4 sm:$0xff]  }
 0x50c   :  { %v7450_v20 = vld [vmem:[#allocation22] ss:$28 sps:$4 sm:$0xff]   ;;  %v7453_v53 = vld [vmem:[#allocation22 + $0x8] ss:$28 sps:$4 sm:$0xff]  }
 0x50d   :  { %6135 = vmatpush1.bf16.msra.mxu0 %v7453_v53  ;;  %v7518_v53 = vld [vmem:[#allocation22 + $0x128] ss:$28 sps:$4 sm:$0xff]  }
 0x50e   :  { %6136 = vmatprep.subr.bf16.mxu0 %v7461_v61  ;;  %v7524_v61 = vld [vmem:[#allocation22 + $0x164] ss:$28 sps:$4 sm:$0xff]  }
 0x511   :  { %6137 = vmatpush1.bf16.msra.mxu0 %v7459_v33  ;;  %v7525_v33 = vld [vmem:[#allocation22 + $0x168] ss:$28 sps:$4 sm:$0xff]  }
 0x512   :  { %6138 = vmatprep.subr.bf16.mxu0 %v7467_v32  ;;  %v7526_v32 = vld [vmem:[#allocation22 + $0x198] ss:$28 sps:$4 sm:$0xff]  }
 0x515   :  { %6139 = vmatpush1.bf16.msra.mxu0 %v7465_v35 }
 0x533   :  { %v5294_v42 = vpop.f32.mrb[44].mxu1 }
 0x534   :  { %v5296_v19 = vpop.f32.mrb[45].mxu1 }
 0x535   :  { %v5297_v49 = vpop.f32.mrb[46].mxu1  ;;  %v7468_v19 = vld [vmem:[#allocation22 + $0xa8] ss:$28 sps:$4 sm:$0xff]  }
 0x536   :  { %v5298_v44 = vpop.f32.mrb[47].mxu1  ;;  %v7471_v49 = vld [vmem:[#allocation22 + $0xb0] ss:$28 sps:$4 sm:$0xff]  }
 0x537   :  { %v7476_v44 = vld [vmem:[#allocation22 + $0xe4] ss:$28 sps:$4 sm:$0xff]  }
 0x540   :  { %v5096_v25 = vpop.f32.mrb[36].mxu0 }
 0x541   :  { %v5102_v47 = vadd.f32 %v5096_v25, %v4904_v21  ;;  %v5098_v39 = vpop.f32.mrb[37].mxu0  ;;  %v7458_v21 = vld [vmem:[#allocation22 + $0x3c] ss:$28 sps:$4 sm:$0xff]   ;;  %v7479_v25 = vld [vmem:[#allocation22 + $0xec] ss:$28 sps:$4 sm:$0xff]  }
 0x542   :  { %v5099_v50 = vpop.f32.mrb[38].mxu0  ;;  %v7477_v39 = vld [vmem:[#allocation22 + $0xe8] ss:$28 sps:$4 sm:$0xff]  }
 0x543   :  { %v5100_v7 = vpop.f32.mrb[39].mxu0  ;;  %v5300_v26 = vadd.f32 %v5294_v42, %v5102_v47  ;;  %v7473_v42 = vld [vmem:[#allocation22 + $0xb4] ss:$28 sps:$4 sm:$0xff]   ;;  %v7474_v47 = vld [vmem:[#allocation22 + $0xe0] ss:$28 sps:$4 sm:$0xff]  }
 0x544   :  { %6140 = vmatprep.subr.bf16.mxu0 %v7473_v42  ;;  %v7482_v50 = vld [vmem:[#allocation22 + $0x11c] ss:$28 sps:$4 sm:$0xff]   ;;  %v7485_v7 = vld [vmem:[#allocation22 + $0x124] ss:$28 sps:$4 sm:$0xff]  }
 0x545   :  { %6141 = vmatpush1.bf16.msra.mxu0 %v7471_v49 }
 0x546   :  { %6142 = vmatprep.subr.bf16.mxu0 %v7479_v25 }
 0x549   :  { %6143 = vmatpush1.bf16.msra.mxu0 %v7477_v39 }
 0x54a   :  { %6144 = vmatprep.subr.bf16.mxu0 %v7485_v7 }
 0x578   :  { %v5492_v63 = vpop.f32.mrb[40].mxu0 }
 0x579   :  { %v5498_v57 = vadd.f32 %v5492_v63, %v5300_v26  ;;  %v5494_v18 = vpop.f32.mrb[41].mxu0  ;;  %v7480_v26 = vld [vmem:[#allocation22 + $0x118] ss:$28 sps:$4 sm:$0xff]   ;;  %v7483_v63 = vld [vmem:[#allocation22 + $0x120] ss:$28 sps:$4 sm:$0xff]  }
 0x57a   :  { %v5495_v23 = vpop.f32.mrb[42].mxu0  ;;  %6145 = vmatpush1.bf16.msra.mxu0 %v7483_v63  ;;  %v7486_v18 = vld [vmem:[#allocation22 + $0x150] ss:$28 sps:$4 sm:$0xff]  }
 0x57b   :  { %v5506_v12 = vadd.f32 %v6753_v24, %v5498_v57  ;;  %v5496_v2 = vpop.f32.mrb[43].mxu0  ;;  %v7488_v24 = vld [vmem:[#allocation22 + $0x154] ss:$28 sps:$4 sm:$0xff]   ;;  %v7491_v57 = vld [vmem:[#allocation22 + $0x15c] ss:$28 sps:$4 sm:$0xff]  }
 0x57c   :  { %v7489_v23 = vld [vmem:[#allocation22 + $0x158] ss:$28 sps:$4 sm:$0xff]   ;;  %6146 = vmatprep.subr.bf16.mxu0 %v7491_v57 }
 0x57d   :  { %v5507_v38 = vsub.f32 0.0, %v5506_v12  ;;  %v7494_v12 = vld [vmem:[#allocation22 + $0x18c] ss:$28 sps:$4 sm:$0xff]   ;;  %v7497_v2 = vld [vmem:[#allocation22 + $0x194] ss:$28 sps:$4 sm:$0xff]  }
 0x57e   :  { %6147 = vmatpush1.bf16.msra.mxu0 %v7489_v23 }
 0x57f   :  { %v5508_v62 = vmul.f32 1.442695, %v5507_v38  ;;  %v7492_v38 = vld [vmem:[#allocation22 + $0x188] ss:$28 sps:$4 sm:$0xff]   ;;  %6148 = vmatprep.subr.bf16.mxu0 %v7497_v2 }
 0x581   :  { %7530 = vpow2.f32 %v5508_v62  ;;  %v7495_v62 = vld [vmem:[#allocation22 + $0x190] ss:$28 sps:$4 sm:$0xff]  }
 0x582   :  { %6149 = vmatpush1.bf16.msra.mxu0 %v7495_v62 }
 0x583   :  { %6868 = vmatprep.subr.bf16.mxu0 %v8252_v46 }
 0x58b   :  { %v7531_v37 = vpop.eup %7530 }
 0x58c   :  { %v5510_v13 = vadd.f32 1.0, %v7531_v37  ;;  %v7500_v37 = vld [vmem:[#allocation22 + $0x14] ss:$28 sps:$4 sm:$0xff]  }
 0x58e   :  { %7532 = vrcp.f32 %v5510_v13  ;;  %v6763_v13 = vld [vmem:[#allocation21] ss:$0 sm:$0xff] }
 0x598   :  { %v7533_v8 = vpop.eup %7532 }
 0x599   :  { %v5512_v29 = vpack.c.bf16 %v7533_v8, %v7533_v8 }
 0x59b   :  { %6859 = vmatmul.mubr.bf16.vlgmr.msra.gmra.mrb[48].mxu1 %v5512_v29 }
 0x59c   :  { %6864 = vmatprep.mubr.msk.bf16.mxu1 %vm7943_vm2, %v8252_v46  ;;  %6863 = vmatpush3.bf16.msra.mxu1 %v7449_v48 }
 0x59d   :  { %6093 = vmatprep.subr.bf16.mxu1 %v7452_v55  ;;  %v7516_v55 = vld [vmem:[#allocation22 + $0xf4] ss:$28 sps:$4 sm:$0xff]  }
 0x66e   :  { %v5618_v3 = vpop.f32.mrb[48].mxu1 }
 0x66f   :  { %v5619_v28 = vadd.f32 %v6754_v30, %v5618_v3  ;;  %v6860_v16 = vpop.f32.mrb[49].mxu1 }
 0x670   :  { %v5621_v36 = vpop.f32.mrb[50].mxu1 }
 0x671   :  { %v5624_v22 = vsub.f32 0.0, %v5619_v28  ;;  %v6861_v10 = vpop.f32.mrb[51].mxu1 }
 0x673   :  { %v5625_v34 = vmul.f32 1.442695, %v5624_v22 }
 0x675   :  { %7534 = vpow2.f32 %v5625_v34  ;;  %v7498_v34 = vld [vmem:[#allocation22 + $0x10] ss:$28 sps:$4 sm:$0xff]  }
 0x67f   :  { %v7535_v4 = vpop.eup %7534 }
 0x680   :  { %v5627_v40 = vadd.f32 1.0, %v7535_v4  ;;  %v7501_v4 = vld [vmem:[#allocation22 + $0x18] ss:$28 sps:$4 sm:$0xff]  }
 0x682   :  { %7536 = vrcp.f32 %v5627_v40 }
 0x68c   :  { %v7537_v11 = vpop.eup %7536 }
 0x68d   :  { %v5639_v1 = vpack.c.bf16 %v7537_v11, %v7537_v11  ;;  %v5630_v15 = vsel %vm5629_vm3, %v7537_v11, 0.0  ;;  %v7504_v11 = vld [vmem:[#allocation22 + $0x4c] ss:$28 sps:$4 sm:$0xff]  }
 0x68e   :  { %v5631_v14 = vrot.slane %v5630_v15, 4 }
 0x68f   :  { %6865 = vmatmul.mubr.msk.bf16.vlgmr.msra.gmra.mrb[52].mxu1 %vm5637_vm4, %v5639_v1  ;;  %v7502_v1 = vld [vmem:[#allocation22 + $0x48] ss:$28 sps:$4 sm:$0xff]  }
 0x690   :  { %6125 = vmatprep.mubr.bf16.mxu1 %v7940_v0  ;;  %v5632_v6 = vadd.f32 %v5631_v14, %v5630_v15  ;;  %6094 = vmatpush1.bf16.msra.mxu1 %v7450_v20  ;;  %v7505_v15 = vld [vmem:[#allocation22 + $0x50] ss:$28 sps:$4 sm:$0xff]   ;;  %v7508_v14 = vld [vmem:[#allocation22 + $0x84] ss:$28 sps:$4 sm:$0xff]  }
 0x691   :  { %6095 = vmatprep.subr.bf16.mxu1 %v7458_v21  ;;  %v7520_v20 = vld [vmem:[#allocation22 + $0x12c] ss:$28 sps:$4 sm:$0xff]  }
 0x692   :  { %v5633_v9 = vrot.slane %v5632_v6, 2  ;;  %v7521_v21 = vld [vmem:[#allocation22 + $0x130] ss:$28 sps:$4 sm:$0xff]  }
 0x694   :  { %v5634_v45 = vadd.f32 %v5633_v9, %v5632_v6  ;;  %6096 = vmatpush1.bf16.msra.mxu1 %v7456_v54  ;;  %v7506_v6 = vld [vmem:[#allocation22 + $0x80] ss:$28 sps:$4 sm:$0xff]   ;;  %v7509_v9 = vld [vmem:[#allocation22 + $0x88] ss:$28 sps:$4 sm:$0xff]  }
 0x695   :  { %6097 = vmatprep.subr.bf16.mxu1 %v7464_v41  ;;  %v7522_v54 = vld [vmem:[#allocation22 + $0x160] ss:$28 sps:$4 sm:$0xff]  }
 0x696   :  { %v5635_v51 = vrot.slane %v5634_v45, 1  ;;  %v7528_v41 = vld [vmem:[#allocation22 + $0x19c] ss:$28 sps:$4 sm:$0xff]  }
 0x698   :  { %v5636_v58 = vadd.f32 %v5635_v51, %v5634_v45  ;;  %6098 = vmatpush1.bf16.msra.mxu1 %v7462_v43  ;;  %v7512_v45 = vld [vmem:[#allocation22 + $0xbc] ss:$28 sps:$4 sm:$0xff]  }
 0x699   :  { %6099 = vmatprep.subr.bf16.mxu1 %v7470_v59  ;;  %v7510_v51 = vld [vmem:[#allocation22 + $0xb8] ss:$28 sps:$4 sm:$0xff]   ;;  %v7529_v43 = vld [vmem:[#allocation22 + $0x1a0] ss:$28 sps:$4 sm:$0xff]  }
 0x69a   :  { %5638 = vst.msk [vmem:[#allocation26] sm:$0xff] %vm5637_vm4, %v5636_v58  ;;  %v7513_v58 = vld [vmem:[#allocation22 + $0xc0] ss:$28 sps:$4 sm:$0xff]  }
 0x69c   :  { %6100 = vmatpush1.bf16.msra.mxu1 %v7468_v19 }
 0x69d   :  { %6101 = vmatprep.subr.bf16.mxu1 %v7476_v44 }
 0x6a0   :  { %6102 = vmatpush1.bf16.msra.mxu1 %v7474_v47 }
 0x6a1   :  { %6103 = vmatprep.subr.bf16.mxu1 %v7482_v50 }
 0x6a4   :  { %6104 = vmatpush1.bf16.msra.mxu1 %v7480_v26 }
 0x6a5   :  { %6105 = vmatprep.subr.bf16.mxu1 %v7488_v24 }
 0x6a8   :  { %6106 = vmatpush1.bf16.msra.mxu1 %v7486_v18 }
 0x6a9   :  { %6107 = vmatprep.subr.bf16.mxu1 %v7494_v12 }
 0x6ac   :  { %6108 = vmatpush1.bf16.msra.mxu1 %v7492_v38 }
 0x6ad   :  { %6175 = vmatprep.subr.bf16.mxu1 %v7500_v37 }
 0x762   :  { %v5692_v8 = vpop.f32.mrb[52].mxu1 }
 0x763   :  { %v5693_v29 = vadd.f32 %v6763_v13, %v5692_v8  ;;  %v6866_v48 = vpop.f32.mrb[53].mxu1 }
 0x764   :  { %v5695_v30 = vpop.f32.mrb[54].mxu1 }
 0x765   :  { %v5698_v3 = vsub.f32 0.0, %v5693_v29  ;;  %v6867_v28 = vpop.f32.mrb[55].mxu1 }
 0x767   :  { %v5699_v16 = vmul.f32 1.442695, %v5698_v3 }
 0x769   :  { %7538 = vpow2.f32 %v5699_v16 }
 0x773   :  { %v7539_v36 = vpop.eup %7538 }
 0x774   :  { %v5701_v22 = vadd.f32 1.0, %v7539_v36 }
 0x776   :  { %7540 = vrcp.f32 %v5701_v22 }
 0x780   :  { %v7541_v10 = vpop.eup %7540 }
 0x781   :  { %v5703_v40 = vpack.c.bf16 %v7541_v10, %v7541_v10 }
 0x783   :  { %6126 = vmatmul.mubr.bf16.vlgmr.msra.gmra.mrb[56].mxu1 %v5703_v40  ;;  %6167 = vmatmul.mubr.bf16.vlgmr.msra.gmra.mrb[44].mxu0 %v5703_v40 }
 0x784   :  { %6176 = vmatpush1.bf16.msra.mxu1 %v7498_v34  ;;  %6869 = vmatpush3.bf16.msra.mxu0 %v7501_v4 }
 0x785   :  { %6177 = vmatprep.subr.bf16.mxu1 %v7504_v11  ;;  %6870 = vmatprep.subr.bf16.mxu0 %v8252_v46 }
 0x786   :  { %6207 = vmatprep.mubr.bf16.mxu1 %v7940_v0  ;;  %6884 = vmatprep.mubr.msk.bf16.mxu0 %vm7943_vm2, %v8252_v46  ;;  %v7514_v0 = vld [vmem:[#allocation22 + $0xf0] ss:$28 sps:$4 sm:$0xff]  }
 0x788   :  { %6178 = vmatpush1.bf16.msra.mxu1 %v7502_v1  ;;  %6871 = vmatpush3.bf16.msra.mxu0 %v7505_v15 }
 0x789   :  { %6179 = vmatprep.subr.bf16.mxu1 %v7508_v14  ;;  %6872 = vmatprep.subr.bf16.mxu0 %v8252_v46 }
 0x78c   :  { %6180 = vmatpush1.bf16.msra.mxu1 %v7506_v6  ;;  %6873 = vmatpush3.bf16.msra.mxu0 %v7509_v9 }
 0x78d   :  { %6181 = vmatprep.subr.bf16.mxu1 %v7512_v45  ;;  %6874 = vmatprep.subr.bf16.mxu0 %v8252_v46 }
 0x790   :  { %6182 = vmatpush1.bf16.msra.mxu1 %v7510_v51  ;;  %6875 = vmatpush3.bf16.msra.mxu0 %v7513_v58 }
 0x791   :  { %6183 = vmatprep.subr.bf16.mxu1 %v7516_v55  ;;  %6876 = vmatprep.subr.bf16.mxu0 %v8252_v46 }
 0x794   :  { %6184 = vmatpush1.bf16.msra.mxu1 %v7514_v0  ;;  %6877 = vmatpush3.bf16.msra.mxu0 %v7517_v5 }
 0x795   :  { %6185 = vmatprep.subr.bf16.mxu1 %v7520_v20  ;;  %6878 = vmatprep.subr.bf16.mxu0 %v8252_v46 }
 0x798   :  { %6186 = vmatpush1.bf16.msra.mxu1 %v7518_v53  ;;  %6879 = vmatpush3.bf16.msra.mxu0 %v7521_v21 }
 0x799   :  { %6187 = vmatprep.subr.bf16.mxu1 %v7524_v61  ;;  %6880 = vmatprep.subr.bf16.mxu0 %v8252_v46 }
 0x79c   :  { %6188 = vmatpush1.bf16.msra.mxu1 %v7522_v54  ;;  %6881 = vmatpush3.bf16.msra.mxu0 %v7525_v33 }
 0x79d   :  { %6189 = vmatprep.subr.bf16.mxu1 %v7528_v41  ;;  %6882 = vmatprep.subr.bf16.mxu0 %v8252_v46 }
 0x7a0   :  { %6190 = vmatpush1.bf16.msra.mxu1 %v7526_v32  ;;  %6883 = vmatpush3.bf16.msra.mxu0 %v7529_v43 }
 0x7a3   :  { %6208 = vmatmul.mubr.bf16.vlgmr.msra.gmra.mrb[60].mxu1 %v5703_v40  ;;  %6885 = vmatmul.mubr.bf16.vlgmr.msra.gmra.mrb[48].mxu0 %v5703_v40 }
 0x7a4   :  { %7868 = shalt.err (!%p7865_p10)
}
 0x7a5   :  { %s7869_s24 = scalar_lea.hbm %s9117_s14, 128 }
 0x7a6   :  { %p7870_p11 = scmp.ne.s32.totalorder %s9117_s14, %s7869_s24  ;;  %p7873_p12 = scmp.lt.u32.totalorder %s7869_s24, %s9117_s14 }
 0x7a8   :  { %p7875_p13 = pnand %p7873_p12, %p7870_p11 }
 0x7aa   :  { %7878 = shalt.err (!%p7875_p13)
}
 0x7ab   :  { %6359 = dma.vmem_to_hbm [thread:$0]  %s6357_s6, 128, %s9117_s14, [#allocation27]   ;;  %v5768_v46 = vld [vmem:[#allocation24] sm:$0x7f]  ;;  %v5788_v28 = vsub.s32 4, %v8270_v52  ;;  %v5796_v16 = vsub.s32 6, %v8270_v52 }
 0x7ac   :  { %v5773_v35 = vrot.slane %v5768_v46, %v8276_v56  ;;  %v5781_v59 = vrot.slane %v5768_v46, %v8295_v17  ;;  %v5777_v42 = vrot.slane %v5768_v46, %v8282_v60  ;;  %v5785_v19 = vrot.slane %v5768_v46, %v8306_v27  ;;  %s7945_s14 = smov [#allocation25]  }
 0x7ad   :  { %v5792_v36 = vsub.s32 5, %v8270_v52  ;;  %v5789_v22 = vrot.slane %v5768_v46, %v5788_v28  ;;  %v5797_v10 = vrot.slane %v5768_v46, %v5796_v16  ;;  %vm6334_vm5 = vcmask 1041408   ;;  %s6346_s0 = sshll.u32 %s7945_s14, 4  ;;  %s6347_s0 = int_to_ptr.vmem [resolvable:$true] %s6346_s0 }
 0x7ae   :  { %vm6335_vm6 = vcmask 1043458   ;;  %vm6337_vm8 = vcmask 128004   ;;  %s7879_s4 = scalar_lea.vmem %s6347_s0, 224  ;;  %p7884_p1 = scmp.lt.s32.totalorder %s6347_s0, %s6347_s0 }
 0x7af   :  { %v5793_v4 = vrot.slane %v5768_v46, %v5792_v36  ;;  %vm6336_vm7 = vmor %vm6335_vm6, %vm6334_vm5  ;;  %p7880_p0 = scmp.ne.s32.totalorder %s6347_s0, %s7879_s4  ;;  %p7885_p2 = scmp.lt.s32.totalorder %s7879_s4, %s7879_s4 }
 0x7b0   :  { %vm6338_vm9 = vmor %vm6337_vm8, %vm6336_vm7 }
 0x7b1   :  { %p7886_p3 = por %p7885_p2, %p7884_p1 }
 0x7b3   :  { %p7887_p4 = pnand %p7886_p3, %p7880_p0 }
 0x856   :  { %v6127_v49 = vpop.f32.mrb[56].mxu1  ;;  %v6168_v44 = vpop.f32.mrb[44].mxu0 }
 0x857   :  { %v6128_v25 = vadd.f32 %v6127_v49, %v5773_v35  ;;  %v6169_v47 = vadd.f32 %v6168_v44, %v5781_v59  ;;  %v6129_v39 = vpop.f32.mrb[57].mxu1  ;;  %v6170_v50 = vpop.f32.mrb[45].mxu0 }
 0x858   :  { %v6130_v7 = vadd.f32 %v6129_v39, %v5777_v42  ;;  %v6171_v26 = vadd.f32 %v6170_v50, %v5785_v19  ;;  %v6131_v63 = vpop.f32.mrb[58].mxu1  ;;  %v6172_v24 = vpop.f32.mrb[46].mxu0 }
 0x859   :  { %v6256_v57 = vsub.f32 0.0, %v6128_v25  ;;  %v6258_v18 = vsub.f32 0.0, %v6169_v47  ;;  %v6132_v23 = vpop.f32.mrb[59].mxu1  ;;  %v6173_v56 = vpop.f32.mrb[47].mxu0 }
 0x85a   :  { %v6257_v12 = vsub.f32 0.0, %v6130_v7  ;;  %v6259_v17 = vsub.f32 0.0, %v6171_v26 }
 0x85b   :  { %v6263_v2 = vmul.f32 1.442695, %v6256_v57  ;;  %v6267_v60 = vmul.f32 1.442695, %v6258_v18 }
 0x85c   :  { %v6265_v38 = vmul.f32 1.442695, %v6257_v12  ;;  %v6269_v27 = vmul.f32 1.442695, %v6259_v17 }
 0x85d   :  { %7542 = vpow2.f32 %v6263_v2 }
 0x85e   :  { %7544 = vpow2.f32 %v6267_v60 }
 0x85f   :  { %7546 = vpow2.f32 %v6265_v38 }
 0x860   :  { %7548 = vpow2.f32 %v6269_v27 }
 0x867   :  { %v7543_v62 = vpop.eup %7542 }
 0x868   :  { %v7545_v37 = vpop.eup %7544  ;;  %v6277_v13 = vadd.f32 1.0, %v7543_v62 }
 0x869   :  { %v7547_v8 = vpop.eup %7546  ;;  %v6279_v29 = vadd.f32 1.0, %v7545_v37 }
 0x86a   :  { %v7549_v48 = vpop.eup %7548  ;;  %7550 = vrcp.f32 %v6277_v13  ;;  %v6278_v30 = vadd.f32 1.0, %v7547_v8 }
 0x86b   :  { %7552 = vrcp.f32 %v6279_v29  ;;  %v6280_v3 = vadd.f32 1.0, %v7549_v48 }
 0x86c   :  { %7554 = vrcp.f32 %v6278_v30 }
 0x86d   :  { %7556 = vrcp.f32 %v6280_v3 }
 0x874   :  { %v7551_v34 = vpop.eup %7550 }
 0x875   :  { %v7553_v40 = vpop.eup %7552 }
 0x876   :  { %v7555_v11 = vpop.eup %7554  ;;  %v6209_v1 = vpop.f32.mrb[60].mxu1 }
 0x877   :  { %v6250_v15 = vpop.f32.mrb[48].mxu0  ;;  %v7557_v14 = vpop.eup %7556  ;;  %v6210_v6 = vadd.f32 %v6209_v1, %v5789_v22  ;;  %v6298_v58 = vcombine.low %v7551_v34, %v7555_v11 }
 0x878   :  { %v6251_v9 = vadd.f32 %v6250_v15, %v5797_v10  ;;  %v6211_v45 = vpop.f32.mrb[61].mxu1  ;;  %v6886_v51 = vpop.f32.mrb[49].mxu0  ;;  %v6299_v20 = vcombine.low %v7553_v40, %v7557_v14 }
 0x879   :  { %v6212_v55 = vadd.f32 %v6211_v45, %v5793_v4  ;;  %v6213_v0 = vpop.f32.mrb[62].mxu1  ;;  %v6253_v5 = vpop.f32.mrb[50].mxu0  ;;  %v6260_v53 = vsub.f32 0.0, %v6210_v6  ;;  %v6306_v54 = vrot.slane %v6298_v58, %v8314_v31 }
 0x87a   :  { %v6262_v52 = vsub.f32 0.0, %v6251_v9  ;;  %v6214_v21 = vpop.f32.mrb[63].mxu1  ;;  %v6887_v61 = vpop.f32.mrb[51].mxu0  ;;  %v6313_v41 = vrot.slane %v6299_v20, %v8314_v31 }
 0x87b   :  { %v6261_v33 = vsub.f32 0.0, %v6212_v55  ;;  %v6271_v32 = vmul.f32 1.442695, %v6260_v53 }
 0x87c   :  { %v6275_v43 = vmul.f32 1.442695, %v6262_v52  ;;  %v6314_v35 = vcombine.low %v6306_v54, %v6313_v41 }
 0x87d   :  { %v6273_v46 = vmul.f32 1.442695, %v6261_v33  ;;  %7558 = vpow2.f32 %v6271_v32 }
 0x87e   :  { %7560 = vpow2.f32 %v6275_v43  ;;  %6333 = vst [vmem:[#allocation25] sm:$0xff] %v6314_v35 }
 0x87f   :  { %7562 = vpow2.f32 %v6273_v46 }
 0x887   :  { %v7559_v59 = vpop.eup %7558 }
 0x888   :  { %v7561_v42 = vpop.eup %7560  ;;  %v6281_v19 = vadd.f32 1.0, %v7559_v59 }
 0x889   :  { %v7563_v49 = vpop.eup %7562  ;;  %v6283_v44 = vadd.f32 1.0, %v7561_v42 }
 0x88a   :  { %7564 = vrcp.f32 %v6281_v19  ;;  %v6282_v25 = vadd.f32 1.0, %v7563_v49 }
 0x88b   :  { %7566 = vrcp.f32 %v6283_v44 }
 0x88c   :  { %7568 = vrcp.f32 %v6282_v25 }
 0x894   :  { %v7565_v47 = vpop.eup %7564 }
 0x895   :  { %v7567_v39 = vpop.eup %7566 }
 0x896   :  { %v7569_v50 = vpop.eup %7568  ;;  %v6329_v63 = vrot.slane %v7567_v39, %v8314_v31 }
 0x897   :  { %v6315_v7 = vcombine.low %v7565_v47, %v7569_v50 }
 0x899   :  { %v6322_v26 = vrot.slane %v6315_v7, %v8314_v31 }
 0x89b   :  { %v6330_v24 = vcombine.low %v6322_v26, %v6329_v63 }
 0x89d   :  { %6339 = vst.msk [vmem:[#allocation25 + $0x8] sm:$0x3f] %vm6338_vm9, %v6330_v24 }
 0x89e   :  { %7890 = shalt.err (!%p7887_p4)
}
 0x89f   :  { %s7891_s28 = scalar_lea.hbm %s9116_s13, 224 }
 0x8a0   :  { %p7892_p5 = scmp.ne.s32.totalorder %s9116_s13, %s7891_s28  ;;  %p7895_p6 = scmp.lt.u32.totalorder %s7891_s28, %s9116_s13 }
 0x8a2   :  { %p7897_p7 = pnand %p7895_p6, %p7892_p5 }
 0x8a4   :  { %7900 = shalt.err (!%p7897_p7)
}
 0x8a5   :  { %6349 = dma.vmem_to_hbm [thread:$0]  %s6347_s0, 224, %s9116_s13, [#allocation6]  }
 0x8a6   :  { %7915 = dma.done.wait [#allocation6], 224  }
 0x8a7   :  { %7916 = vsyncadd [#allocation6], 4294967072 }
 0x8a8   :  { %7917 = dma.done.wait [#allocation27], 128  }
 0x8a9   :  { %7918 = vsyncadd [#allocation27], 4294967168 }
 0x8aa   :  { %6366 = vsyncpa [#allocation5], 1 }
 0x8ab   :  { %6367 = vsyncpa [#allocation8], 1 }
 0x8ac   :  { %6368 = vsyncpa [#allocation11], 1 }
 0x8ad   :  { %6369 = vsyncpa [#allocation14], 1 }
 0x8ae   :  { %6370 = vsyncpa [#allocation17], 1 }
 0x8af   :  { %6371 = vsyncpa [#allocation20], 1 }
 0x8b0   :  { %6372 = vsyncpa [#allocation23], 1 }
 0x8b1   :  { %6373 = vsyncpa [#allocation6], 1 }
 0x8b2   :  { %6374 = vsyncpa [#allocation27], 1 }

</bundles_post_ra>
